<compile_context>
chip_gen: v7x
topology: tpu7x:2x2x1
jax: 0.10.0
libtpu: 0.0.40
codegen_flags: <defaults>
</compile_context>

<pallas_src>
import functools

import jax
import jax.numpy as jnp
from jax import lax
from jax.experimental import pallas as pl
from jax.experimental.pallas import tpu as pltpu


def _shift_flat(v, sh):
    """result[:, q] = v[:, q + sh] if 0 <= q + sh < L else 0  (static sh)."""
    if sh == 0:
        return v
    c, L = v.shape
    fill = jnp.zeros((c, abs(sh)), v.dtype)
    if sh > 0:
        return jnp.concatenate([v[:, sh:], fill], axis=1)
    return jnp.concatenate([fill, v[:, :L + sh]], axis=1)


def _fused_kernel(x_ref, w1_ref, w2_ref, pos_ref, g_ref, b_ref, o_ref,
                  z_sc, sum_sc, sq_sc, *,
                  k, s, D, H, W, c_out, slope, eps, inv_count):
    phase = pl.program_id(0)      # 0: compute conv1->conv2->stats, 1: BN apply
    n = pl.program_id(1)          # batch element
    p, pd = k // 2, s // 2
    HW = H * W

    @pl.when((phase == 0) & (n == 0))
    def _init_stats():
        sum_sc[...] = jnp.zeros_like(sum_sc)
        sq_sc[...] = jnp.zeros_like(sq_sc)

    @pl.when(phase == 0)
    def _compute():
        x = x_ref[...]                                   # (c_in, D*H*W)
        x = jnp.where(x >= 0, x, slope * x)              # LeakyReLU(0.2)
        L = x.shape[1]

        pos = pos_ref[...]                               # (3, D*H*W) int32
        dpos = pos[0:1, :]
        ypos = pos[1:2, :]
        xpos = pos[2:3, :]

        # ---- conv1: (1, k, k) spatial conv, "same" padding, no bias -------
        # Each tap is a zero-filled lane shift of the flat slab + boundary
        # mask, contracted on the MXU as (c_out, c_in) x (c_in, D*H*W).
        acc1 = jnp.zeros((c_out, L), jnp.float32)
        for ky in range(k):
            dy = ky - p
            for kx in range(k):
                dx = kx - p
                col = _shift_flat(x, dy * W + dx)
                if (dy, dx) != (0, 0):
                    valid = ((ypos + dy >= 0) & (ypos + dy < H) &
                             (xpos + dx >= 0) & (xpos + dx < W))
                    col = jnp.where(valid, col, 0.0)
                acc1 = acc1 + lax.dot_general(
                    w1_ref[ky * k + kx], col, (((1,), (0,)), ((), ())),
                    preferred_element_type=jnp.float32)

        # ---- conv2: (s, 1, 1) spectral conv, "same" padding, no bias ------
        acc2 = jnp.zeros((c_out, L), jnp.float32)
        for kd in range(s):
            dd = kd - pd
            ycol = _shift_flat(acc1, dd * HW)            # shift is a multiple of H*W
            if dd != 0:
                validd = (dpos + dd >= 0) & (dpos + dd < D)
                ycol = jnp.where(validd, ycol, 0.0)
            acc2 = acc2 + lax.dot_general(
                w2_ref[kd], ycol, (((1,), (0,)), ((), ())),
                preferred_element_type=jnp.float32)

        # Pre-BN activations stay VMEM-resident; accumulate BN statistics.
        z_sc[n] = acc2
        sum_sc[...] += jnp.sum(acc2, axis=1, keepdims=True)
        sq_sc[...] += jnp.sum(acc2 * acc2, axis=1, keepdims=True)

    @pl.when(phase == 1)
    def _bn_apply():
        # TODO(synk): E[x^2]-E[x]^2 in f32 can cancel at very large N*D*H*W;
        # switch to a centered second pass over the VMEM-resident z if needed.
        mean = sum_sc[...] * inv_count                   # (c_out, 1)
        var = sq_sc[...] * inv_count - mean * mean
        rstd = lax.rsqrt(var + eps)
        scale = g_ref[...] * rstd
        shift = b_ref[...] - mean * scale
        o_ref[...] = (z_sc[n] * scale + shift).astype(o_ref.dtype)


def leaky_conv_bn(x_ncdhw, w1, w2, gamma, beta, *, negative_slope=0.2, eps=1e-5):
    # x : (N, c_in, D, H, W)
    # w1: (c_out, c_in, 1, spa_s, spa_s)    spatial conv weight
    # w2: (c_out, c_out, spe_s, 1, 1)       spectral conv weight
    N, c_in, D, H, W = x_ncdhw.shape
    c_out = int(w1.shape[0])
    k = int(w1.shape[-1])
    s = int(w2.shape[2])
    # TODO(synk): even spa_s/spe_s (output size != input size) are not handled
    # by the fused flat-layout kernel; NAS search spaces use odd sizes.
    assert k % 2 == 1 and s % 2 == 1, "kernel sizes must be odd ('same' padding)"
    L = D * H * W

    # Free reshape (NCDHW is already channel-major over a contiguous D*H*W).
    x = x_ncdhw.reshape(N, c_in, L).astype(jnp.float32)

    # w1t[ky*k+kx, co, ci] = w1[co, ci, 0, ky, kx]
    w1t = jnp.transpose(w1[:, :, 0], (2, 3, 0, 1)).reshape(k * k, c_out, c_in)
    w1t = w1t.astype(jnp.float32)
    # w2t[kd, co, c1] = w2[co, c1, kd, 0, 0]
    w2t = jnp.transpose(w2[:, :, :, 0, 0], (2, 0, 1)).astype(jnp.float32)

    g = gamma.reshape(c_out, 1).astype(jnp.float32)
    b = beta.reshape(c_out, 1).astype(jnp.float32)

    # Flat-position (d, y, x) indices, computed once in the wrapper so the
    # kernel needs no vector integer div/mod.
    d_idx, y_idx, x_idx = jnp.meshgrid(
        jnp.arange(D, dtype=jnp.int32), jnp.arange(H, dtype=jnp.int32),
        jnp.arange(W, dtype=jnp.int32), indexing="ij")
    pos = jnp.stack(
        [d_idx.reshape(-1), y_idx.reshape(-1), x_idx.reshape(-1)], axis=0)

    kernel = functools.partial(
        _fused_kernel, k=k, s=s, D=D, H=H, W=W, c_out=c_out,
        slope=float(negative_slope), eps=float(eps),
        inv_count=1.0 / float(N * L))

    out_flat = pl.pallas_call(
        kernel,
        out_shape=jax.ShapeDtypeStruct((N, c_out, L), jnp.float32),
        grid=(2, N),
        in_specs=[
            # x: block n in phase 0, parked on block 0 in phase 1 (unused).
            pl.BlockSpec((None, c_in, L), lambda ph, n: (n * (1 - ph), 0, 0)),
            pl.BlockSpec((k * k, c_out, c_in), lambda ph, n: (0, 0, 0)),
            pl.BlockSpec((s, c_out, c_out), lambda ph, n: (0, 0, 0)),
            pl.BlockSpec((3, L), lambda ph, n: (0, 0)),
            pl.BlockSpec((c_out, 1), lambda ph, n: (0, 0)),
            pl.BlockSpec((c_out, 1), lambda ph, n: (0, 0)),
        ],
        # Output only written in phase 1; phase 0 parks on block 0 so no
        # spurious write-backs happen before real data is produced.
        out_specs=pl.BlockSpec((None, c_out, L), lambda ph, n: (n * ph, 0, 0)),
        scratch_shapes=[
            pltpu.VMEM((N, c_out, L), jnp.float32),   # pre-BN activations z
            pltpu.VMEM((c_out, 1), jnp.float32),      # per-channel sum(z)
            pltpu.VMEM((c_out, 1), jnp.float32),      # per-channel sum(z^2)
        ],
        compiler_params=pltpu.CompilerParams(
            dimension_semantics=("arbitrary", "arbitrary")),
    )(x, w1t, w2t, pos, g, b)

    return out_flat.reshape(N, c_out, D, H, W)          # NCDHW, free reshape


# ---------------------------------------------------------------------------
# Pure-JAX reference for correctness checking.
# ---------------------------------------------------------------------------
def reference(x, w1, w2, gamma, beta, eps=1e-5, slope=0.2):
    y = jnp.where(x >= 0, x, slope * x)
    dn = ("NCDHW", "OIDHW", "NCDHW")
    p = w1.shape[-1] // 2
    pd = w2.shape[2] // 2
    y = lax.conv_general_dilated(y, w1, (1, 1, 1),
                                 [(0, 0), (p, p), (p, p)], dimension_numbers=dn)
    y = lax.conv_general_dilated(y, w2, (1, 1, 1),
                                 [(pd, pd), (0, 0), (0, 0)], dimension_numbers=dn)
    mean = y.mean(axis=(0, 2, 3, 4), keepdims=True)
    var = y.var(axis=(0, 2, 3, 4), keepdims=True)
    g = gamma.reshape(1, -1, 1, 1, 1)
    b = beta.reshape(1, -1, 1, 1, 1)
    return (y - mean) * g / jnp.sqrt(var + eps) + b


if __name__ == "__main__":
    key = jax.random.PRNGKey(0)
    k1, k2, k3, k4, k5 = jax.random.split(key, 5)

    # small shapes consistent with the module's NCDHW Conv3d forward
    N, c_in, c_out, D, H, W = 2, 4, 8, 8, 16, 16
    spa_s, spe_s = 3, 3

    x = jax.random.normal(k1, (N, c_in, D, H, W), jnp.float32)
    w1 = 0.2 * jax.random.normal(k2, (c_out, c_in, 1, spa_s, spa_s), jnp.float32)
    w2 = 0.2 * jax.random.normal(k3, (c_out, c_out, spe_s, 1, 1), jnp.float32)
    gamma = 1.0 + 0.1 * jax.random.normal(k4, (c_out,), jnp.float32)
    beta = 0.1 * jax.random.normal(k5, (c_out,), jnp.float32)

    out = leaky_conv_bn(x, w1, w2, gamma, beta)
    out = jax.block_until_ready(out)

    ref = reference(x, w1, w2, gamma, beta)
    assert out.shape == ref.shape, (out.shape, ref.shape)
    err = float(jnp.max(jnp.abs(out - ref)))
    if not err < 2e-3:
        raise AssertionError(f"mismatch: max abs err = {err}")
    print("KERNEL_OK")
</pallas_src>

<mosaic_0001>
module attributes {stable_mosaic.version = 11 : i64} {
  func.func @_fused_kernel(%arg0: i32, %arg1: i32, %arg2: memref<1x4x2048xf32, #tpu.memory_space<vmem>>, %arg3: memref<9x8x4xf32, #tpu.memory_space<vmem>>, %arg4: memref<3x8x8xf32, #tpu.memory_space<vmem>>, %arg5: memref<3x2048xi32, #tpu.memory_space<vmem>>, %arg6: memref<8x1xf32, #tpu.memory_space<vmem>>, %arg7: memref<8x1xf32, #tpu.memory_space<vmem>>, %arg8: memref<1x8x2048xf32, #tpu.memory_space<vmem>>, %arg9: memref<2x8x2048xf32, #tpu.memory_space<vmem>>, %arg10: memref<8x1xf32, #tpu.memory_space<vmem>>, %arg11: memref<8x1xf32, #tpu.memory_space<vmem>>) attributes {dimension_semantics = [#tpu.dimension_semantics<arbitrary>, #tpu.dimension_semantics<arbitrary>], iteration_bounds = array<i64: 2, 2>, scalar_prefetch = 0 : i64, scratch_operands = 3 : i64, tpu.core_type = #tpu.core_type<tc>, window_params = [{transform_indices = @transform_0, window_bounds = array<i64: 1, 4, 2048>}, {pipeline_mode = #tpu.pipeline_mode<synchronous>, transform_indices = @transform_1, window_bounds = array<i64: 9, 8, 4>}, {pipeline_mode = #tpu.pipeline_mode<synchronous>, transform_indices = @transform_2, window_bounds = array<i64: 3, 8, 8>}, {pipeline_mode = #tpu.pipeline_mode<synchronous>, transform_indices = @transform_3, window_bounds = array<i64: 3, 2048>}, {pipeline_mode = #tpu.pipeline_mode<synchronous>, transform_indices = @transform_4, window_bounds = array<i64: 8, 1>}, {pipeline_mode = #tpu.pipeline_mode<synchronous>, transform_indices = @transform_5, window_bounds = array<i64: 8, 1>}, {transform_indices = @transform_6, window_bounds = array<i64: 1, 8, 2048>}]} {
    %c0_i32 = arith.constant 0 : i32
    %0 = arith.cmpi eq, %arg0, %c0_i32 : i32
    %c0_i32_0 = arith.constant 0 : i32
    %1 = arith.cmpi eq, %arg1, %c0_i32_0 : i32
    %2 = arith.andi %0, %1 : i1
    %3 = arith.extui %2 : i1 to i32
    %c0_i32_1 = arith.constant 0 : i32
    %4 = arith.cmpi ne, %3, %c0_i32_1 : i32
    scf.if %4 {
      %cst = arith.constant 0.000000e+00 : f32
      %11 = vector.broadcast %cst : f32 to vector<8x1xf32>
      %c0 = arith.constant 0 : index
      %c0_5 = arith.constant 0 : index
      %12 = vector.load %arg10[%c0, %c0_5] : memref<8x1xf32, #tpu.memory_space<vmem>>, vector<8x1xf32>
      tpu.vector_store %arg10[%c0, %c0_5], %11 {strides = array<i32>} : memref<8x1xf32, #tpu.memory_space<vmem>>, vector<8x1xf32>,
      %cst_6 = arith.constant 0.000000e+00 : f32
      %13 = vector.broadcast %cst_6 : f32 to vector<8x1xf32>
      %c0_7 = arith.constant 0 : index
      %c0_8 = arith.constant 0 : index
      %14 = vector.load %arg11[%c0_7, %c0_8] : memref<8x1xf32, #tpu.memory_space<vmem>>, vector<8x1xf32>
      tpu.vector_store %arg11[%c0_7, %c0_8], %13 {strides = array<i32>} : memref<8x1xf32, #tpu.memory_space<vmem>>, vector<8x1xf32>,
    } else {
    }
    %c0_i32_2 = arith.constant 0 : i32
    %5 = arith.cmpi eq, %arg0, %c0_i32_2 : i32
    %6 = arith.extui %5 : i1 to i32
    %c0_i32_3 = arith.constant 0 : i32
    %7 = arith.cmpi ne, %6, %c0_i32_3 : i32
    scf.if %7 {
      %c0 = arith.constant 0 : index
      %c0_5 = arith.constant 0 : index
      %c0_6 = arith.constant 0 : index
      %11 = vector.load %arg2[%c0, %c0_5, %c0_6] : memref<1x4x2048xf32, #tpu.memory_space<vmem>>, vector<1x4x2048xf32>
      %12 = vector.shape_cast %11 : vector<1x4x2048xf32> to vector<4x2048xf32>
      %cst = arith.constant 0.000000e+00 : f32
      %13 = vector.broadcast %cst : f32 to vector<4x2048xf32>
      %14 = arith.cmpf oge, %12, %13 : vector<4x2048xf32>
      %cst_7 = arith.constant 2.000000e-01 : f32
      %15 = vector.broadcast %cst_7 : f32 to vector<4x2048xf32>
      %16 = arith.mulf %15, %12 : vector<4x2048xf32>
      %17 = arith.select %14, %12, %16 : vector<4x2048xi1>, vector<4x2048xf32>
      %c0_8 = arith.constant 0 : index
      %c0_9 = arith.constant 0 : index
      %18 = vector.load %arg5[%c0_8, %c0_9] : memref<3x2048xi32, #tpu.memory_space<vmem>>, vector<3x2048xi32>
      %19 = vector.extract_strided_slice %18 {offsets = [0, 0], sizes = [1, 2048], strides = [1, 1]} : vector<3x2048xi32> to vector<1x2048xi32>
      %20 = vector.extract_strided_slice %18 {offsets = [1, 0], sizes = [1, 2048], strides = [1, 1]} : vector<3x2048xi32> to vector<1x2048xi32>
      %21 = vector.extract_strided_slice %18 {offsets = [2, 0], sizes = [1, 2048], strides = [1, 1]} : vector<3x2048xi32> to vector<1x2048xi32>
      %cst_10 = arith.constant 0.000000e+00 : f32
      %22 = vector.broadcast %cst_10 : f32 to vector<8x2048xf32>
      %cst_11 = arith.constant 0.000000e+00 : f32
      %23 = vector.broadcast %cst_11 : f32 to vector<4x17xf32>
      %24 = vector.extract_strided_slice %17 {offsets = [0, 0], sizes = [4, 2031], strides = [1, 1]} : vector<4x2048xf32> to vector<4x2031xf32>
      %25 = tpu.concatenate %23, %24 in 1 : vector<4x17xf32>, vector<4x2031xf32> -> vector<4x2048xf32>
      %c-1_i32 = arith.constant -1 : i32
      %26 = vector.broadcast %c-1_i32 : i32 to vector<1x2048xi32>
      %27 = arith.addi %20, %26 : vector<1x2048xi32>
      %c0_i32_12 = arith.constant 0 : i32
      %28 = vector.broadcast %c0_i32_12 : i32 to vector<1x2048xi32>
      %29 = arith.cmpi sge, %27, %28 : vector<1x2048xi32>
      %c-1_i32_13 = arith.constant -1 : i32
      %30 = vector.broadcast %c-1_i32_13 : i32 to vector<1x2048xi32>
      %31 = arith.addi %20, %30 : vector<1x2048xi32>
      %c16_i32 = arith.constant 16 : i32
      %32 = vector.broadcast %c16_i32 : i32 to vector<1x2048xi32>
      %33 = arith.cmpi slt, %31, %32 : vector<1x2048xi32>
      %34 = arith.andi %29, %33 : vector<1x2048xi1>
      %c-1_i32_14 = arith.constant -1 : i32
      %35 = vector.broadcast %c-1_i32_14 : i32 to vector<1x2048xi32>
      %36 = arith.addi %21, %35 : vector<1x2048xi32>
      %c0_i32_15 = arith.constant 0 : i32
      %37 = vector.broadcast %c0_i32_15 : i32 to vector<1x2048xi32>
      %38 = arith.cmpi sge, %36, %37 : vector<1x2048xi32>
      %39 = arith.andi %34, %38 : vector<1x2048xi1>
      %c-1_i32_16 = arith.constant -1 : i32
      %40 = vector.broadcast %c-1_i32_16 : i32 to vector<1x2048xi32>
      %41 = arith.addi %21, %40 : vector<1x2048xi32>
      %c16_i32_17 = arith.constant 16 : i32
      %42 = vector.broadcast %c16_i32_17 : i32 to vector<1x2048xi32>
      %43 = arith.cmpi slt, %41, %42 : vector<1x2048xi32>
      %44 = arith.andi %39, %43 : vector<1x2048xi1>
      %cst_18 = arith.constant 0.000000e+00 : f32
      %45 = vector.shape_cast %44 : vector<1x2048xi1> to vector<1x2048xi1>
      %46 = vector.broadcast %45 : vector<1x2048xi1> to vector<4x2048xi1>
      %47 = vector.broadcast %cst_18 : f32 to vector<4x2048xf32>
      %48 = arith.select %46, %25, %47 : vector<4x2048xi1>, vector<4x2048xf32>
      %c0_19 = arith.constant 0 : index
      %c0_20 = arith.constant 0 : index
      %c0_21 = arith.constant 0 : index
      %49 = vector.load %arg3[%c0_19, %c0_20, %c0_21] : memref<9x8x4xf32, #tpu.memory_space<vmem>>, vector<1x8x4xf32>
      %50 = vector.shape_cast %49 : vector<1x8x4xf32> to vector<8x4xf32>
      %cst_22 = arith.constant dense<0.000000e+00> : vector<8x2048xf32>
      %51 = tpu.matmul %50, %48, %cst_22 {dimension_numbers = #tpu.dot_dimension_numbers<[1], [0], [0], [1], [0, 0, 1, 1], [], []>} : vector<8x4xf32>, vector<4x2048xf32>, vector<8x2048xf32> -> vector<8x2048xf32>
      %52 = arith.addf %22, %51 : vector<8x2048xf32>
      %cst_23 = arith.constant 0.000000e+00 : f32
      %53 = vector.broadcast %cst_23 : f32 to vector<4x16xf32>
      %54 = vector.extract_strided_slice %17 {offsets = [0, 0], sizes = [4, 2032], strides = [1, 1]} : vector<4x2048xf32> to vector<4x2032xf32>
      %55 = tpu.concatenate %53, %54 in 1 : vector<4x16xf32>, vector<4x2032xf32> -> vector<4x2048xf32>
      %c-1_i32_24 = arith.constant -1 : i32
      %56 = vector.broadcast %c-1_i32_24 : i32 to vector<1x2048xi32>
      %57 = arith.addi %20, %56 : vector<1x2048xi32>
      %c0_i32_25 = arith.constant 0 : i32
      %58 = vector.broadcast %c0_i32_25 : i32 to vector<1x2048xi32>
      %59 = arith.cmpi sge, %57, %58 : vector<1x2048xi32>
      %c-1_i32_26 = arith.constant -1 : i32
      %60 = vector.broadcast %c-1_i32_26 : i32 to vector<1x2048xi32>
      %61 = arith.addi %20, %60 : vector<1x2048xi32>
      %c16_i32_27 = arith.constant 16 : i32
      %62 = vector.broadcast %c16_i32_27 : i32 to vector<1x2048xi32>
      %63 = arith.cmpi slt, %61, %62 : vector<1x2048xi32>
      %64 = arith.andi %59, %63 : vector<1x2048xi1>
      %c0_i32_28 = arith.constant 0 : i32
      %65 = vector.broadcast %c0_i32_28 : i32 to vector<1x2048xi32>
      %66 = arith.addi %21, %65 : vector<1x2048xi32>
      %c0_i32_29 = arith.constant 0 : i32
      %67 = vector.broadcast %c0_i32_29 : i32 to vector<1x2048xi32>
      %68 = arith.cmpi sge, %66, %67 : vector<1x2048xi32>
      %69 = arith.andi %64, %68 : vector<1x2048xi1>
      %c0_i32_30 = arith.constant 0 : i32
      %70 = vector.broadcast %c0_i32_30 : i32 to vector<1x2048xi32>
      %71 = arith.addi %21, %70 : vector<1x2048xi32>
      %c16_i32_31 = arith.constant 16 : i32
      %72 = vector.broadcast %c16_i32_31 : i32 to vector<1x2048xi32>
      %73 = arith.cmpi slt, %71, %72 : vector<1x2048xi32>
      %74 = arith.andi %69, %73 : vector<1x2048xi1>
      %cst_32 = arith.constant 0.000000e+00 : f32
      %75 = vector.shape_cast %74 : vector<1x2048xi1> to vector<1x2048xi1>
      %76 = vector.broadcast %75 : vector<1x2048xi1> to vector<4x2048xi1>
      %77 = vector.broadcast %cst_32 : f32 to vector<4x2048xf32>
      %78 = arith.select %76, %55, %77 : vector<4x2048xi1>, vector<4x2048xf32>
      %c1 = arith.constant 1 : index
      %c0_33 = arith.constant 0 : index
      %c0_34 = arith.constant 0 : index
      %79 = vector.load %arg3[%c1, %c0_33, %c0_34] : memref<9x8x4xf32, #tpu.memory_space<vmem>>, vector<1x8x4xf32>
      %80 = vector.shape_cast %79 : vector<1x8x4xf32> to vector<8x4xf32>
      %cst_35 = arith.constant dense<0.000000e+00> : vector<8x2048xf32>
      %81 = tpu.matmul %80, %78, %cst_35 {dimension_numbers = #tpu.dot_dimension_numbers<[1], [0], [0], [1], [0, 0, 1, 1], [], []>} : vector<8x4xf32>, vector<4x2048xf32>, vector<8x2048xf32> -> vector<8x2048xf32>
      %82 = arith.addf %52, %81 : vector<8x2048xf32>
      %cst_36 = arith.constant 0.000000e+00 : f32
      %83 = vector.broadcast %cst_36 : f32 to vector<4x15xf32>
      %84 = vector.extract_strided_slice %17 {offsets = [0, 0], sizes = [4, 2033], strides = [1, 1]} : vector<4x2048xf32> to vector<4x2033xf32>
      %85 = tpu.concatenate %83, %84 in 1 : vector<4x15xf32>, vector<4x2033xf32> -> vector<4x2048xf32>
      %c-1_i32_37 = arith.constant -1 : i32
      %86 = vector.broadcast %c-1_i32_37 : i32 to vector<1x2048xi32>
      %87 = arith.addi %20, %86 : vector<1x2048xi32>
      %c0_i32_38 = arith.constant 0 : i32
      %88 = vector.broadcast %c0_i32_38 : i32 to vector<1x2048xi32>
      %89 = arith.cmpi sge, %87, %88 : vector<1x2048xi32>
      %c-1_i32_39 = arith.constant -1 : i32
      %90 = vector.broadcast %c-1_i32_39 : i32 to vector<1x2048xi32>
      %91 = arith.addi %20, %90 : vector<1x2048xi32>
      %c16_i32_40 = arith.constant 16 : i32
      %92 = vector.broadcast %c16_i32_40 : i32 to vector<1x2048xi32>
      %93 = arith.cmpi slt, %91, %92 : vector<1x2048xi32>
      %94 = arith.andi %89, %93 : vector<1x2048xi1>
      %c1_i32_41 = arith.constant 1 : i32
      %95 = vector.broadcast %c1_i32_41 : i32 to vector<1x2048xi32>
      %96 = arith.addi %21, %95 : vector<1x2048xi32>
      %c0_i32_42 = arith.constant 0 : i32
      %97 = vector.broadcast %c0_i32_42 : i32 to vector<1x2048xi32>
      %98 = arith.cmpi sge, %96, %97 : vector<1x2048xi32>
      %99 = arith.andi %94, %98 : vector<1x2048xi1>
      %c1_i32_43 = arith.constant 1 : i32
      %100 = vector.broadcast %c1_i32_43 : i32 to vector<1x2048xi32>
      %101 = arith.addi %21, %100 : vector<1x2048xi32>
      %c16_i32_44 = arith.constant 16 : i32
      %102 = vector.broadcast %c16_i32_44 : i32 to vector<1x2048xi32>
      %103 = arith.cmpi slt, %101, %102 : vector<1x2048xi32>
      %104 = arith.andi %99, %103 : vector<1x2048xi1>
      %cst_45 = arith.constant 0.000000e+00 : f32
      %105 = vector.shape_cast %104 : vector<1x2048xi1> to vector<1x2048xi1>
      %106 = vector.broadcast %105 : vector<1x2048xi1> to vector<4x2048xi1>
      %107 = vector.broadcast %cst_45 : f32 to vector<4x2048xf32>
      %108 = arith.select %106, %85, %107 : vector<4x2048xi1>, vector<4x2048xf32>
      %c2 = arith.constant 2 : index
      %c0_46 = arith.constant 0 : index
      %c0_47 = arith.constant 0 : index
      %109 = vector.load %arg3[%c2, %c0_46, %c0_47] : memref<9x8x4xf32, #tpu.memory_space<vmem>>, vector<1x8x4xf32>
      %110 = vector.shape_cast %109 : vector<1x8x4xf32> to vector<8x4xf32>
      %cst_48 = arith.constant dense<0.000000e+00> : vector<8x2048xf32>
      %111 = tpu.matmul %110, %108, %cst_48 {dimension_numbers = #tpu.dot_dimension_numbers<[1], [0], [0], [1], [0, 0, 1, 1], [], []>} : vector<8x4xf32>, vector<4x2048xf32>, vector<8x2048xf32> -> vector<8x2048xf32>
      %112 = arith.addf %82, %111 : vector<8x2048xf32>
      %cst_49 = arith.constant 0.000000e+00 : f32
      %113 = vector.broadcast %cst_49 : f32 to vector<4x1xf32>
      %114 = vector.extract_strided_slice %17 {offsets = [0, 0], sizes = [4, 2047], strides = [1, 1]} : vector<4x2048xf32> to vector<4x2047xf32>
      %115 = tpu.concatenate %113, %114 in 1 : vector<4x1xf32>, vector<4x2047xf32> -> vector<4x2048xf32>
      %c0_i32_50 = arith.constant 0 : i32
      %116 = vector.broadcast %c0_i32_50 : i32 to vector<1x2048xi32>
      %117 = arith.addi %20, %116 : vector<1x2048xi32>
      %c0_i32_51 = arith.constant 0 : i32
      %118 = vector.broadcast %c0_i32_51 : i32 to vector<1x2048xi32>
      %119 = arith.cmpi sge, %117, %118 : vector<1x2048xi32>
      %c0_i32_52 = arith.constant 0 : i32
      %120 = vector.broadcast %c0_i32_52 : i32 to vector<1x2048xi32>
      %121 = arith.addi %20, %120 : vector<1x2048xi32>
      %c16_i32_53 = arith.constant 16 : i32
      %122 = vector.broadcast %c16_i32_53 : i32 to vector<1x2048xi32>
      %123 = arith.cmpi slt, %121, %122 : vector<1x2048xi32>
      %124 = arith.andi %119, %123 : vector<1x2048xi1>
      %c-1_i32_54 = arith.constant -1 : i32
      %125 = vector.broadcast %c-1_i32_54 : i32 to vector<1x2048xi32>
      %126 = arith.addi %21, %125 : vector<1x2048xi32>
      %c0_i32_55 = arith.constant 0 : i32
      %127 = vector.broadcast %c0_i32_55 : i32 to vector<1x2048xi32>
      %128 = arith.cmpi sge, %126, %127 : vector<1x2048xi32>
      %129 = arith.andi %124, %128 : vector<1x2048xi1>
      %c-1_i32_56 = arith.constant -1 : i32
      %130 = vector.broadcast %c-1_i32_56 : i32 to vector<1x2048xi32>
      %131 = arith.addi %21, %130 : vector<1x2048xi32>
      %c16_i32_57 = arith.constant 16 : i32
      %132 = vector.broadcast %c16_i32_57 : i32 to vector<1x2048xi32>
      %133 = arith.cmpi slt, %131, %132 : vector<1x2048xi32>
      %134 = arith.andi %129, %133 : vector<1x2048xi1>
      %cst_58 = arith.constant 0.000000e+00 : f32
      %135 = vector.shape_cast %134 : vector<1x2048xi1> to vector<1x2048xi1>
      %136 = vector.broadcast %135 : vector<1x2048xi1> to vector<4x2048xi1>
      %137 = vector.broadcast %cst_58 : f32 to vector<4x2048xf32>
      %138 = arith.select %136, %115, %137 : vector<4x2048xi1>, vector<4x2048xf32>
      %c3 = arith.constant 3 : index
      %c0_59 = arith.constant 0 : index
      %c0_60 = arith.constant 0 : index
      %139 = vector.load %arg3[%c3, %c0_59, %c0_60] : memref<9x8x4xf32, #tpu.memory_space<vmem>>, vector<1x8x4xf32>
      %140 = vector.shape_cast %139 : vector<1x8x4xf32> to vector<8x4xf32>
      %cst_61 = arith.constant dense<0.000000e+00> : vector<8x2048xf32>
      %141 = tpu.matmul %140, %138, %cst_61 {dimension_numbers = #tpu.dot_dimension_numbers<[1], [0], [0], [1], [0, 0, 1, 1], [], []>} : vector<8x4xf32>, vector<4x2048xf32>, vector<8x2048xf32> -> vector<8x2048xf32>
      %142 = arith.addf %112, %141 : vector<8x2048xf32>
      %c4 = arith.constant 4 : index
      %c0_62 = arith.constant 0 : index
      %c0_63 = arith.constant 0 : index
      %143 = vector.load %arg3[%c4, %c0_62, %c0_63] : memref<9x8x4xf32, #tpu.memory_space<vmem>>, vector<1x8x4xf32>
      %144 = vector.shape_cast %143 : vector<1x8x4xf32> to vector<8x4xf32>
      %cst_64 = arith.constant dense<0.000000e+00> : vector<8x2048xf32>
      %145 = tpu.matmul %144, %17, %cst_64 {dimension_numbers = #tpu.dot_dimension_numbers<[1], [0], [0], [1], [0, 0, 1, 1], [], []>} : vector<8x4xf32>, vector<4x2048xf32>, vector<8x2048xf32> -> vector<8x2048xf32>
      %146 = arith.addf %142, %145 : vector<8x2048xf32>
      %cst_65 = arith.constant 0.000000e+00 : f32
      %147 = vector.broadcast %cst_65 : f32 to vector<4x1xf32>
      %148 = vector.extract_strided_slice %17 {offsets = [0, 1], sizes = [4, 2047], strides = [1, 1]} : vector<4x2048xf32> to vector<4x2047xf32>
      %149 = tpu.concatenate %148, %147 in 1 : vector<4x2047xf32>, vector<4x1xf32> -> vector<4x2048xf32>
      %c0_i32_66 = arith.constant 0 : i32
      %150 = vector.broadcast %c0_i32_66 : i32 to vector<1x2048xi32>
      %151 = arith.addi %20, %150 : vector<1x2048xi32>
      %c0_i32_67 = arith.constant 0 : i32
      %152 = vector.broadcast %c0_i32_67 : i32 to vector<1x2048xi32>
      %153 = arith.cmpi sge, %151, %152 : vector<1x2048xi32>
      %c0_i32_68 = arith.constant 0 : i32
      %154 = vector.broadcast %c0_i32_68 : i32 to vector<1x2048xi32>
      %155 = arith.addi %20, %154 : vector<1x2048xi32>
      %c16_i32_69 = arith.constant 16 : i32
      %156 = vector.broadcast %c16_i32_69 : i32 to vector<1x2048xi32>
      %157 = arith.cmpi slt, %155, %156 : vector<1x2048xi32>
      %158 = arith.andi %153, %157 : vector<1x2048xi1>
      %c1_i32_70 = arith.constant 1 : i32
      %159 = vector.broadcast %c1_i32_70 : i32 to vector<1x2048xi32>
      %160 = arith.addi %21, %159 : vector<1x2048xi32>
      %c0_i32_71 = arith.constant 0 : i32
      %161 = vector.broadcast %c0_i32_71 : i32 to vector<1x2048xi32>
      %162 = arith.cmpi sge, %160, %161 : vector<1x2048xi32>
      %163 = arith.andi %158, %162 : vector<1x2048xi1>
      %c1_i32_72 = arith.constant 1 : i32
      %164 = vector.broadcast %c1_i32_72 : i32 to vector<1x2048xi32>
      %165 = arith.addi %21, %164 : vector<1x2048xi32>
      %c16_i32_73 = arith.constant 16 : i32
      %166 = vector.broadcast %c16_i32_73 : i32 to vector<1x2048xi32>
      %167 = arith.cmpi slt, %165, %166 : vector<1x2048xi32>
      %168 = arith.andi %163, %167 : vector<1x2048xi1>
      %cst_74 = arith.constant 0.000000e+00 : f32
      %169 = vector.shape_cast %168 : vector<1x2048xi1> to vector<1x2048xi1>
      %170 = vector.broadcast %169 : vector<1x2048xi1> to vector<4x2048xi1>
      %171 = vector.broadcast %cst_74 : f32 to vector<4x2048xf32>
      %172 = arith.select %170, %149, %171 : vector<4x2048xi1>, vector<4x2048xf32>
      %c5 = arith.constant 5 : index
      %c0_75 = arith.constant 0 : index
      %c0_76 = arith.constant 0 : index
      %173 = vector.load %arg3[%c5, %c0_75, %c0_76] : memref<9x8x4xf32, #tpu.memory_space<vmem>>, vector<1x8x4xf32>
      %174 = vector.shape_cast %173 : vector<1x8x4xf32> to vector<8x4xf32>
      %cst_77 = arith.constant dense<0.000000e+00> : vector<8x2048xf32>
      %175 = tpu.matmul %174, %172, %cst_77 {dimension_numbers = #tpu.dot_dimension_numbers<[1], [0], [0], [1], [0, 0, 1, 1], [], []>} : vector<8x4xf32>, vector<4x2048xf32>, vector<8x2048xf32> -> vector<8x2048xf32>
      %176 = arith.addf %146, %175 : vector<8x2048xf32>
      %cst_78 = arith.constant 0.000000e+00 : f32
      %177 = vector.broadcast %cst_78 : f32 to vector<4x15xf32>
      %178 = vector.extract_strided_slice %17 {offsets = [0, 15], sizes = [4, 2033], strides = [1, 1]} : vector<4x2048xf32> to vector<4x2033xf32>
      %179 = tpu.concatenate %178, %177 in 1 : vector<4x2033xf32>, vector<4x15xf32> -> vector<4x2048xf32>
      %c1_i32_79 = arith.constant 1 : i32
      %180 = vector.broadcast %c1_i32_79 : i32 to vector<1x2048xi32>
      %181 = arith.addi %20, %180 : vector<1x2048xi32>
      %c0_i32_80 = arith.constant 0 : i32
      %182 = vector.broadcast %c0_i32_80 : i32 to vector<1x2048xi32>
      %183 = arith.cmpi sge, %181, %182 : vector<1x2048xi32>
      %c1_i32_81 = arith.constant 1 : i32
      %184 = vector.broadcast %c1_i32_81 : i32 to vector<1x2048xi32>
      %185 = arith.addi %20, %184 : vector<1x2048xi32>
      %c16_i32_82 = arith.constant 16 : i32
      %186 = vector.broadcast %c16_i32_82 : i32 to vector<1x2048xi32>
      %187 = arith.cmpi slt, %185, %186 : vector<1x2048xi32>
      %188 = arith.andi %183, %187 : vector<1x2048xi1>
      %c-1_i32_83 = arith.constant -1 : i32
      %189 = vector.broadcast %c-1_i32_83 : i32 to vector<1x2048xi32>
      %190 = arith.addi %21, %189 : vector<1x2048xi32>
      %c0_i32_84 = arith.constant 0 : i32
      %191 = vector.broadcast %c0_i32_84 : i32 to vector<1x2048xi32>
      %192 = arith.cmpi sge, %190, %191 : vector<1x2048xi32>
      %193 = arith.andi %188, %192 : vector<1x2048xi1>
      %c-1_i32_85 = arith.constant -1 : i32
      %194 = vector.broadcast %c-1_i32_85 : i32 to vector<1x2048xi32>
      %195 = arith.addi %21, %194 : vector<1x2048xi32>
      %c16_i32_86 = arith.constant 16 : i32
      %196 = vector.broadcast %c16_i32_86 : i32 to vector<1x2048xi32>
      %197 = arith.cmpi slt, %195, %196 : vector<1x2048xi32>
      %198 = arith.andi %193, %197 : vector<1x2048xi1>
      %cst_87 = arith.constant 0.000000e+00 : f32
      %199 = vector.shape_cast %198 : vector<1x2048xi1> to vector<1x2048xi1>
      %200 = vector.broadcast %199 : vector<1x2048xi1> to vector<4x2048xi1>
      %201 = vector.broadcast %cst_87 : f32 to vector<4x2048xf32>
      %202 = arith.select %200, %179, %201 : vector<4x2048xi1>, vector<4x2048xf32>
      %c6 = arith.constant 6 : index
      %c0_88 = arith.constant 0 : index
      %c0_89 = arith.constant 0 : index
      %203 = vector.load %arg3[%c6, %c0_88, %c0_89] : memref<9x8x4xf32, #tpu.memory_space<vmem>>, vector<1x8x4xf32>
      %204 = vector.shape_cast %203 : vector<1x8x4xf32> to vector<8x4xf32>
      %cst_90 = arith.constant dense<0.000000e+00> : vector<8x2048xf32>
      %205 = tpu.matmul %204, %202, %cst_90 {dimension_numbers = #tpu.dot_dimension_numbers<[1], [0], [0], [1], [0, 0, 1, 1], [], []>} : vector<8x4xf32>, vector<4x2048xf32>, vector<8x2048xf32> -> vector<8x2048xf32>
      %206 = arith.addf %176, %205 : vector<8x2048xf32>
      %cst_91 = arith.constant 0.000000e+00 : f32
      %207 = vector.broadcast %cst_91 : f32 to vector<4x16xf32>
      %208 = vector.extract_strided_slice %17 {offsets = [0, 16], sizes = [4, 2032], strides = [1, 1]} : vector<4x2048xf32> to vector<4x2032xf32>
      %209 = tpu.concatenate %208, %207 in 1 : vector<4x2032xf32>, vector<4x16xf32> -> vector<4x2048xf32>
      %c1_i32_92 = arith.constant 1 : i32
      %210 = vector.broadcast %c1_i32_92 : i32 to vector<1x2048xi32>
      %211 = arith.addi %20, %210 : vector<1x2048xi32>
      %c0_i32_93 = arith.constant 0 : i32
      %212 = vector.broadcast %c0_i32_93 : i32 to vector<1x2048xi32>
      %213 = arith.cmpi sge, %211, %212 : vector<1x2048xi32>
      %c1_i32_94 = arith.constant 1 : i32
      %214 = vector.broadcast %c1_i32_94 : i32 to vector<1x2048xi32>
      %215 = arith.addi %20, %214 : vector<1x2048xi32>
      %c16_i32_95 = arith.constant 16 : i32
      %216 = vector.broadcast %c16_i32_95 : i32 to vector<1x2048xi32>
      %217 = arith.cmpi slt, %215, %216 : vector<1x2048xi32>
      %218 = arith.andi %213, %217 : vector<1x2048xi1>
      %c0_i32_96 = arith.constant 0 : i32
      %219 = vector.broadcast %c0_i32_96 : i32 to vector<1x2048xi32>
      %220 = arith.addi %21, %219 : vector<1x2048xi32>
      %c0_i32_97 = arith.constant 0 : i32
      %221 = vector.broadcast %c0_i32_97 : i32 to vector<1x2048xi32>
      %222 = arith.cmpi sge, %220, %221 : vector<1x2048xi32>
      %223 = arith.andi %218, %222 : vector<1x2048xi1>
      %c0_i32_98 = arith.constant 0 : i32
      %224 = vector.broadcast %c0_i32_98 : i32 to vector<1x2048xi32>
      %225 = arith.addi %21, %224 : vector<1x2048xi32>
      %c16_i32_99 = arith.constant 16 : i32
      %226 = vector.broadcast %c16_i32_99 : i32 to vector<1x2048xi32>
      %227 = arith.cmpi slt, %225, %226 : vector<1x2048xi32>
      %228 = arith.andi %223, %227 : vector<1x2048xi1>
      %cst_100 = arith.constant 0.000000e+00 : f32
      %229 = vector.shape_cast %228 : vector<1x2048xi1> to vector<1x2048xi1>
      %230 = vector.broadcast %229 : vector<1x2048xi1> to vector<4x2048xi1>
      %231 = vector.broadcast %cst_100 : f32 to vector<4x2048xf32>
      %232 = arith.select %230, %209, %231 : vector<4x2048xi1>, vector<4x2048xf32>
      %c7 = arith.constant 7 : index
      %c0_101 = arith.constant 0 : index
      %c0_102 = arith.constant 0 : index
      %233 = vector.load %arg3[%c7, %c0_101, %c0_102] : memref<9x8x4xf32, #tpu.memory_space<vmem>>, vector<1x8x4xf32>
      %234 = vector.shape_cast %233 : vector<1x8x4xf32> to vector<8x4xf32>
      %cst_103 = arith.constant dense<0.000000e+00> : vector<8x2048xf32>
      %235 = tpu.matmul %234, %232, %cst_103 {dimension_numbers = #tpu.dot_dimension_numbers<[1], [0], [0], [1], [0, 0, 1, 1], [], []>} : vector<8x4xf32>, vector<4x2048xf32>, vector<8x2048xf32> -> vector<8x2048xf32>
      %236 = arith.addf %206, %235 : vector<8x2048xf32>
      %cst_104 = arith.constant 0.000000e+00 : f32
      %237 = vector.broadcast %cst_104 : f32 to vector<4x17xf32>
      %238 = vector.extract_strided_slice %17 {offsets = [0, 17], sizes = [4, 2031], strides = [1, 1]} : vector<4x2048xf32> to vector<4x2031xf32>
      %239 = tpu.concatenate %238, %237 in 1 : vector<4x2031xf32>, vector<4x17xf32> -> vector<4x2048xf32>
      %c1_i32_105 = arith.constant 1 : i32
      %240 = vector.broadcast %c1_i32_105 : i32 to vector<1x2048xi32>
      %241 = arith.addi %20, %240 : vector<1x2048xi32>
      %c0_i32_106 = arith.constant 0 : i32
      %242 = vector.broadcast %c0_i32_106 : i32 to vector<1x2048xi32>
      %243 = arith.cmpi sge, %241, %242 : vector<1x2048xi32>
      %c1_i32_107 = arith.constant 1 : i32
      %244 = vector.broadcast %c1_i32_107 : i32 to vector<1x2048xi32>
      %245 = arith.addi %20, %244 : vector<1x2048xi32>
      %c16_i32_108 = arith.constant 16 : i32
      %246 = vector.broadcast %c16_i32_108 : i32 to vector<1x2048xi32>
      %247 = arith.cmpi slt, %245, %246 : vector<1x2048xi32>
      %248 = arith.andi %243, %247 : vector<1x2048xi1>
      %c1_i32_109 = arith.constant 1 : i32
      %249 = vector.broadcast %c1_i32_109 : i32 to vector<1x2048xi32>
      %250 = arith.addi %21, %249 : vector<1x2048xi32>
      %c0_i32_110 = arith.constant 0 : i32
      %251 = vector.broadcast %c0_i32_110 : i32 to vector<1x2048xi32>
      %252 = arith.cmpi sge, %250, %251 : vector<1x2048xi32>
      %253 = arith.andi %248, %252 : vector<1x2048xi1>
      %c1_i32_111 = arith.constant 1 : i32
      %254 = vector.broadcast %c1_i32_111 : i32 to vector<1x2048xi32>
      %255 = arith.addi %21, %254 : vector<1x2048xi32>
      %c16_i32_112 = arith.constant 16 : i32
      %256 = vector.broadcast %c16_i32_112 : i32 to vector<1x2048xi32>
      %257 = arith.cmpi slt, %255, %256 : vector<1x2048xi32>
      %258 = arith.andi %253, %257 : vector<1x2048xi1>
      %cst_113 = arith.constant 0.000000e+00 : f32
      %259 = vector.shape_cast %258 : vector<1x2048xi1> to vector<1x2048xi1>
      %260 = vector.broadcast %259 : vector<1x2048xi1> to vector<4x2048xi1>
      %261 = vector.broadcast %cst_113 : f32 to vector<4x2048xf32>
      %262 = arith.select %260, %239, %261 : vector<4x2048xi1>, vector<4x2048xf32>
      %c8 = arith.constant 8 : index
      %c0_114 = arith.constant 0 : index
      %c0_115 = arith.constant 0 : index
      %263 = vector.load %arg3[%c8, %c0_114, %c0_115] : memref<9x8x4xf32, #tpu.memory_space<vmem>>, vector<1x8x4xf32>
      %264 = vector.shape_cast %263 : vector<1x8x4xf32> to vector<8x4xf32>
      %cst_116 = arith.constant dense<0.000000e+00> : vector<8x2048xf32>
      %265 = tpu.matmul %264, %262, %cst_116 {dimension_numbers = #tpu.dot_dimension_numbers<[1], [0], [0], [1], [0, 0, 1, 1], [], []>} : vector<8x4xf32>, vector<4x2048xf32>, vector<8x2048xf32> -> vector<8x2048xf32>
      %266 = arith.addf %236, %265 : vector<8x2048xf32>
      %cst_117 = arith.constant 0.000000e+00 : f32
      %267 = vector.broadcast %cst_117 : f32 to vector<8x2048xf32>
      %cst_118 = arith.constant 0.000000e+00 : f32
      %268 = vector.broadcast %cst_118 : f32 to vector<8x256xf32>
      %269 = vector.extract_strided_slice %266 {offsets = [0, 0], sizes = [8, 1792], strides = [1, 1]} : vector<8x2048xf32> to vector<8x1792xf32>
      %270 = tpu.concatenate %268, %269 in 1 : vector<8x256xf32>, vector<8x1792xf32> -> vector<8x2048xf32>
      %c-1_i32_119 = arith.constant -1 : i32
      %271 = vector.broadcast %c-1_i32_119 : i32 to vector<1x2048xi32>
      %272 = arith.addi %19, %271 : vector<1x2048xi32>
      %c0_i32_120 = arith.constant 0 : i32
      %273 = vector.broadcast %c0_i32_120 : i32 to vector<1x2048xi32>
      %274 = arith.cmpi sge, %272, %273 : vector<1x2048xi32>
      %c-1_i32_121 = arith.constant -1 : i32
      %275 = vector.broadcast %c-1_i32_121 : i32 to vector<1x2048xi32>
      %276 = arith.addi %19, %275 : vector<1x2048xi32>
      %c8_i32 = arith.constant 8 : i32
      %277 = vector.broadcast %c8_i32 : i32 to vector<1x2048xi32>
      %278 = arith.cmpi slt, %276, %277 : vector<1x2048xi32>
      %279 = arith.andi %274, %278 : vector<1x2048xi1>
      %cst_122 = arith.constant 0.000000e+00 : f32
      %280 = vector.shape_cast %279 : vector<1x2048xi1> to vector<1x2048xi1>
      %281 = vector.broadcast %280 : vector<1x2048xi1> to vector<8x2048xi1>
      %282 = vector.broadcast %cst_122 : f32 to vector<8x2048xf32>
      %283 = arith.select %281, %270, %282 : vector<8x2048xi1>, vector<8x2048xf32>
      %c0_123 = arith.constant 0 : index
      %c0_124 = arith.constant 0 : index
      %c0_125 = arith.constant 0 : index
      %284 = vector.load %arg4[%c0_123, %c0_124, %c0_125] : memref<3x8x8xf32, #tpu.memory_space<vmem>>, vector<1x8x8xf32>
      %285 = vector.shape_cast %284 : vector<1x8x8xf32> to vector<8x8xf32>
      %cst_126 = arith.constant dense<0.000000e+00> : vector<8x2048xf32>
      %286 = tpu.matmul %285, %283, %cst_126 {dimension_numbers = #tpu.dot_dimension_numbers<[1], [0], [0], [1], [0, 0, 1, 1], [], []>} : vector<8x8xf32>, vector<8x2048xf32>, vector<8x2048xf32> -> vector<8x2048xf32>
      %287 = arith.addf %267, %286 : vector<8x2048xf32>
      %c1_127 = arith.constant 1 : index
      %c0_128 = arith.constant 0 : index
      %c0_129 = arith.constant 0 : index
      %288 = vector.load %arg4[%c1_127, %c0_128, %c0_129] : memref<3x8x8xf32, #tpu.memory_space<vmem>>, vector<1x8x8xf32>
      %289 = vector.shape_cast %288 : vector<1x8x8xf32> to vector<8x8xf32>
      %cst_130 = arith.constant dense<0.000000e+00> : vector<8x2048xf32>
      %290 = tpu.matmul %289, %266, %cst_130 {dimension_numbers = #tpu.dot_dimension_numbers<[1], [0], [0], [1], [0, 0, 1, 1], [], []>} : vector<8x8xf32>, vector<8x2048xf32>, vector<8x2048xf32> -> vector<8x2048xf32>
      %291 = arith.addf %287, %290 : vector<8x2048xf32>
      %cst_131 = arith.constant 0.000000e+00 : f32
      %292 = vector.broadcast %cst_131 : f32 to vector<8x256xf32>
      %293 = vector.extract_strided_slice %266 {offsets = [0, 256], sizes = [8, 1792], strides = [1, 1]} : vector<8x2048xf32> to vector<8x1792xf32>
      %294 = tpu.concatenate %293, %292 in 1 : vector<8x1792xf32>, vector<8x256xf32> -> vector<8x2048xf32>
      %c1_i32_132 = arith.constant 1 : i32
      %295 = vector.broadcast %c1_i32_132 : i32 to vector<1x2048xi32>
      %296 = arith.addi %19, %295 : vector<1x2048xi32>
      %c0_i32_133 = arith.constant 0 : i32
      %297 = vector.broadcast %c0_i32_133 : i32 to vector<1x2048xi32>
      %298 = arith.cmpi sge, %296, %297 : vector<1x2048xi32>
      %c1_i32_134 = arith.constant 1 : i32
      %299 = vector.broadcast %c1_i32_134 : i32 to vector<1x2048xi32>
      %300 = arith.addi %19, %299 : vector<1x2048xi32>
      %c8_i32_135 = arith.constant 8 : i32
      %301 = vector.broadcast %c8_i32_135 : i32 to vector<1x2048xi32>
      %302 = arith.cmpi slt, %300, %301 : vector<1x2048xi32>
      %303 = arith.andi %298, %302 : vector<1x2048xi1>
      %cst_136 = arith.constant 0.000000e+00 : f32
      %304 = vector.shape_cast %303 : vector<1x2048xi1> to vector<1x2048xi1>
      %305 = vector.broadcast %304 : vector<1x2048xi1> to vector<8x2048xi1>
      %306 = vector.broadcast %cst_136 : f32 to vector<8x2048xf32>
      %307 = arith.select %305, %294, %306 : vector<8x2048xi1>, vector<8x2048xf32>
      %c2_137 = arith.constant 2 : index
      %c0_138 = arith.constant 0 : index
      %c0_139 = arith.constant 0 : index
      %308 = vector.load %arg4[%c2_137, %c0_138, %c0_139] : memref<3x8x8xf32, #tpu.memory_space<vmem>>, vector<1x8x8xf32>
      %309 = vector.shape_cast %308 : vector<1x8x8xf32> to vector<8x8xf32>
      %cst_140 = arith.constant dense<0.000000e+00> : vector<8x2048xf32>
      %310 = tpu.matmul %309, %307, %cst_140 {dimension_numbers = #tpu.dot_dimension_numbers<[1], [0], [0], [1], [0, 0, 1, 1], [], []>} : vector<8x8xf32>, vector<8x2048xf32>, vector<8x2048xf32> -> vector<8x2048xf32>
      %311 = arith.addf %291, %310 : vector<8x2048xf32>
      %312 = arith.index_cast %arg1 : i32 to index
      %c0_141 = arith.constant 0 : index
      %c0_142 = arith.constant 0 : index
      %313 = vector.load %arg9[%312, %c0_141, %c0_142] : memref<2x8x2048xf32, #tpu.memory_space<vmem>>, vector<1x8x2048xf32>
      %314 = vector.shape_cast %313 : vector<1x8x2048xf32> to vector<8x2048xf32>
      %315 = vector.shape_cast %311 : vector<8x2048xf32> to vector<1x8x2048xf32>
      tpu.vector_store %arg9[%312, %c0_141, %c0_142], %315 {strides = array<i32>} : memref<2x8x2048xf32, #tpu.memory_space<vmem>>, vector<1x8x2048xf32>,
      %c0_143 = arith.constant 0 : index
      %c0_144 = arith.constant 0 : index
      %316 = vector.load %arg10[%c0_143, %c0_144] : memref<8x1xf32, #tpu.memory_space<vmem>>, vector<8x1xf32>
      %cst_145 = arith.constant dense<0.000000e+00> : vector<8xf32>
      %317 = vector.multi_reduction <add>, %311, %cst_145 [1] : vector<8x2048xf32> to vector<8xf32>
      %318 = vector.shape_cast %317 : vector<8xf32> to vector<8x1xf32>
      %319 = arith.addf %316, %318 : vector<8x1xf32>
      %c0_146 = arith.constant 0 : index
      %c0_147 = arith.constant 0 : index
      %320 = vector.load %arg10[%c0_146, %c0_147] : memref<8x1xf32, #tpu.memory_space<vmem>>, vector<8x1xf32>
      tpu.vector_store %arg10[%c0_146, %c0_147], %319 {strides = array<i32>} : memref<8x1xf32, #tpu.memory_space<vmem>>, vector<8x1xf32>,
      %c0_148 = arith.constant 0 : index
      %c0_149 = arith.constant 0 : index
      %321 = vector.load %arg11[%c0_148, %c0_149] : memref<8x1xf32, #tpu.memory_space<vmem>>, vector<8x1xf32>
      %322 = arith.mulf %311, %311 : vector<8x2048xf32>
      %cst_150 = arith.constant dense<0.000000e+00> : vector<8xf32>
      %323 = vector.multi_reduction <add>, %322, %cst_150 [1] : vector<8x2048xf32> to vector<8xf32>
      %324 = vector.shape_cast %323 : vector<8xf32> to vector<8x1xf32>
      %325 = arith.addf %321, %324 : vector<8x1xf32>
      %c0_151 = arith.constant 0 : index
      %c0_152 = arith.constant 0 : index
      %326 = vector.load %arg11[%c0_151, %c0_152] : memref<8x1xf32, #tpu.memory_space<vmem>>, vector<8x1xf32>
      tpu.vector_store %arg11[%c0_151, %c0_152], %325 {strides = array<i32>} : memref<8x1xf32, #tpu.memory_space<vmem>>, vector<8x1xf32>,
    } else {
    }
    %c1_i32 = arith.constant 1 : i32
    %8 = arith.cmpi eq, %arg0, %c1_i32 : i32
    %9 = arith.extui %8 : i1 to i32
    %c0_i32_4 = arith.constant 0 : i32
    %10 = arith.cmpi ne, %9, %c0_i32_4 : i32
    scf.if %10 {
      %c0 = arith.constant 0 : index
      %c0_5 = arith.constant 0 : index
      %11 = vector.load %arg10[%c0, %c0_5] : memref<8x1xf32, #tpu.memory_space<vmem>>, vector<8x1xf32>
      %cst = arith.constant 2.44140625E-4 : f32
      %12 = vector.broadcast %cst : f32 to vector<8x1xf32>
      %13 = arith.mulf %11, %12 : vector<8x1xf32>
      %c0_6 = arith.constant 0 : index
      %c0_7 = arith.constant 0 : index
      %14 = vector.load %arg11[%c0_6, %c0_7] : memref<8x1xf32, #tpu.memory_space<vmem>>, vector<8x1xf32>
      %cst_8 = arith.constant 2.44140625E-4 : f32
      %15 = vector.broadcast %cst_8 : f32 to vector<8x1xf32>
      %16 = arith.mulf %14, %15 : vector<8x1xf32>
      %17 = arith.mulf %13, %13 : vector<8x1xf32>
      %18 = arith.subf %16, %17 : vector<8x1xf32>
      %cst_9 = arith.constant 9.99999974E-6 : f32
      %19 = vector.broadcast %cst_9 : f32 to vector<8x1xf32>
      %20 = arith.addf %18, %19 : vector<8x1xf32>
      %21 = math.rsqrt %20 : vector<8x1xf32>
      %c0_10 = arith.constant 0 : index
      %c0_11 = arith.constant 0 : index
      %22 = vector.load %arg6[%c0_10, %c0_11] : memref<8x1xf32, #tpu.memory_space<vmem>>, vector<8x1xf32>
      %23 = arith.mulf %22, %21 : vector<8x1xf32>
      %c0_12 = arith.constant 0 : index
      %c0_13 = arith.constant 0 : index
      %24 = vector.load %arg7[%c0_12, %c0_13] : memref<8x1xf32, #tpu.memory_space<vmem>>, vector<8x1xf32>
      %25 = arith.mulf %13, %23 : vector<8x1xf32>
      %26 = arith.subf %24, %25 : vector<8x1xf32>
      %27 = arith.index_cast %arg1 : i32 to index
      %c0_14 = arith.constant 0 : index
      %c0_15 = arith.constant 0 : index
      %28 = vector.load %arg9[%27, %c0_14, %c0_15] : memref<2x8x2048xf32, #tpu.memory_space<vmem>>, vector<1x8x2048xf32>
      %29 = vector.shape_cast %28 : vector<1x8x2048xf32> to vector<8x2048xf32>
      %30 = vector.broadcast %23 : vector<8x1xf32> to vector<8x2048xf32>
      %31 = arith.mulf %29, %30 : vector<8x2048xf32>
      %32 = vector.broadcast %26 : vector<8x1xf32> to vector<8x2048xf32>
      %33 = arith.addf %31, %32 : vector<8x2048xf32>
      %c0_16 = arith.constant 0 : index
      %c0_17 = arith.constant 0 : index
      %c0_18 = arith.constant 0 : index
      %34 = vector.load %arg8[%c0_16, %c0_17, %c0_18] : memref<1x8x2048xf32, #tpu.memory_space<vmem>>, vector<1x8x2048xf32>
      %35 = vector.shape_cast %34 : vector<1x8x2048xf32> to vector<8x2048xf32>
      %36 = vector.shape_cast %33 : vector<8x2048xf32> to vector<1x8x2048xf32>
      tpu.vector_store %arg8[%c0_16, %c0_17, %c0_18], %36 {strides = array<i32>} : memref<1x8x2048xf32, #tpu.memory_space<vmem>>, vector<1x8x2048xf32>,
    } else {
    }
    return
  }
  func.func @transform_0(%arg0: i32, %arg1: i32) -> (i32, i32, i32) {
    %c1_i32 = arith.constant 1 : i32
    %0 = arith.subi %c1_i32, %arg0 : i32
    %1 = arith.muli %arg1, %0 : i32
    %c0_i32 = arith.constant 0 : i32
    %c0_i32_0 = arith.constant 0 : i32
    %c0_i32_1 = arith.constant 0 : i32
    return %1, %c0_i32, %c0_i32_0 : i32, i32, i32
  }
  func.func @transform_1(%arg0: i32, %arg1: i32) -> (i32, i32, i32) {
    %c0_i32 = arith.constant 0 : i32
    %c0_i32_0 = arith.constant 0 : i32
    %c0_i32_1 = arith.constant 0 : i32
    %c0_i32_2 = arith.constant 0 : i32
    return %c0_i32, %c0_i32_0, %c0_i32_1 : i32, i32, i32
  }
  func.func @transform_2(%arg0: i32, %arg1: i32) -> (i32, i32, i32) {
    %c0_i32 = arith.constant 0 : i32
    %c0_i32_0 = arith.constant 0 : i32
    %c0_i32_1 = arith.constant 0 : i32
    %c0_i32_2 = arith.constant 0 : i32
    return %c0_i32, %c0_i32_0, %c0_i32_1 : i32, i32, i32
  }
  func.func @transform_3(%arg0: i32, %arg1: i32) -> (i32, i32) {
    %c0_i32 = arith.constant 0 : i32
    %c0_i32_0 = arith.constant 0 : i32
    %c0_i32_1 = arith.constant 0 : i32
    return %c0_i32, %c0_i32_0 : i32, i32
  }
  func.func @transform_4(%arg0: i32, %arg1: i32) -> (i32, i32) {
    %c0_i32 = arith.constant 0 : i32
    %c0_i32_0 = arith.constant 0 : i32
    %c0_i32_1 = arith.constant 0 : i32
    return %c0_i32, %c0_i32_0 : i32, i32
  }
  func.func @transform_5(%arg0: i32, %arg1: i32) -> (i32, i32) {
    %c0_i32 = arith.constant 0 : i32
    %c0_i32_0 = arith.constant 0 : i32
    %c0_i32_1 = arith.constant 0 : i32
    return %c0_i32, %c0_i32_0 : i32, i32
  }
  func.func @transform_6(%arg0: i32, %arg1: i32) -> (i32, i32, i32) {
    %0 = arith.muli %arg1, %arg0 : i32
    %c0_i32 = arith.constant 0 : i32
    %c0_i32_0 = arith.constant 0 : i32
    %c0_i32_1 = arith.constant 0 : i32
    return %0, %c0_i32, %c0_i32_0 : i32, i32, i32
  }
}

</mosaic_0001>

<bundles_post_ra>
// kernel: tpu_custom_call.1
= control target key start
LH: loop header
LB: loop body
LE: loop exit
PB: predicated region body
PF: predicated region fallthrough
CT: control target
= control target key end

     0   :  { %s15238_s0 = inlined_call_operand.hbm [shape: f32[2,4,2048], index: 0, kind: input, shape index: {}]   ;;  %s15239_s1 = inlined_call_operand.vmem [shape: f32[9,8,4], index: 1, kind: input, shape index: {}]   ;;  %s15240_s2 = inlined_call_operand.vmem [shape: f32[3,8,8], index: 2, kind: input, shape index: {}]   ;;  %s15241_s3 = inlined_call_operand.vmem [shape: s32[3,2048], index: 3, kind: input, shape index: {}]   ;;  %s15242_s4 = inlined_call_operand.vmem [shape: f32[8,1], index: 4, kind: input, shape index: {}]   ;;  %s15243_s5 = inlined_call_operand.vmem [shape: f32[8,1], index: 5, kind: input, shape index: {}]   ;;  %s15244_s6 = inlined_call_operand.hbm [shape: f32[2,8,2048], index: 6, kind: output, shape index: {}]  }
   0x1   :  { %15519 = sst [smem:[#allocation67_spill]] %s15243_s5 }
   0x2   :  { %15520 = sst [smem:[#allocation68_spill]] %s15244_s6 }
   0x3   :  { %11 = vsyncpa [#allocation6], 0 }
   0x4   :  { %13 = vsyncpa [#allocation6 + $0x1], 0 }
   0x5   :  { %14 = vsyncpa [#allocation7], 0 }
   0x6   :  { %16 = vsyncpa [#allocation7 + $0x1], 0  ;;  %s11485_s21 = smov 0   ;;  %s11487_s22 = smov 0  }
   0x7   :  { %s11489_s23 = smov 0   ;;  %s11491_s24 = smov 0  }
   0x8   :  { %s11493_s25 = smov 0   ;;  %s11495_s26 = smov 0  }
   0x9   :  { %s11497_s27 = smov 0   ;;  %s11499_s28 = smov 0  }
   0xa   :  { %s11501_s29 = smov 0   ;;  %s11503_s30 = smov 0  }
   0xb   :  { %s11505_s7 = smov 0  }
   0xc LB: > { %15521 = sst [smem:[#allocation11_spill]] %s11429_s30  ;;  %s10644_s8 = sadd.s32 4294967295, %s11433_s7   ;;  %s11433_s7 = sphi %s11505_s7, %s22_s7   ;;  %s11429_s30 = sphi %s11503_s30, %s16504_s30   ;;  %s11425_s29 = sphi %s11501_s29, %s16512_s29   ;;  %s11421_s28 = sphi %s11499_s28, %s16503_s28   ;;  %s11417_s27 = sphi %s11497_s27, %s16511_s27   ;;  %s11413_s26 = sphi %s11495_s26, %s16510_s26   ;;  %s11409_s25 = sphi %s11493_s25, %s16509_s25   ;;  %s11405_s24 = sphi %s11491_s24, %s16508_s24   ;;  %s11401_s23 = sphi %s11489_s23, %s16507_s23   ;;  %s11397_s22 = sphi %s11487_s22, %s16506_s22   ;;  %s11393_s21 = sphi %s11485_s21, %s16505_s21  }
   0xd   : > { %s31_s10 = sadd.s32 1, %s11425_s29  ;;  %s34_s11 = sadd.s32 1, %s11429_s30 }
   0xe   : > { %p32_p0 = scmp.ge.s32.totalorder %s31_s10, 2  ;;  %s38_s12 = ssub.s32 1, %s11429_s30 }
   0xf   : > { %s11544_s13 = smul.u32 %s11425_s29, %s38_s12  ;;  %s45_s14 = sadd.s32 1, %s11413_s26 }
  0x10   : > { %s16514_s10 = smov (%p32_p0, %s31_s10), 0  ;;  %s16516_s11 = smov (!%p32_p0, %s34_s11), %s11429_s30 }
  0x11   : > { %p52_p1 = scmp.ne.s32.totalorder %s11413_s26, %s11409_s25  ;;  %p53_p2 = scmp.eq.s32.totalorder %s11433_s7, 0 }
  0x12   : > { %p36_p3 = scmp.ge.s32.totalorder %s16516_s11, 2  ;;  %p58_p4 = scmp.ne.s32.totalorder %s11409_s25, %s11405_s24 }
  0x13   : > { %p11554_p5 = por %p53_p2, %p52_p1  ;;  %p59_p6 = scmp.eq.s32.totalorder %s10644_s8, 0 }
  0x14   : > { %s16518_s11 = smov (%p36_p3, %s16516_s11), 0  ;;  %s173_s17 = smul.u32 %s11425_s29, %s11429_s30 }
  0x15   : > { %15523 = sst [smem:[#allocation12_spill]] %s16518_s11  ;;  %p11560_p7 = por %p59_p6, %p58_p4 }
  0x16   : > { %s40_s18 = ssub.s32 1, %s16518_s11  ;;  %s174_s19 = smul.u32 %s16518_s11, %s16514_s10 }
  0x17   : > { %s41_s20 = smul.u32 %s40_s18, %s16514_s10  ;;  %s178_s24 = sadd.s32 1, %s11401_s23 }
  0x18   : > { %s175_s12 = ssub.s32 %s173_s17, %s174_s19  ;;  %p188_p8 = scmp.ne.s32.totalorder %s11401_s23, %s11397_s22 }
  0x19   : > { %s42_s9 = ssub.s32 %s11544_s13, %s41_s20  ;;  %p176_p9 = scmp.eq.s32.totalorder %s175_s12, 0 }
  0x1a   : > { %p43_p10 = scmp.eq.s32.totalorder %s42_s9, 0  ;;  %p189_p11 = scmp.eq.s32.totalorder %s10644_s8, 3 }
  0x1b   : > { %s11575_s6 = scalar_select %p176_p9, %s11401_s23, %s178_s24  }
  0x1c   : > { %s11578_s5 = scalar_select %p43_p10, %s11413_s26, %s45_s14  }
  0x1d   : > { %p11580_p12 = por %p189_p11, %p188_p8  ;;  %p194_p13 = scmp.ne.s32.totalorder %s11397_s22, %s11393_s21 }
  0x1e   : > { %s15526_s18 = sadd.s32 4294967294, %s11433_s7   ;;  %p11175_p1 = scmp.lt.s32.totalorder %s11433_s7, 4 }
  0x1f   : > { %s15525_s30 = scalar_select %p11580_p12, 1, 0 }
  0x20   : > { %p195_p0 = scmp.eq.s32.totalorder %s15526_s18, 3  ;;  %s230_s17 = sand.u32 1, %s11413_s26  }
  0x21   : > { %s10648_s8 = sshll.u32 %s230_s17, 6  ;;  %s10991_s9 = sshll.u32 %s11544_s13, 10 }
  0x22   : > { %p11590_p2 = por %p195_p0, %p194_p13  ;;  %s11598_s14 = scalar_lea.hbm %s15238_s0, %s10991_s9 }
  0x23   : > { %s234_s12 = scalar_lea.vmem [#allocation5], %s10648_s8  ;;  %p11602_p3 = pnand %p11175_p1, %p11554_p5 }
  0x24   : > { %s15527_s19 = scalar_select %p11590_p2, 1, 0 }
  0x25   : > { %s244_s11 = sshll.u32 %s234_s12, 4  ;;  %s231_s13 = scalar_lea.sflag [#allocation6], %s230_s17  ;;  %s11606_s11 = int_to_ptr.vmem [resolvable:$true] %s244_s11 }
  0x26   : > { %s11281_s9 = scalar_lea.hbm %s11598_s14, 1024  ;;  %p11283_p9 = pneg %p11602_p3 }
  0x27   : > { %p11282_p8 = scmp.ne.s32.totalorder %s11598_s14, %s11281_s9  ;;  %s11286_s20 = scalar_lea.hbm %s15238_s0, 2048 }
  0x28   : > { %p11287_p5 = scmp.lt.u32.totalorder %s11598_s14, %s15238_s0  ;;  %p11288_p13 = scmp.lt.u32.totalorder %s11286_s20, %s11281_s9 }
  0x29   : > { %p11284_p10 = pnand %p11283_p9, %p11282_p8  ;;  %p11290_p1 = scmp.lt.u32.totalorder %s11281_s9, %s11598_s14 }
  0x2a   : > { %p11289_p0 = por %p11288_p13, %p11287_p5 }
  0x2b   : > { %p11285_p11 = pneg %p11284_p10 }
  0x2c   : > { %p11291_p4 = por %p11290_p1, %p11289_p0 }
  0x2e   : > { %p11292_p6 = pnand %p11291_p4, %p11285_p11 }
  0x30   : > { %11295 = shalt.err (!%p11292_p6)
}
  0x31   : > { %s11296_s17 = scalar_lea.vmem %s11606_s11, 1024  ;;  %s11435_s15 = smov [#allocation5]  }
  0x32   : > { %p11297_p8 = scmp.ne.s32.totalorder %s11606_s11, %s11296_s17  ;;  %s11301_s8 = sshll.u32 %s11435_s15, 4  ;;  %s11302_s8 = int_to_ptr.vmem [resolvable:$false] %s11301_s8 }
  0x33   : > { %s11303_s24 = scalar_lea.vmem %s11302_s8, 2048  ;;  %p11304_p12 = scmp.lt.s32.totalorder %s11606_s11, %s11302_s8 }
  0x34   : > { %p11299_p10 = pnand %p11297_p8, %p11283_p9  ;;  %p11305_p5 = scmp.lt.s32.totalorder %s11303_s24, %s11296_s17 }
  0x36   : > { %p11300_p2 = pneg %p11299_p10  ;;  %p11306_p13 = por %p11305_p5, %p11304_p12 }
  0x38   : > { %p11307_p0 = pnand %p11306_p13, %p11300_p2 }
  0x3a   : > { %11310 = shalt.err (!%p11307_p0)
}
  0x3b   : > { %11170 = dma.hbm_to_vmem [thread:$0]  (!%p11602_p3), %s11598_s14, 1024, %s11606_s11, %s231_s13  }
  0x3c   : > { %p15529_p4 = scmp.lt.s32.totalorder %s11433_s7, 5  ;;  %p15530_p6 = scmp.ge.s32.totalorder %s11433_s7, 1 }
  0x3e   : > { %p250_p9 = pnand %p15530_p6, %p15529_p4 }
  0x3f   : > { %s255_s9 = sand.u32 (!%p250_p9), 1, %s11409_s25  }
  0x40   : > { %253 = sbr.rel (%p250_p9) target bundleno = 1368 (0x558), region = 44  ;;  %s10652_s20 = sshll.u32 (!%p250_p9), %s255_s9, 6 }
  0x41   : > { %s256_s12 = scalar_lea.sflag (!%p250_p9), [#allocation6], %s255_s9  ;;  %s11640_s17 = scalar_lea.vmem (!%p250_p9), [#allocation5], %s10652_s20 }
  0x47   : > { %11384 = dma.done.wait (%p11560_p7), %s256_s12, 1024  }
  0x48   : > { %11386 = vsyncadd (%p11560_p7), %s256_s12, 4294966272  ;;  %s285_s11 = sand.u32 1, %s11397_s22   ;;  %p291_p12 = scmp.eq.s32.totalorder %s11421_s28, 0 }
  0x49   : > { %s10653_s14 = sshll.u32 %s285_s11, 7  ;;  %p292_p2 = scmp.eq.s32.totalorder %s11417_s27, 0 }
  0x4a   : > { %s11651_s18 = scalar_lea.vmem [#allocation8], %s10653_s14 }
  0x4b   : > { %p293_p3 = pnand %p292_p2, %p291_p12 }
  0x4c   : > { %vm297_vm0 = vcmask (!%p293_p3), 7168   ;;  %v11436_v0 = vmov (!%p293_p3), 0.0  }
  0x4d   : > { %296 = sbr.rel (%p293_p3) target bundleno = 84 (0x54), region = 52  ;;  %298 = vst.msk [vmem:[#allocation3] sm:$0xff] (!%p293_p3), %vm297_vm0, %v11436_v0  ;;  %299 = vst.msk [vmem:[#allocation4] sm:$0xff] (!%p293_p3), %vm297_vm0, %v11436_v0 }
  0x54 PF: > { %p10654_p7 = scmp.ne.s32.totalorder %s11421_s28, 0 }
  0x56   : > { %302 = sbr.rel (%p10654_p7) target bundleno = 1172 (0x494), region = 56 }
  0x5d   : > { %v305_v1 = vld [vmem:[%s11640_s17 + $0x10] sm:$0xff]  ;;  %v303_v2 = vld [vmem:[%s11640_s17] sm:$0xff]  ;;  %v304_v3 = vld [vmem:[%s11640_s17 + $0x8] sm:$0xff]  ;;  %s11437_s16 = smov 16   ;;  %v15269_v21 = vmov 0   ;;  %v15532_v23 = vmov 0 }
  0x5e   : > { %vm313_vm1 = vcmp.ge.f32.partialorder %v305_v1, 0.0  ;;  %v321_v4 = vmul.f32 0.2, %v305_v1  ;;  %vm311_vm2 = vcmp.ge.f32.partialorder %v303_v2, 0.0  ;;  %v319_v5 = vmul.f32 0.2, %v303_v2 }
  0x5f   : > { %vm312_vm3 = vcmp.ge.f32.partialorder %v304_v3, 0.0  ;;  %v320_v6 = vmul.f32 0.2, %v304_v3  ;;  %v307_v7 = vld [vmem:[%s11640_s17 + $0x20] sm:$0xff]  ;;  %v306_v14 = vld [vmem:[%s11640_s17 + $0x18] sm:$0xff]  ;;  %v309_v19 = vld [vmem:[%s11640_s17 + $0x30] sm:$0xff] }
  0x60   : > { %v11658_v8 = vsel %vm313_vm1, %v305_v1, %v321_v4  ;;  %v11660_v9 = vsel %vm311_vm2, %v303_v2, %v319_v5  ;;  %v323_v13 = vmul.f32 0.2, %v307_v7  ;;  %vm315_vm4 = vcmp.ge.f32.partialorder %v307_v7, 0.0  ;;  %v11688_v16 = vld [vmem:[%s15241_s3] sm:$0x77]  ;;  %v308_v27 = vld [vmem:[%s11640_s17 + $0x28] sm:$0xff] }
  0x61   : > { %713 = vrot.lane.b32.xlu1 %v11658_v8, %s11437_s16  ;;  %705 = vrot.lane.b32.xlu0 %v11660_v9, %s11437_s16  ;;  %v11668_v10 = vcombine.high %v11658_v8, %v11658_v8  ;;  %v11672_v11 = vcombine.high %v11660_v9, %v11660_v9  ;;  %v11674_v12 = vsel %vm312_vm3, %v304_v3, %v320_v6  ;;  %v322_v18 = vmul.f32 0.2, %v306_v14  ;;  %v11726_v32 = vld [vmem:[%s15241_s3 + $0x8] sm:$0x77]  ;;  %s11440_s9 = smov 17   ;;  %s11441_s20 = smov 15  }
  0x62   : > { %v11683_v15 = vcombine.high %v11674_v12, %v11674_v12  ;;  %v11690_v17 = vsel %vm315_vm4, %v307_v7, %v323_v13  ;;  %vm314_vm5 = vcmp.ge.f32.partialorder %v306_v14, 0.0  ;;  %vm770_vm6 = vcmp.ge.s32.totalorder %v11688_v16, 0  ;;  %v310_v42 = vld [vmem:[%s11640_s17 + $0x38] sm:$0xff]  ;;  %v11875_v57 = vld [vmem:[%s15241_s3 + $0x10] sm:$0x77]  ;;  %s11442_s8 = smov 1  }
  0x63   : > { %15531 = vst [vmem:[#allocation13_spill] sm:$0xff] %v11690_v17  ;;  %vm818_vm7 = vcmp.lt.s32.totalorder %v11688_v16, 16  ;;  %v11701_v20 = vcombine.high %v11690_v17, %v11690_v17  ;;  %v778_v22 = vsel %vm770_vm6, 1, %v15269_v21  ;;  %v11708_v24 = vsel %vm314_vm5, %v306_v14, %v322_v18  ;;  %v11886_v59 = vld [vmem:[%s15241_s3 + $0x20] sm:$0x77]  ;;  %s11443_s15 = smov 127  }
  0x64   : > { %vm11704_vm8 = vmand %vm770_vm6, %vm818_vm7  ;;  %v325_v25 = vmul.f32 0.2, %v309_v19  ;;  %v826_v26 = vsel %vm818_vm7, 1, %v15269_v21  ;;  %vm317_vm9 = vcmp.ge.f32.partialorder %v309_v19, 0.0  ;;  %v10671_v28 = vrot.slane %v778_v22, 9  ;;  %15562 = vst [vmem:[#allocation24_spill] sm:$0xff] %v11886_v59 }
  0x65   : > { %715 = vrot.lane.b32.xlu1 %v11668_v10, %s11437_s16  ;;  %707 = vrot.lane.b32.xlu0 %v11672_v11, %s11437_s16  ;;  %v15533_v23 = vsel %vm11704_vm8, 4294967295, %v15532_v23  ;;  %v11713_v29 = vadd.s32 1, %v11688_v16  ;;  %v10679_v30 = vrot.slane %v826_v26, 9  ;;  %v11721_v31 = vcombine.high %v11708_v24, %v11708_v24  ;;  %v11915_v2 = vld [vmem:[%s15241_s3 + $0x18] sm:$0x77]  ;;  %s11445_s17 = smov 112  }
  0x66   : > { %15534 = vst [vmem:[#allocation14_spill] sm:$0xff] %v15533_v23  ;;  %v11728_v33 = vsel %vm317_vm9, %v309_v19, %v325_v25  ;;  %v324_v34 = vmul.f32 0.2, %v308_v27  ;;  %v15267_v35 = vmov 0.0   ;;  %vm316_vm12 = vcmp.ge.f32.partialorder %v308_v27, 0.0  ;;  %15567 = vst [vmem:[#allocation27_spill] sm:$0xff] %v11915_v2 }
  0x67   : > { %15535 = vst [vmem:[#allocation15_spill] sm:$0xff] %v11713_v29  ;;  %15536 = vst [vmem:[#allocation16_spill] sm:$0xff] %v11728_v33  ;;  %vm15252_vm10 = vcmp.ge.s32.totalorder %v11713_v29, 0  ;;  %vm15251_vm11 = vcmp.lt.s32.totalorder %v11713_v29, 16  ;;  %1153 = vmatprep.mubr.f32.mxu0 %v15267_v35  ;;  %1224 = vmatprep.mubr.f32.mxu1 %v15267_v35  ;;  %vm11734_vm13 = vcmp.ne.s32.totalorder %v10671_v28, 0  ;;  %v15539_v37 = vmov 0 }
  0x68   : > { %vm11742_vm14 = vmand %vm15252_vm10, %vm15251_vm11  ;;  %vm11746_vm15 = vcmp.ne.s32.totalorder %v10679_v30, 0  ;;  %vm771_vm1 = vcmp.ge.s32.totalorder %v11726_v32, 0  ;;  %vm819_vm2 = vcmp.lt.s32.totalorder %v11726_v32, 16  ;;  %v11762_v39 = vcombine.high %v11728_v33, %v11728_v33  ;;  %v11970_v22 = vld [vmem:[%s15241_s3 + $0x30] sm:$0x77]  ;;  %s11446_s13 = smov 111  }
  0x69   : > { %711 = vrot.lane.b32.xlu1 %v11683_v15, %s11437_s16  ;;  %709 = vrot.lane.b32.xlu0 %v11674_v12, %s11437_s16  ;;  %v15540_v37 = vsel %vm11742_vm14, 4294967295, %v15539_v37  ;;  %vm6610_vm0 = vmand %vm11742_vm14, %vm11734_vm13  ;;  %v15544_v40 = vmov 0  ;;  %v11770_v41 = vsel %vm316_vm12, %v308_v27, %v324_v34  ;;  %v779_v43 = vsel %vm771_vm1, 1, %v15269_v21  ;;  %15583 = vst [vmem:[#allocation31_spill] sm:$0xff] %v11970_v22  ;;  %v12141_v35 = vld [vmem:[%s15241_s3 + $0x38] sm:$0x77] }
  0x6a   : > { %15541 = vst [vmem:[#allocation17_spill] sm:$0xff] %v15540_v37  ;;  %vm11766_vm3 = vmand %vm6610_vm0, %vm11746_vm15  ;;  %v827_v44 = vsel %vm819_vm2, 1, %v15269_v21  ;;  %v11780_v45 = vadd.s32 1, %v11726_v32  ;;  %v11788_v46 = vcombine.high %v11770_v41, %v11770_v41  ;;  %v10672_v47 = vrot.slane %v779_v43, 9 }
  0x6b   : > { %v15545_v40 = vsel %vm11766_vm3, 4294967295, %v15544_v40  ;;  %v326_v48 = vmul.f32 0.2, %v310_v42  ;;  %v10680_v49 = vrot.slane %v827_v44, 9  ;;  %vm11794_vm4 = vmand %vm771_vm1, %vm819_vm2  ;;  %v15549_v50 = vmov 0  ;;  %15632 = vst [vmem:[#allocation43_spill] sm:$0xff] %v12141_v35 }
  0x6c   : > { %15546 = vst [vmem:[#allocation18_spill] sm:$0xff] %v15545_v40  ;;  %15547 = vst [vmem:[#allocation19_spill] sm:$0xff] %v11780_v45  ;;  %v15550_v50 = vsel %vm11794_vm4, 4294967295, %v15549_v50  ;;  %vm318_vm5 = vcmp.ge.f32.partialorder %v310_v42, 0.0  ;;  %vm15250_vm6 = vcmp.ge.s32.totalorder %v11780_v45, 0  ;;  %vm15249_vm7 = vcmp.lt.s32.totalorder %v11780_v45, 16 }
  0x6d   : > { %723 = vrot.lane.b32.xlu1 %v11701_v20, %s11437_s16  ;;  %721 = vrot.lane.b32.xlu0 %v11690_v17, %s11437_s16  ;;  %15548 = vst [vmem:[#allocation20_spill] sm:$0xff] %v11788_v46  ;;  %15551 = vst [vmem:[#allocation21_spill] sm:$0xff] %v15550_v50  ;;  %vm11804_vm9 = vcmp.ne.s32.totalorder %v10672_v47, 0  ;;  %v15554_v52 = vmov 0  ;;  %v11816_v53 = vsel %vm318_vm5, %v310_v42, %v326_v48  ;;  %vm11818_vm0 = vcmp.ne.s32.totalorder %v10680_v49, 0 }
  0x6e   : > { %vm11812_vm12 = vmand %vm15250_vm6, %vm15249_vm7  ;;  %v15559_v55 = vmov 0  ;;  %v11836_v56 = vcombine.high %v11816_v53, %v11816_v53  ;;  %v424_v58 = vadd.s32 4294967295, %v11688_v16  ;;  %vm15253_vm5 = vcmp.ge.s32.totalorder %v11875_v57, 0  ;;  %v12033_v48 = vld [vmem:[%s15241_s3 + $0x28] sm:$0x77] }
  0x6f   : > { %v15555_v52 = vsel %vm11812_vm12, 4294967295, %v15554_v52  ;;  %vm6611_vm1 = vmand %vm11812_vm12, %vm11804_vm9  ;;  %v11893_v60 = vadd.s32 4294967295, %v11875_v57  ;;  %v780_v61 = vsel %vm15253_vm5, 1, %v15269_v21  ;;  %vm15256_vm6 = vcmp.lt.s32.totalorder %v11875_v57, 16  ;;  %15601 = vst [vmem:[#allocation35_spill] sm:$0xff] %v12033_v48 }
  0x70   : > { %15556 = vst [vmem:[#allocation22_spill] sm:$0xff] %v15555_v52  ;;  %vm11828_vm2 = vmand %vm6611_vm1, %vm11818_vm0  ;;  %vm15255_vm1 = vcmp.ge.s32.totalorder %v424_v58, 0  ;;  %vm15254_vm7 = vcmp.lt.s32.totalorder %v424_v58, 16  ;;  %v11900_v62 = vadd.s32 4294967295, %v11726_v32  ;;  %v15565_v63 = vmov 0 }
  0x71   : > { %719 = vrot.lane.b32.xlu1 %v11721_v31, %s11437_s16  ;;  %717 = vrot.lane.b32.xlu0 %v11708_v24, %s11437_s16  ;;  %v15560_v55 = vsel %vm11828_vm2, 4294967295, %v15559_v55  ;;  %15563 = vst [vmem:[#allocation25_spill] sm:$0xff] %v11893_v60  ;;  %vm11905_vm10 = vmand %vm15255_vm1, %vm15254_vm7  ;;  %v10673_v0 = vrot.slane %v780_v61, 9  ;;  %v828_v1 = vsel %vm15256_vm6, 1, %v15269_v21  ;;  %v11926_v3 = vadd.s32 4294967295, %v11886_v59 }
  0x72   : > { %15561 = vst [vmem:[#allocation23_spill] sm:$0xff] %v15560_v55  ;;  %15564 = vst [vmem:[#allocation26_spill] sm:$0xff] %v11900_v62  ;;  %v15566_v63 = vsel %vm11905_vm10, 4294967295, %v15565_v63  ;;  %vm15569_vm6 = vcmp.ge.s32.totalorder %v11886_v59, 0  ;;  %v10681_v5 = vrot.slane %v828_v1, 9  ;;  %v544_v6 = vlaneseq }
  0x73   : > { %15568 = vst [vmem:[#allocation28_spill] sm:$0xff] %v11926_v3  ;;  %v782_v4 = vsel %vm15569_vm6, 1, %v15269_v21  ;;  %vm810_vm5 = vmand %vm11905_vm10, %vm11734_vm13  ;;  %vm15570_vm1 = vcmp.lt.s32.totalorder %v11893_v60, 16  ;;  %vm15571_vm11 = vcmp.ge.s32.totalorder %v11893_v60, 0  ;;  %v15572_v7 = vmov 0 }
  0x74   : > { %vm11941_vm3 = vmand %vm15571_vm11, %vm15570_vm1  ;;  %vm11945_vm6 = vcmp.ne.s32.totalorder %v10673_v0, 0  ;;  %v15574_v13 = vmov 0  ;;  %vm15577_vm13 = vcmp.lt.s32.totalorder %v11900_v62, 16  ;;  %vm15578_vm7 = vcmp.ge.s32.totalorder %v11900_v62, 0 }
  0x75   : > { %731 = vrot.lane.b32.xlu1 %v11762_v39, %s11437_s16  ;;  %729 = vrot.lane.b32.xlu0 %v11728_v33, %s11437_s16  ;;  %v15573_v7 = vsel %vm11941_vm3, 4294967295, %v15572_v7  ;;  %v15575_v13 = vsel %vm11945_vm6, 4294967295, %v15574_v13  ;;  %vm11957_vm2 = vmand %vm15578_vm7, %vm15577_vm13  ;;  %v15579_v14 = vmov 0  ;;  %v10675_v16 = vrot.slane %v782_v4, 9 }
  0x76   : > { %15576 = vst [vmem:[#allocation29_spill] sm:$0xff] %v15575_v13  ;;  %v15580_v14 = vsel %vm11957_vm2, 4294967295, %v15579_v14  ;;  %vm15581_vm11 = vcmp.lt.s32.totalorder %v11886_v59, 16  ;;  %v11965_v19 = vadd.s32 4294967295, %v11915_v2  ;;  %vm11974_vm1 = vmand %vm810_vm5, %vm11746_vm15  ;;  %vm15264_vm7 = vcmp.ge.s32.totalorder %v11926_v3, 0 }
  0x77   : > { %v830_v18 = vsel %vm15581_vm11, 1, %v15269_v21  ;;  %vm15263_vm13 = vcmp.lt.s32.totalorder %v11926_v3, 16  ;;  %vm15586_vm11 = vcmp.ge.s32.totalorder %v11915_v2, 0  ;;  %vm15587_vm14 = vcmp.ge.s32.totalorder %v424_v58, 0  ;;  %vm812_vm15 = vmand %vm11941_vm3, %vm11945_vm6 }
  0x78   : > { %15582 = vst [vmem:[#allocation30_spill] sm:$0xff] %v11965_v19  ;;  %v781_v26 = vsel %vm15586_vm11, 1, %v15269_v21  ;;  %v456_v27 = vsel %vm15587_vm14, 1, %v15269_v21  ;;  %vm11990_vm5 = vcmp.ne.s32.totalorder %v10681_v5, 0  ;;  %v15588_v28 = vmov 0  ;;  %vm12011_vm6 = vmand %vm15264_vm7, %vm15263_vm13 }
  0x79   : > { %727 = vrot.lane.b32.xlu1 %v11788_v46, %s11437_s16  ;;  %725 = vrot.lane.b32.xlu0 %v11770_v41, %s11437_s16  ;;  %v15589_v28 = vsel %vm11990_vm5, 4294967295, %v15588_v28  ;;  %v11994_v30 = vshrl.u32 %v544_v6, 7  ;;  %v10683_v32 = vrot.slane %v830_v18, 9  ;;  %vm15592_vm14 = vcmp.lt.s32.totalorder %v424_v58, 16 }
  0x7a   : > { %15590 = vst [vmem:[#allocation32_spill] sm:$0xff] %v15589_v28  ;;  %v496_v34 = vsel %vm15592_vm14, 1, %v15269_v21  ;;  %v15593_v36 = vmov 0  ;;  %vm12015_vm11 = vcmp.ne.s32.totalorder %v10675_v16, 0  ;;  %v15595_v38 = vmov 0  ;;  %vm12024_vm14 = vmand %vm812_vm15, %vm11990_vm5 }
  0x7b   : > { %15591 = vst [vmem:[#allocation33_spill] sm:$0xff] %v11994_v30  ;;  %v15594_v36 = vsel %vm12011_vm6, 4294967295, %v15593_v36  ;;  %v15596_v38 = vsel %vm12015_vm11, 4294967295, %v15595_v38  ;;  %v10674_v42 = vrot.slane %v781_v26, 9  ;;  %vm15598_vm12 = vcmp.lt.s32.totalorder %v11915_v2, 16 }
  0x7c   : > { %15597 = vst [vmem:[#allocation34_spill] sm:$0xff] %v15596_v38  ;;  %v829_v43 = vsel %vm15598_vm12, 1, %v15269_v21  ;;  %v10655_v44 = vrot.slane %v456_v27, 9  ;;  %vm15602_vm12 = vmand %vm11957_vm2, %vm11804_vm9  ;;  %v12047_v58 = vadd.s32 4294967295, %v11970_v22  ;;  %vm15606_vm13 = vcmp.ge.s32.totalorder %v11970_v22, 0 }
  0x7d   : > { %361 = vrot.lane.b32.xlu1 %v11672_v11, %s11440_s9  ;;  %359 = vrot.lane.b32.xlu0 %v11660_v9, %s11440_s9  ;;  %vm12042_vm15 = vmand %vm15602_vm12, %vm11818_vm0  ;;  %v784_v61 = vsel %vm15606_vm13, 1, %v15269_v21  ;;  %v10663_v0 = vrot.slane %v496_v34, 9  ;;  %vm12057_vm9 = vcmp.ne.s32.totalorder %v10683_v32, 0  ;;  %v15607_v51 = vmov 0 }
  0x7e   : > { %15605 = vst [vmem:[#allocation36_spill] sm:$0xff] %v12047_v58  ;;  %v15608_v51 = vsel %vm12057_vm9, 4294967295, %v15607_v51  ;;  %v10682_v54 = vrot.slane %v829_v43, 9  ;;  %v12066_v1 = vsub.s32 1, %v11994_v30  ;;  %v12069_v4 = vsub.s32 5, %v11994_v30 }
  0x7f   : > { %15609 = vst [vmem:[#allocation37_spill] sm:$0xff] %v15608_v51  ;;  %vm15610_vm0 = vcmp.lt.s32.totalorder %v11965_v19, 16  ;;  %vm15611_vm13 = vcmp.ge.s32.totalorder %v11965_v19, 0  ;;  %vm12079_vm5 = vcmp.ne.s32.totalorder %v10674_v42, 0  ;;  %v15614_v6 = vmov 0 }
  0x80   : > { %vm12075_vm12 = vmand %vm15611_vm13, %vm15610_vm0  ;;  %v15615_v6 = vsel %vm12079_vm5, 4294967295, %v15614_v6  ;;  %vm12084_vm4 = vcmp.ne.s32.totalorder %v10655_v44, 0  ;;  %v15617_v16 = vmov 0  ;;  %v866_v18 = vsel %vm11974_vm1, 1, %v15269_v21 }
  0x81   : > { %735 = vrot.lane.b32.xlu1 %v11836_v56, %s11437_s16  ;;  %733 = vrot.lane.b32.xlu0 %v11816_v53, %s11437_s16  ;;  %15616 = vst [vmem:[#allocation38_spill] sm:$0xff] %v15615_v6  ;;  %v15618_v16 = vsel %vm12084_vm4, 4294967295, %v15617_v16  ;;  %v10677_v26 = vrot.slane %v784_v61, 9  ;;  %vm15620_vm0 = vcmp.lt.s32.totalorder %v11970_v22, 16  ;;  %v868_v32 = vsel %vm12024_vm14, 1, %v15269_v21  ;;  %vm15621_vm1 = vmand %vm12011_vm6, %vm12015_vm11 }
  0x82   : > { %15619 = vst [vmem:[#allocation39_spill] sm:$0xff] %v15618_v16  ;;  %v832_v27 = vsel %vm15620_vm0, 1, %v15269_v21  ;;  %v867_v34 = vsel %vm12042_vm15, 1, %v15269_v21  ;;  %vm12107_vm13 = vmand %vm15621_vm1, %vm12057_vm9  ;;  %vm15281_vm7 = vcmp.lt.s32.totalorder %v12047_v58, 16  ;;  %vm12117_vm15 = vcmp.ne.s32.totalorder %v10682_v54, 0 }
  0x83   : > { %v15624_v42 = vmov 0  ;;  %v12122_v43 = vadd.s32 4294967295, %v12033_v48  ;;  %vm15628_vm1 = vcmp.ge.s32.totalorder %v12033_v48, 0  ;;  %vm12132_vm14 = vcmp.ne.s32.totalorder %v10663_v0, 0 }
  0x84   : > { %v15625_v42 = vsel %vm12117_vm15, 4294967295, %v15624_v42  ;;  %v783_v44 = vsel %vm15628_vm1, 1, %v15269_v21  ;;  %v15629_v47 = vmov 0  ;;  %v881_v49 = vrot.slane %v866_v18, %v12069_v4 }
  0x85   : > { %369 = vrot.lane.b32.xlu1 %v11668_v10, %s11440_s9  ;;  %367 = vrot.lane.b32.xlu0 %v11658_v8, %s11440_s9  ;;  %15626 = vst [vmem:[#allocation40_spill] sm:$0xff] %v15625_v42  ;;  %15627 = vst [vmem:[#allocation41_spill] sm:$0xff] %v12122_v43  ;;  %v15630_v47 = vsel %vm12132_vm14, 4294967295, %v15629_v47  ;;  %v877_v61 = vrot.slane %v866_v18, %v12066_v1  ;;  %v10685_v54 = vrot.slane %v832_v27, 9  ;;  %v15633_v30 = vmov 0  }
  0x86   : > { %15631 = vst [vmem:[#allocation42_spill] sm:$0xff] %v15630_v47  ;;  %v893_v21 = vrot.slane %v868_v32, %v12066_v1  ;;  %vm15634_vm1 = vcmp.lt.s32.totalorder %v11900_v62, 16  ;;  %v870_v0 = vsel %vm12107_vm13, 1, %v15633_v30  ;;  %vm15635_vm0 = vcmp.ge.s32.totalorder %v12047_v58, 0  ;;  %vm15641_vm13 = vmand %vm12075_vm12, %vm12079_vm5 }
  0x87   : > { %v12147_v51 = vsel %vm15634_vm1, 1, %v15633_v30  ;;  %vm12156_vm9 = vmand %vm15635_vm0, %vm15281_vm7  ;;  %v15636_v18 = vmov 0  ;;  %vm12160_vm11 = vcmp.ne.s32.totalorder %v10677_v26, 0  ;;  %v15638_v27 = vmov 0 }
  0x88   : > { %v15637_v18 = vsel %vm12156_vm9, 4294967295, %v15636_v18  ;;  %v15639_v27 = vsel %vm12160_vm11, 4294967295, %v15638_v27  ;;  %v897_v55 = vrot.slane %v868_v32, %v12069_v4  ;;  %v889_v38 = vrot.slane %v867_v34, %v12069_v4  ;;  %vm12173_vm1 = vmand %vm15641_vm13, %vm12117_vm15 }
  0x89   : > { %365 = vrot.lane.b32.xlu1 %v11683_v15, %s11440_s9  ;;  %363 = vrot.lane.b32.xlu0 %v11674_v12, %s11440_s9  ;;  %15640 = vst [vmem:[#allocation44_spill] sm:$0xff] %v15639_v27  ;;  %v10676_v28 = vrot.slane %v783_v44, 9  ;;  %vm15644_vm0 = vcmp.lt.s32.totalorder %v12033_v48, 16  ;;  %v885_v32 = vrot.slane %v867_v34, %v12066_v1  ;;  %vm15302_vm8 = vcmp.ge.s32.totalorder %v12122_v43, 0  ;;  %vm488_vm13 = vmand %vm11905_vm10, %vm12084_vm4 }
  0x8a   : > { %v831_v26 = vsel %vm15644_vm0, 1, %v15633_v30  ;;  %vm15299_vm6 = vcmp.lt.s32.totalorder %v12122_v43, 16  ;;  %v12189_v44 = vrot.slane %v881_v49, %v12066_v1  ;;  %v12192_v42 = vrot.slane %v877_v61, %v12066_v1 }
  0x8b   : > { %v913_v34 = vrot.slane %v870_v0, %v12069_v4  ;;  %vm12199_vm0 = vcmp.ne.s32.totalorder %v10685_v54, 0  ;;  %v15645_v6 = vmov 0  ;;  %vm15648_vm7 = vcmp.ge.s32.totalorder %v11900_v62, 0  ;;  %vm12220_vm15 = vmand %vm15302_vm8, %vm15299_vm6 }
  0x8c   : > { %v15646_v6 = vsel %vm12199_vm0, 4294967295, %v15645_v6  ;;  %v12206_v13 = vsel %vm15648_vm7, 1, %v15633_v30  ;;  %v869_v61 = vsel %vm12173_vm1, 1, %v15633_v30  ;;  %v10684_v40 = vrot.slane %v831_v26, 9 }
  0x8d   : > { %377 = vrot.lane.b32.xlu1 %v11701_v20, %s11440_s9  ;;  %375 = vrot.lane.b32.xlu0 %v11690_v17, %s11440_s9  ;;  %15647 = vst [vmem:[#allocation45_spill] sm:$0xff] %v15646_v6  ;;  %v15649_v54 = vmov 0  ;;  %vm12224_vm7 = vcmp.ne.s32.totalorder %v10676_v28, 0  ;;  %v15651_v49 = vmov 0  ;;  %v12229_v25 = vadd.s32 4294967295, %v12141_v35 }
  0x8e   : > { %v15650_v54 = vsel %vm12220_vm15, 4294967295, %v15649_v54  ;;  %v15652_v49 = vsel %vm12224_vm7, 4294967295, %v15651_v49  ;;  %vm15655_vm1 = vcmp.ge.s32.totalorder %v12141_v35, 0  ;;  %v12236_v62 = vrot.slane %v893_v21, %v12066_v1 }
  0x8f   : > { %15653 = vst [vmem:[#allocation46_spill] sm:$0xff] %v15652_v49  ;;  %15654 = vst [vmem:[#allocation47_spill] sm:$0xff] %v12229_v25  ;;  %v785_v26 = vsel %vm15655_vm1, 1, %v15633_v30  ;;  %v12239_v52 = vrot.slane %v897_v55, %v12066_v1  ;;  %v12242_v28 = vrot.slane %v889_v38, %v12066_v1  ;;  %v12245_v37 = vrot.slane %v885_v32, %v12066_v1 }
  0x90   : > { %vm15656_vm1 = vmand %vm12156_vm9, %vm12160_vm11  ;;  %v12264_v21 = vrot.slane %v913_v34, %v12066_v1  ;;  %v909_v55 = vrot.slane %v870_v0, %v12066_v1  ;;  %v901_v38 = vrot.slane %v869_v61, %v12066_v1  ;;  %v905_v6 = vrot.slane %v869_v61, %v12069_v4 }
  0x91   : > { %373 = vrot.lane.b32.xlu1 %v11721_v31, %s11440_s9  ;;  %371 = vrot.lane.b32.xlu0 %v11708_v24, %s11440_s9  ;;  %vm12254_vm6 = vmand %vm15656_vm1, %vm12199_vm0  ;;  %vm12284_vm8 = vcmp.ne.s32.totalorder %v10684_v40, 0  ;;  %v15661_v0 = vmov 0  ;;  %v10678_v34 = vrot.slane %v785_v26, 9  ;;  %vm15664_vm0 = vcmp.lt.s32.totalorder %v12141_v35, 16 }
  0x92   : > { %vm12275_vm1 = vmand %vm488_vm13, %vm12132_vm14  ;;  %v15662_v0 = vsel %vm12284_vm8, 4294967295, %v15661_v0  ;;  %v833_v27 = vsel %vm15664_vm0, 1, %v15633_v30  ;;  %v12294_v61 = vsel %vm12254_vm6, 1, %v15633_v30  ;;  %vm15332_vm13 = vcmp.ge.s32.totalorder %v12229_v25, 0 }
  0x93   : > { %15663 = vst [vmem:[#allocation48_spill] sm:$0xff] %v15662_v0  ;;  %vm15329_vm2 = vcmp.lt.s32.totalorder %v12229_v25, 16  ;;  %vm15665_vm11 = vcmp.ge.s32.totalorder %v11893_v60, 0  ;;  %v12310_v50 = vrot.slane %v909_v55, %v12066_v1  ;;  %v12313_v26 = vrot.slane %v901_v38, %v12066_v1  ;;  %vm15666_vm6 = vmand %vm12220_vm15, %vm12224_vm7 }
  0x94   : > { %v458_v40 = vsel %vm15665_vm11, 1, %v15633_v30  ;;  %vm12322_vm11 = vmand %vm15666_vm6, %vm12284_vm8  ;;  %v12329_v35 = vsel %vm12275_vm1, 1, %v15633_v30  ;;  %v10686_v55 = vrot.slane %v833_v27, 9  ;;  %v929_v38 = vrot.slane %v12294_v61, %v12069_v4 }
  0x95   : > { %385 = vrot.lane.b32.xlu1 %v11762_v39, %s11440_s9  ;;  %383 = vrot.lane.b32.xlu0 %v11728_v33, %s11440_s9  ;;  %vm12337_vm4 = vmand %vm15332_vm13, %vm15329_vm2  ;;  %vm12341_vm6 = vcmp.ne.s32.totalorder %v10678_v34, 0  ;;  %v15671_v49 = vmov 0  ;;  %v10657_v48 = vrot.slane %v458_v40, 9  ;;  %vm15674_vm1 = vcmp.lt.s32.totalorder %v11893_v60, 16 }
  0x96   : > { %v15672_v49 = vsel %vm12341_vm6, 4294967295, %v15671_v49  ;;  %v498_v27 = vsel %vm15674_vm1, 1, %v15633_v30  ;;  %vm15675_vm5 = vcmask 130048   ;;  %v925_v60 = vrot.slane %v12294_v61, %v12066_v1  ;;  %vm15698_vm10 = vmand %vm12337_vm4, %vm12341_vm6 }
  0x97   : > { %15673 = vst [vmem:[#allocation49_spill] sm:$0xff] %v15672_v49  ;;  %vm15676_vm13 = vmmov %vm15675_vm5  ;;  %v12364_v59 = vsel %vm12322_vm11, 1, %v15633_v30  ;;  %v547_v61 = vrot.slane %v12329_v35, %v12066_v1  ;;  %v15679_v16 = vmov 0  ;;  %v10665_v45 = vrot.slane %v498_v27, 9 }
  0x98   : > { %vm15677_vm14 = vmmov %vm15675_vm5  ;;  %vm15682_vm11 = vcmask 1043456   ;;  %vm15683_vm1 = vcmp.eq.s32.totalorder %v12192_v42, 1  ;;  %vm12397_vm0 = vcmp.ne.s32.totalorder %v10657_v48, 0  ;;  %v15688_v42 = vrot.slane %v12147_v51, 9 }
  0x99   : > { %381 = vrot.lane.b32.xlu1 %v11788_v46, %s11440_s9  ;;  %379 = vrot.lane.b32.xlu0 %v11770_v41, %s11440_s9  ;;  %v10656_v48 = vrot.slane %v12206_v13, 9  ;;  %vm15692_vm2 = vcmp.ge.s32.totalorder %v11926_v3, 0  ;;  %v15718_v13 = vmov 0 }
  0x9d   : > { %2278 = vrot.lane.b32.xlu1 %v11672_v11, %s11441_s20  ;;  %2276 = vrot.lane.b32.xlu0 %v11660_v9, %s11441_s20 }
  0xa1   : > { %389 = vrot.lane.b32.xlu1 %v11836_v56, %s11440_s9  ;;  %387 = vrot.lane.b32.xlu0 %v11816_v53, %s11440_s9  ;;  %s11444_s9 = smov 113  }
  0xa5   : > { %2286 = vrot.lane.b32.xlu1 %v11668_v10, %s11441_s20  ;;  %2284 = vrot.lane.b32.xlu0 %v11658_v8, %s11441_s20 }
  0xa9   : > { %2282 = vrot.lane.b32.xlu1 %v11683_v15, %s11441_s20  ;;  %2280 = vrot.lane.b32.xlu0 %v11674_v12, %s11441_s20 }
  0xad   : > { %2294 = vrot.lane.b32.xlu1 %v11701_v20, %s11441_s20  ;;  %2292 = vrot.lane.b32.xlu0 %v11690_v17, %s11441_s20 }
  0xb1   : > { %2290 = vrot.lane.b32.xlu1 %v11721_v31, %s11441_s20  ;;  %2288 = vrot.lane.b32.xlu0 %v11708_v24, %s11441_s20 }
  0xb5   : > { %2302 = vrot.lane.b32.xlu1 %v11762_v39, %s11441_s20  ;;  %2300 = vrot.lane.b32.xlu0 %v11728_v33, %s11441_s20 }
  0xb9   : > { %2298 = vrot.lane.b32.xlu1 %v11788_v46, %s11441_s20  ;;  %2296 = vrot.lane.b32.xlu0 %v11770_v41, %s11441_s20 }
  0xbd   : > { %3252 = vrot.lane.b32.xlu1 %v11672_v11, %s11442_s8  ;;  %3250 = vrot.lane.b32.xlu0 %v11660_v9, %s11442_s8 }
  0xc1   : > { %2306 = vrot.lane.b32.xlu1 %v11836_v56, %s11441_s20  ;;  %2304 = vrot.lane.b32.xlu0 %v11816_v53, %s11441_s20 }
  0xc5   : > { %3260 = vrot.lane.b32.xlu1 %v11668_v10, %s11442_s8  ;;  %3258 = vrot.lane.b32.xlu0 %v11658_v8, %s11442_s8 }
  0xc9   : > { %3256 = vrot.lane.b32.xlu1 %v11683_v15, %s11442_s8  ;;  %3254 = vrot.lane.b32.xlu0 %v11674_v12, %s11442_s8 }
  0xcd   : > { %3268 = vrot.lane.b32.xlu1 %v11701_v20, %s11442_s8  ;;  %3266 = vrot.lane.b32.xlu0 %v11690_v17, %s11442_s8  ;;  %v15689_v17 = vmov 0 }
  0xd1   : > { %3264 = vrot.lane.b32.xlu1 %v11721_v31, %s11442_s8  ;;  %3262 = vrot.lane.b32.xlu0 %v11708_v24, %s11442_s8 }
  0xd3   : > { %v714_v47 = vpop.permute.xlu1 %713  ;;  %v706_v23 = vpop.permute.xlu0 %705 }
  0xd4   : > { %v769_v2 = vsel %vm15675_vm5, 0.0, %v706_v23  ;;  %vm15678_vm5 = vcmp.eq.s32.totalorder %v12189_v44, 1 }
  0xd5   : > { %3276 = vrot.lane.b32.xlu1 %v11762_v39, %s11442_s8  ;;  %3274 = vrot.lane.b32.xlu0 %v11728_v33, %s11442_s8  ;;  %v12354_v33 = vrot.slane %v905_v6, %v12066_v1  ;;  %v1018_v44 = vsel %vm15683_vm1, %v769_v2, 0.0  ;;  %vm12406_vm1 = vcmp.ne.s32.totalorder %v15688_v42, 0  ;;  %v15711_v42 = vmov 0.0  }
  0xd6   : > { %v15690_v17 = vsel %vm12406_vm1, 4294967295, %v15689_v17 }
  0xd7   : > { %v12348_v32 = vpop.permute.xlu1 %715  ;;  %v708_v22 = vpop.permute.xlu0 %707  ;;  %15691 = vst [vmem:[#allocation51_spill] sm:$0xff] %v15690_v17 }
  0xd8   : > { %v742_v34 = vsel %vm15676_vm13, %v714_v47, %v12348_v32  ;;  %v738_v40 = vsel %vm15677_vm14, %v706_v23, %v708_v22  ;;  %v12375_v23 = vld [vmem:[%s15239_s1 + $0x8] sm:$0xff]  ;;  %vm12383_vm13 = vcmp.ne.s32.totalorder %v10686_v55, 0  ;;  %v15684_v55 = vmov 0  ;;  %vm15686_vm14 = vmmov %vm15682_vm11 }
  0xd9   : > { %3272 = vrot.lane.b32.xlu1 %v11788_v46, %s11442_s8  ;;  %3270 = vrot.lane.b32.xlu0 %v11770_v41, %s11442_s8  ;;  %v1019_v6 = vsel %vm15678_vm5, %v738_v40, 0.0  ;;  %v15680_v16 = vsel %vm12383_vm13, 4294967295, %v15679_v16  ;;  %v12393_v40 = vrot.slane %v929_v38, %v12066_v1  ;;  %v551_v46 = vrot.slane %v12329_v35, %v12069_v4  ;;  %vm12429_vm15 = vmand %vm15698_vm10, %vm12383_vm13 }
  0xda   : > { %15681 = vst [vmem:[#allocation50_spill] sm:$0xff] %v15680_v16  ;;  %10688 = vmatprep.subr.msk.mxu0 %vm15682_vm11, %v1019_v6  ;;  %v15685_v55 = vsel %vm12397_vm0, 4294967295, %v15684_v55  ;;  %vm15687_vm11 = vcmp.eq.s32.totalorder %v12239_v52, 1  ;;  %v917_v35 = vrot.slane %v12364_v59, %v12066_v1  ;;  %v460_v38 = vsel %vm15692_vm2, 1, %v15633_v30 }
  0xdb   : > { %v712_v27 = vpop.permute.xlu1 %711  ;;  %10689 = vmatpush1.msk.msra.mxu0 %vm15686_vm14, %v1018_v44  ;;  %v710_v6 = vpop.permute.xlu0 %709  ;;  %v1023_v2 = vsel %vm15687_vm11, %v742_v34, 0.0  ;;  %vm15693_vm14 = vcmask 130048   ;;  %vm15694_vm5 = vcmask 1043456   ;;  %vm15695_vm11 = vcmask 31744  }
  0xdc   : > { %v741_v44 = vsel %vm15693_vm14, %v712_v27, %v714_v47  ;;  %10694 = vmatprep.subr.msk.mxu0 %vm15694_vm5, %v1023_v2  ;;  %10690 = vmatmul.mubr.msk.f32.vlgmr.msra.gmra.mrb[0].mxu0 %vm15695_vm11, %v12375_v23  ;;  %vm15696_vm8 = vmmov %vm15693_vm14  ;;  %vm15701_vm2 = vcmp.lt.s32.totalorder %v11926_v3, 16  ;;  %vm15702_vm5 = vcmp.eq.s32.totalorder %v12236_v62, 1  ;;  %vm15704_vm10 = vcmp.eq.s32.totalorder %v12245_v37, 1 }
  0xdd   : > { %v740_v52 = vsel %vm15696_vm8, %v710_v6, %v712_v27  ;;  %vm15697_vm7 = vmmov %vm15696_vm8  ;;  %v500_v47 = vsel %vm15701_vm2, 1, %v15633_v30  ;;  %v1022_v34 = vsel %vm15702_vm5, %v741_v44, 0.0  ;;  %3280 = vrot.lane.b32.xlu1 %v11836_v56, %s11442_s8  ;;  %3278 = vrot.lane.b32.xlu0 %v11816_v53, %s11442_s8  ;;  %vm15703_vm8 = vcmp.eq.s32.totalorder %v12242_v28, 1 }
  0xde   : > { %v739_v51 = vsel %vm15697_vm7, %v708_v22, %v710_v6  ;;  %v1021_v22 = vsel %vm15703_vm8, %v740_v52, 0.0  ;;  %vm490_vm7 = vmand %vm11941_vm3, %vm12397_vm0  ;;  %vm12450_vm14 = vcmp.ne.s32.totalorder %v10665_v45, 0  ;;  %v15705_v62 = vmov 0  ;;  %1295 = vmatprep.mubr.f32.mxu0 %v15711_v42 }
  0xdf   : > { %v1020_v27 = vsel %vm15704_vm10, %v739_v51, 0.0  ;;  %v15706_v62 = vsel %vm12450_vm14, 4294967295, %v15705_v62  ;;  %vm15708_vm11 = vcmask 1043456   ;;  %v12458_v28 = vrot.slane %v925_v60, %v12066_v1  ;;  %v12463_v2 = vpop.permute.xlu1 %723  ;;  %v722_v45 = vpop.permute.xlu0 %721 }
  0xe0   : > { %15707 = vst [vmem:[#allocation52_spill] sm:$0xff] %v15706_v62  ;;  %10691 = vmatprep.subr.msk.mxu1 %vm15708_vm11, %v1021_v22  ;;  %vm15709_vm2 = vmmov %vm15708_vm11  ;;  %v12461_v37 = vrot.slane %v547_v61, %v12066_v1  ;;  %v10659_v6 = vrot.slane %v460_v38, 9  ;;  %v921_v44 = vrot.slane %v12364_v59, %v12069_v4  ;;  %v873_v52 = vsel %vm12429_vm15, 1, %v15633_v30 }
  0xe1   : > { %10695 = vmatpush1.msk.msra.mxu0 %vm15709_vm2, %v1022_v34  ;;  %vm15710_vm8 = vmmov %vm15709_vm2  ;;  %v10667_v60 = vrot.slane %v500_v47, 9  ;;  %vm15712_vm10 = vcmp.ge.s32.totalorder %v11965_v19, 0  ;;  %vm15713_vm11 = vcmask 130048   ;;  %vm15714_vm2 = vcmask 31744   ;;  %4769 = vrot.lane.b32.xlu1 %v11674_v12, %s11443_s15 }
  0xe2   : > { %10692 = vmatpush1.msk.msra.mxu1 %vm15710_vm8, %v1020_v27  ;;  %v459_v61 = vsel %vm15712_vm10, 1, %v15633_v30  ;;  %v746_v38 = vsel %vm15713_vm11, %v722_v45, %v12463_v2  ;;  %10696 = vmatmul.mubr.msk.f32.vlgmr.msra.gmra.mrb[2].mxu0 %vm15714_vm2, %v12375_v23  ;;  %vm15715_vm8 = vmmov %vm15714_vm2  ;;  %v12482_v59 = vrot.slane %v551_v46, %v12066_v1  ;;  %vm12495_vm10 = vcmp.ne.s32.totalorder %v10656_v48, 0 }
  0xe3   : > { %10693 = vmatmul.mubr.msk.f32.vlgmr.msra.gmra.mrb[0].mxu1 %vm15715_vm8, %v12375_v23  ;;  %vm12491_vm15 = vmand %vm490_vm7, %vm12450_vm14  ;;  %v15719_v13 = vsel %vm12495_vm10, 4294967295, %v15718_v13  ;;  %vm15720_vm11 = vcmp.lt.s32.totalorder %v11965_v19, 16  ;;  %4767 = vrot.lane.b32.xlu0 %v11672_v11, %s11443_s15  ;;  %vm15721_vm7 = vcmp.eq.s32.totalorder %v12264_v21, 1  ;;  %v12512_v48 = vrot.slane %v917_v35, %v12066_v1  ;;  %v718_v19 = vpop.permute.xlu0 %717 }
  0xe4   : > { %v12502_v46 = vsel %vm15720_vm11, 1, %v15633_v30  ;;  %v1027_v47 = vsel %vm15721_vm7, %v746_v38, 0.0  ;;  %vm15722_vm8 = vcmp.ge.s32.totalorder %v12047_v58, 0  ;;  %vm15723_vm11 = vcmask 1043456   ;;  %1437 = vmatprep.mubr.f32.mxu0 %v15711_v42  ;;  %v720_v38 = vpop.permute.xlu1 %719  ;;  %1366 = vmatprep.mubr.f32.mxu1 %v15711_v42 }
  0xe5   : > { %v462_v34 = vsel %vm15722_vm8, 1, %v15633_v30  ;;  %10700 = vmatprep.subr.msk.mxu0 %vm15723_vm11, %v1027_v47  ;;  %v933_v22 = vrot.slane %v873_v52, %v12066_v1  ;;  %v937_v21 = vrot.slane %v873_v52, %v12069_v4  ;;  %vm12522_vm7 = vcmp.ne.s32.totalorder %v10659_v6, 0  ;;  %4775 = vrot.lane.b32.xlu1 %v11668_v10, %s11443_s15  ;;  %vm15739_vm0 = vmmov %vm15723_vm11 }
  0xe6   : > { %v15724_v27 = vmov 0  ;;  %v10658_v35 = vrot.slane %v459_v61, 9  ;;  %v12528_v3 = vrot.slane %v921_v44, %v12066_v1  ;;  %v538_v47 = vsel %vm12491_vm15, 1, %v15633_v30 }
  0xe7   : > { %v15725_v27 = vsel %vm12522_vm7, 4294967295, %v15724_v27  ;;  %vm15726_vm8 = vnez %v15580_v14  ;;  %vm12537_vm5 = vcmp.ne.s32.totalorder %v10667_v60, 0  ;;  %v15727_v6 = vmov 0  ;;  %4765 = vrot.lane.b32.xlu0 %v11660_v9, %s11443_s15  ;;  %v730_v60 = vpop.permute.xlu0 %729 }
  0xe8   : > { %v15728_v6 = vsel %vm12537_vm5, 4294967295, %v15727_v6  ;;  %v10666_v52 = vrot.slane %v12502_v46, 9  ;;  %vm15730_vm2 = vcmask 130048   ;;  %v10661_v51 = vrot.slane %v462_v34, 9 }
  0xe9   : > { %15729 = vst [vmem:[#allocation53_spill] sm:$0xff] %v15728_v6  ;;  %v745_v61 = vsel %vm15730_vm2, %v720_v38, %v722_v45  ;;  %vm15731_vm13 = vmmov %vm15730_vm2  ;;  %vm15733_vm15 = vcmp.eq.s32.totalorder %v12310_v50, 1  ;;  %vm15734_vm14 = vcmp.eq.s32.totalorder %v12313_v26, 1  ;;  %v12567_v50 = vrot.slane %v933_v22, %v12066_v1  ;;  %4771 = vrot.lane.b32.xlu1 %v11683_v15, %s11443_s15 }
  0xea   : > { %v743_v44 = vsel %vm15731_vm13, %v12348_v32, %v718_v19  ;;  %vm15732_vm6 = vmmov %vm15730_vm2  ;;  %v1026_v49 = vsel %vm15733_vm15, %v745_v61, 0.0  ;;  %vm15735_vm2 = vcmp.eq.s32.totalorder %v12354_v33, 1  ;;  %vm15737_vm15 = vcmp.lt.s32.totalorder %v12047_v58, 16 }
  0xeb   : > { %v744_v16 = vsel %vm15732_vm6, %v718_v19, %v720_v38  ;;  %v1024_v62 = vsel %vm15734_vm14, %v743_v44, 0.0  ;;  %vm15736_vm6 = vnez %v15594_v36  ;;  %v502_v19 = vsel %vm15737_vm15, 1, %v15633_v30  ;;  %vm15738_vm14 = vmmov %vm15723_vm11  ;;  %10701 = vmatpush1.msk.msra.mxu0 %vm15739_vm0, %v1026_v49  ;;  %4777 = vrot.lane.b32.xlu0 %v11708_v24, %s11443_s15 }
  0xec   : > { %v1025_v45 = vsel %vm15735_vm2, %v744_v16, 0.0  ;;  %v12570_v33 = vrot.slane %v937_v21, %v12066_v1  ;;  %v567_v26 = vrot.slane %v538_v47, %v12069_v4  ;;  %vm15740_vm2 = vmand %vm15726_vm8, %vm12495_vm10  ;;  %vm12584_vm0 = vcmp.ne.s32.totalorder %v10658_v35, 0  ;;  %v12588_v16 = vpop.permute.xlu1 %731 }
  0xed   : > { %10697 = vmatprep.subr.msk.mxu1 %vm15738_vm14, %v1025_v45  ;;  %vm12580_vm15 = vmand %vm15740_vm2, %vm12406_vm1  ;;  %v15743_v49 = vmov 0  ;;  %v563_v46 = vrot.slane %v538_v47, %v12066_v1  ;;  %vm15748_vm2 = vcmp.ge.s32.totalorder %v12122_v43, 0  ;;  %v10669_v21 = vrot.slane %v502_v19, 9  ;;  %v726_v19 = vpop.permute.xlu0 %725  ;;  %4783 = vrot.lane.b32.xlu1 %v11701_v20, %s11443_s15 }
  0xee   : > { %v15744_v49 = vsel %vm12584_vm0, 4294967295, %v15743_v49  ;;  %vm15746_vm14 = vmmov %vm15723_vm11  ;;  %vm15747_vm11 = vcmask 31744   ;;  %v461_v34 = vsel %vm15748_vm2, 1, %v15633_v30  ;;  %vm15755_vm2 = vcmp.eq.s32.totalorder %v12393_v40, 1 }
  0xef   : > { %15745 = vst [vmem:[#allocation54_spill] sm:$0xff] %v15744_v49  ;;  %10698 = vmatpush1.msk.msra.mxu1 %vm15746_vm14, %v1024_v62  ;;  %10702 = vmatmul.mubr.msk.f32.vlgmr.msra.gmra.mrb[4].mxu0 %vm15747_vm11, %v12375_v23  ;;  %vm15749_vm1 = vmmov %vm15731_vm13  ;;  %v12628_v47 = vsel %vm12580_vm15, 1, %v15633_v30  ;;  %v15756_v61 = vmov 0  ;;  %v15759_v44 = vmov 0  ;;  %vm15762_vm10 = vcmask 1043456  }
  0xf0   : > { %v750_v22 = vsel %vm15749_vm1, %v730_v60, %v12588_v16  ;;  %vm15750_vm14 = vmmov %vm15747_vm11  ;;  %1579 = vmatprep.mubr.f32.mxu0 %v15711_v42  ;;  %vm15754_vm1 = vcmp.ge.s32.totalorder %v11713_v29, 0  ;;  %v12647_v40 = vrot.slane %v567_v26, %v12066_v1  ;;  %v10660_v45 = vrot.slane %v461_v34, 9  ;;  %4773 = vrot.lane.b32.xlu0 %v11658_v8, %s11443_s15 }
  0xf1   : > { %10699 = vmatmul.mubr.msk.f32.vlgmr.msra.gmra.mrb[2].mxu1 %vm15750_vm14, %v12375_v23  ;;  %vm15751_vm11 = vmand %vm15736_vm6, %vm12522_vm7  ;;  %v2357_v35 = vsel %vm15754_vm1, 1, %v15633_v30  ;;  %v1031_v38 = vsel %vm15755_vm2, %v750_v22, 0.0  ;;  %vm12638_vm1 = vcmp.ne.s32.totalorder %v10661_v51, 0  ;;  %vm15763_vm3 = vcmp.lt.s32.totalorder %v12122_v43, 16  ;;  %v728_v51 = vpop.permute.xlu1 %727  ;;  %4779 = vrot.lane.b32.xlu1 %v11721_v31, %s11443_s15 }
  0xf2   : > { %vm12612_vm13 = vmand %vm15751_vm11, %vm12537_vm5  ;;  %vm12634_vm11 = vcmp.ne.s32.totalorder %v10666_v52, 0  ;;  %v15760_v44 = vsel %vm12638_vm1, 4294967295, %v15759_v44  ;;  %10706 = vmatprep.subr.msk.mxu0 %vm15762_vm10, %v1031_v38  ;;  %1508 = vmatprep.mubr.f32.mxu1 %v15711_v42  ;;  %v501_v52 = vsel %vm15763_vm3, 1, %v15633_v30  ;;  %v12653_v32 = vrot.slane %v563_v46, %v12066_v1 }
  0xf3   : > { %vm491_vm14 = vmand %vm12075_vm12, %vm12584_vm0  ;;  %v15757_v61 = vsel %vm12634_vm11, 4294967295, %v15756_v61  ;;  %15761 = vst [vmem:[#allocation56_spill] sm:$0xff] %v15760_v44  ;;  %v12658_v22 = vsel %vm12612_vm13, 1, %v15633_v30  ;;  %v10736_v38 = vrot.slane %v2357_v35, 9  ;;  %vm15764_vm10 = vcmp.lt.s32.totalorder %v11713_v29, 16 }
  0xf4   : > { %15758 = vst [vmem:[#allocation55_spill] sm:$0xff] %v15757_v61  ;;  %v2405_v26 = vsel %vm15764_vm10, 1, %v15633_v30  ;;  %vm15765_vm15 = vcmask 130048   ;;  %vm12674_vm13 = vmand %vm491_vm14, %vm12634_vm11  ;;  %vm12678_vm5 = vcmp.ne.s32.totalorder %v10669_v21, 0  ;;  %v15770_v62 = vmov 0  ;;  %4785 = vrot.lane.b32.xlu0 %v11770_v41, %s11443_s15 }
  0xf5   : > { %v749_v34 = vsel %vm15765_vm15, %v728_v51, %v730_v60  ;;  %vm15766_vm2 = vmmov %vm15765_vm15  ;;  %v15771_v62 = vsel %vm12678_vm5, 4294967295, %v15770_v62  ;;  %vm15773_vm15 = vcmp.eq.s32.totalorder %v12458_v28, 1  ;;  %vm15775_vm14 = vcmp.eq.s32.totalorder %v12528_v3, 1  ;;  %4791 = vrot.lane.b32.xlu1 %v11762_v39, %s11443_s15 }
  0xf6   : > { %v747_v43 = vsel %vm15766_vm2, %v12463_v2, %v726_v19  ;;  %vm15767_vm3 = vmmov %vm15766_vm2  ;;  %15772 = vst [vmem:[#allocation57_spill] sm:$0xff] %v15771_v62  ;;  %v1030_v2 = vsel %vm15773_vm15, %v749_v34, 0.0  ;;  %vm15774_vm2 = vcmp.eq.s32.totalorder %v12512_v48, 1  ;;  %v10668_v21 = vrot.slane %v501_v52, 9  ;;  %v360_v52 = vpop.permute.xlu0 %359 }
  0xf7   : > { %v748_v58 = vsel %vm15767_vm3, %v726_v19, %v728_v51  ;;  %v1028_v60 = vsel %vm15774_vm2, %v747_v43, 0.0  ;;  %vm15776_vm3 = vcmask 1043456   ;;  %v555_v43 = vrot.slane %v12628_v47, %v12066_v1 }
  0xf8   : > { %v1029_v35 = vsel %vm15775_vm14, %v748_v58, 0.0  ;;  %vm15777_vm15 = vmmov %vm15776_vm3  ;;  %v559_v28 = vrot.slane %v12628_v47, %v12069_v4  ;;  %vm12702_vm2 = vcmp.ne.s32.totalorder %v10660_v45, 0  ;;  %v15778_v48 = vmov 0  ;;  %v12706_v58 = vpop.permute.xlu1 %361 }
  0xf9   : > { %10703 = vmatprep.subr.msk.mxu1 %vm15776_vm3, %v1029_v35  ;;  %10707 = vmatpush1.msk.msra.mxu0 %vm15777_vm15, %v1030_v2  ;;  %v15779_v48 = vsel %vm12702_vm2, 4294967295, %v15778_v48  ;;  %v10744_v3 = vrot.slane %v2405_v26, 9  ;;  %vm15781_vm14 = vmmov %vm15776_vm3  ;;  %vm15782_vm3 = vcmask 31744   ;;  %v583_v51 = vrot.slane %v12658_v22, %v12069_v4  ;;  %v12755_v35 = vld [vmem:[%s15239_s1] sm:$0xff] }
  0xfa   : > { %15780 = vst [vmem:[#allocation58_spill] sm:$0xff] %v15779_v48  ;;  %10704 = vmatpush1.msk.msra.mxu1 %vm15781_vm14, %v1028_v60  ;;  %10708 = vmatmul.mubr.msk.f32.vlgmr.msra.gmra.mrb[6].mxu0 %vm15782_vm3, %v12375_v23  ;;  %vm12714_vm10 = vcmp.ne.s32.totalorder %v10736_v38, 0  ;;  %v15783_v47 = vmov 0  ;;  %vm15786_vm11 = vcmp.ge.s32.totalorder %v12229_v25, 0  ;;  %vm15787_vm0 = vcmask 138240   ;;  %v15832_v48 = vld [vmem:[#allocation19_spill] sm:$0xff] }
  0xfb   : > { %v15784_v47 = vsel %vm12714_vm10, 4294967295, %v15783_v47  ;;  %v463_v45 = vsel %vm15786_vm11, 1, %v15633_v30  ;;  %v392_v19 = vsel %vm15787_vm0, %v360_v52, %v12706_v58  ;;  %vm15788_vm14 = vmmov %vm15787_vm0  ;;  %10705 = vmatmul.mubr.msk.f32.vlgmr.msra.gmra.mrb[4].mxu1 %vm15782_vm3, %v12375_v23  ;;  %1772 = vmatprep.mubr.f32.mxu0 %v15711_v42  ;;  %v539_v38 = vsel %vm12674_vm13, 1, %v15633_v30 }
  0xfc   : > { %15785 = vst [vmem:[#allocation59_spill] sm:$0xff] %v15784_v47  ;;  %v423_v26 = vsel %vm15788_vm14, 0.0, %v360_v52  ;;  %vm15789_vm11 = vmand %vm12156_vm9, %vm12638_vm1  ;;  %v12742_v2 = vadd.s32 1, %v11875_v57  ;;  %vm15793_vm0 = vcmp.eq.s32.totalorder %v12461_v37, 1  ;;  %vm15794_vm13 = vcmp.eq.s32.totalorder %v12482_v59, 1  ;;  %1650 = vmatprep.mubr.f32.mxu1 %v15711_v42 }
  0xfd   : > { %vm12737_vm15 = vmand %vm15789_vm11, %vm12678_vm5  ;;  %v688_v60 = vsel %vm15793_vm0, %v423_v26, 0.0  ;;  %v689_v46 = vsel %vm15794_vm13, %v392_v19, 0.0  ;;  %v579_v52 = vrot.slane %v12658_v22, %v12066_v1  ;;  %vm15795_vm14 = vnez %v15650_v54  ;;  %v736_v26 = vpop.permute.xlu1 %735  ;;  %v15964_v54 = vld [vmem:[#allocation42_spill] sm:$0xff] }
  0xfe   : > { %15792 = vst [vmem:[#allocation60_spill] sm:$0xff] %v12742_v2  ;;  %vm493_vm3 = vmand %vm15795_vm14, %vm12702_vm2  ;;  %vm12763_vm11 = vcmp.ne.s32.totalorder %v10668_v21, 0  ;;  %v15796_v37 = vmov 0  ;;  %vm15799_vm0 = vcmask 1043456   ;;  %v12770_v59 = vrot.slane %v555_v43, %v12066_v1  ;;  %v734_v43 = vpop.permute.xlu0 %733 }
  0xff   : > { %v15797_v37 = vsel %vm12763_vm11, 4294967295, %v15796_v37  ;;  %10712 = vmatprep.subr.msk.mxu0 %vm15799_vm0, %v689_v46  ;;  %vm15800_vm5 = vnez %v15566_v63  ;;  %vm12777_vm7 = vcmp.ne.s32.totalorder %v10744_v3, 0  ;;  %v15801_v22 = vmov 0  ;;  %vm12808_vm9 = vmand %vm493_vm3, %vm12763_vm11 }
 0x100   : > { %15798 = vst [vmem:[#allocation61_spill] sm:$0xff] %v15797_v37  ;;  %v15802_v22 = vsel %vm12777_vm7, 4294967295, %v15801_v22  ;;  %v10662_v21 = vrot.slane %v463_v45, 9  ;;  %vm15804_vm0 = vcmp.lt.s32.totalorder %v12229_v25, 16  ;;  %vm15805_vm13 = vcmask 1043456   ;;  %vm15814_vm3 = vmand %vm15800_vm5, %vm12714_vm10 }
 0x101   : > { %15803 = vst [vmem:[#allocation62_spill] sm:$0xff] %v15802_v22  ;;  %v503_v19 = vsel %vm15804_vm0, 1, %v15633_v30  ;;  %10713 = vmatpush1.msk.msra.mxu0 %vm15805_vm13, %v688_v60  ;;  %v12786_v46 = vrot.slane %v559_v28, %v12066_v1  ;;  %v12789_v29 = vrot.slane %v583_v51, %v12066_v1  ;;  %v571_v3 = vrot.slane %v539_v38, %v12066_v1 }
 0x102   : > { %v542_v45 = vsel %vm12737_vm15, 1, %v15633_v30  ;;  %vm15806_vm1 = vcmask 130048   ;;  %vm15808_vm13 = vcmask 31744   ;;  %v575_v28 = vrot.slane %v539_v38, %v12069_v4  ;;  %v15812_v38 = vld [vmem:[#allocation13_spill] sm:$0xff] }
 0x103   : > { %v751_v25 = vsel %vm15806_vm1, %v12588_v16, %v734_v43  ;;  %vm15807_vm0 = vmmov %vm15806_vm1  ;;  %10714 = vmatmul.mubr.msk.f32.vlgmr.msra.gmra.mrb[0].mxu0 %vm15808_vm13, %v12755_v35  ;;  %vm15811_vm15 = vcmp.eq.s32.totalorder %v12567_v50, 1  ;;  %4781 = vrot.lane.b32.xlu0 %v15812_v38, %s11443_s15  ;;  %vm15817_vm1 = vcmask 1043456   ;;  %v12835_v50 = vrot.slane %v579_v52, %v12066_v1 }
 0x104   : > { %v752_v62 = vsel %vm15807_vm0, %v734_v43, %v736_v26  ;;  %v1032_v16 = vsel %vm15811_vm15, %v751_v25, 0.0  ;;  %vm15813_vm0 = vcmp.eq.s32.totalorder %v12570_v33, 1  ;;  %vm12828_vm13 = vmand %vm15814_vm3, %vm12777_vm7  ;;  %v10670_v25 = vrot.slane %v503_v19, 9  ;;  %1914 = vmatprep.mubr.f32.mxu0 %v15711_v42  ;;  %v12844_v26 = vpop.permute.xlu1 %369  ;;  %v368_v19 = vpop.permute.xlu0 %367 }
 0x105   : > { %v1033_v34 = vsel %vm15813_vm0, %v752_v62, 0.0  ;;  %v599_v33 = vrot.slane %v542_v45, %v12069_v4  ;;  %v595_v63 = vrot.slane %v542_v45, %v12066_v1  ;;  %vm12840_vm0 = vcmp.ne.s32.totalorder %v10662_v21, 0  ;;  %vm15821_vm5 = vmmov %vm15817_vm1 }
 0x106   : > { %10709 = vmatprep.subr.msk.mxu1 %vm15817_vm1, %v1033_v34  ;;  %v15818_v62 = vmov 0  ;;  %vm674_vm1 = vcmp.eq.s32.totalorder %v12770_v59, 1  ;;  %v541_v52 = vsel %vm12808_vm9, 1, %v15633_v30  ;;  %vm15822_vm15 = vcmp.ge.s32.totalorder %v12742_v2, 0 }
 0x107   : > { %v15819_v62 = vsel %vm12840_vm0, 4294967295, %v15818_v62  ;;  %10710 = vmatpush1.msk.msra.mxu1 %vm15821_vm5, %v1032_v16  ;;  %v2359_v21 = vsel %vm15822_vm15, 1, %v15633_v30  ;;  %vm15823_vm7 = vcmask 138240   ;;  %vm15824_vm10 = vcmask 31744   ;;  %v15826_v16 = vld [vmem:[#allocation20_spill] sm:$0xff]  ;;  %4793 = vrot.lane.b32.xlu0 %v11816_v53, %s11443_s15  ;;  %vm15831_vm15 = vmmov %vm15821_vm5 }
 0x108   : > { %15820 = vst [vmem:[#allocation13_spill] sm:$0xff] %v15819_v62  ;;  %v396_v43 = vsel %vm15823_vm7, %v368_v19, %v12844_v26  ;;  %10711 = vmatmul.mubr.msk.f32.vlgmr.msra.gmra.mrb[6].mxu1 %vm15824_vm10, %v12375_v23  ;;  %v12863_v45 = vsel %vm12828_vm13, 1, %v15633_v30  ;;  %vm15825_vm9 = vcmp.lt.s32.totalorder %v12742_v2, 16  ;;  %4787 = vrot.lane.b32.xlu1 %v15826_v16, %s11443_s15  ;;  %vm15827_vm7 = vcmp.eq.s32.totalorder %v12647_v40, 1  ;;  %vm495_vm10 = vmand %vm12337_vm4, %vm12840_vm0  ;;  %v366_v22 = vpop.permute.xlu1 %365 }
 0x109   : > { %v2407_v51 = vsel %vm15825_vm9, 1, %v15633_v30  ;;  %v693_v23 = vsel %vm15827_vm7, %v396_v43, 0.0  ;;  %v12875_v34 = vrot.slane %v571_v3, %v12066_v1  ;;  %v12878_v60 = vrot.slane %v575_v28, %v12066_v1  ;;  %1843 = vmatprep.mubr.f32.mxu1 %v15711_v42 }
 0x10a   : > { %vm12884_vm13 = vcmp.ne.s32.totalorder %v10670_v25, 0  ;;  %v15828_v2 = vmov 0  ;;  %10718 = vmatprep.subr.msk.mxu0 %vm15831_vm15, %v693_v23  ;;  %v12892_v40 = vrot.slane %v599_v33, %v12066_v1  ;;  %v12895_v3 = vrot.slane %v595_v63, %v12066_v1  ;;  %v364_v25 = vpop.permute.xlu0 %363 }
 0x10b   : > { %v15829_v2 = vsel %vm12884_vm13, 4294967295, %v15828_v2  ;;  %v587_v28 = vrot.slane %v541_v52, %v12066_v1  ;;  %v10738_v43 = vrot.slane %v2359_v21, 9  ;;  %v591_v47 = vrot.slane %v541_v52, %v12069_v4  ;;  %vm12915_vm3 = vmand %vm495_vm10, %vm12884_vm13  ;;  %v15839_v21 = vld [vmem:[#allocation24_spill] sm:$0xff] }
 0x10c   : > { %15830 = vst [vmem:[#allocation20_spill] sm:$0xff] %v15829_v2  ;;  %v2456_v23 = vrot.slane %v12863_v45, %v12066_v1  ;;  %v10746_v37 = vrot.slane %v2407_v51, 9  ;;  %vm15833_vm7 = vcmp.ge.s32.totalorder %v15832_v48, 0  ;;  %vm15834_vm15 = vcmask 138240   ;;  %5653 = vrot.lane.b32.xlu1 %v11672_v11, %s11444_s9  ;;  %v15844_v2 = vld [vmem:[#allocation27_spill] sm:$0xff] }
 0x10d   : > { %v2358_v44 = vsel %vm15833_vm7, 1, %v15633_v30  ;;  %v395_v33 = vsel %vm15834_vm15, %v366_v22, %v368_v19  ;;  %vm15835_vm9 = vmmov %vm15834_vm15  ;;  %v12920_v51 = vadd.s32 1, %v15839_v21  ;;  %vm15841_vm7 = vcmp.eq.s32.totalorder %v12653_v32, 1 }
 0x10e   : > { %v393_v63 = vsel %vm15835_vm9, %v12706_v58, %v364_v25  ;;  %vm15836_vm5 = vmmov %vm15835_vm9  ;;  %v692_v19 = vsel %vm15841_vm7, %v395_v33, 0.0  ;;  %v12933_v62 = vadd.s32 1, %v15844_v2  ;;  %vm15846_vm10 = vcmask 1043456  }
 0x10f   : > { %v394_v61 = vsel %vm15836_vm5, %v364_v25, %v366_v22  ;;  %15840 = vst [vmem:[#allocation24_spill] sm:$0xff] %v12920_v51  ;;  %v690_v58 = vsel %vm674_vm1, %v393_v63, 0.0  ;;  %v15842_v22 = vld [vmem:[#allocation16_spill] sm:$0xff]  ;;  %vm15843_vm5 = vcmp.eq.s32.totalorder %v12786_v46, 1  ;;  %vm15847_vm9 = vmmov %vm15846_vm10  ;;  %v2460_v32 = vrot.slane %v12863_v45, %v12069_v4  ;;  %v376_v63 = vpop.permute.xlu0 %375 }
 0x110   : > { %4789 = vrot.lane.b32.xlu0 %v15842_v22, %s11443_s15  ;;  %v691_v25 = vsel %vm15843_vm5, %v394_v61, 0.0  ;;  %15845 = vst [vmem:[#allocation16_spill] sm:$0xff] %v12933_v62  ;;  %10719 = vmatpush1.msk.msra.mxu0 %vm15847_vm9, %v692_v19  ;;  %vm12939_vm1 = vcmp.ne.s32.totalorder %v10738_v43, 0  ;;  %v15848_v59 = vmov 0  ;;  %v10737_v33 = vrot.slane %v2358_v44, 9  ;;  %v12946_v61 = vpop.permute.xlu1 %377  ;;  %vm15851_vm7 = vmmov %vm15847_vm9 }
 0x111   : > { %10715 = vmatprep.subr.msk.mxu1 %vm15846_vm10, %v691_v25  ;;  %v15849_v59 = vsel %vm12939_vm1, 4294967295, %v15848_v59  ;;  %vm15850_vm15 = vcmp.lt.s32.totalorder %v15832_v48, 16  ;;  %vm15852_vm10 = vcmask 31744   ;;  %v12957_v44 = vsel %vm12915_vm3, 1, %v15633_v30  ;;  %4795 = vrot.lane.b32.xlu1 %v11836_v56, %s11443_s15  ;;  %vm15860_vm5 = vmmov %vm15847_vm9 }
 0x112   : > { %v2406_v46 = vsel %vm15850_vm15, 1, %v15633_v30  ;;  %10716 = vmatpush1.msk.msra.mxu1 %vm15851_vm7, %v690_v58  ;;  %10720 = vmatmul.mubr.msk.f32.vlgmr.msra.gmra.mrb[2].mxu0 %vm15852_vm10, %v12755_v35  ;;  %vm15853_vm15 = vcmask 138240   ;;  %vm15854_vm7 = vmmov %vm15852_vm10  ;;  %v12964_v43 = vrot.slane %v587_v28, %v12066_v1  ;;  %v12968_v19 = vrot.slane %v591_v47, %v12066_v1 }
 0x113   : > { %v400_v45 = vsel %vm15853_vm15, %v376_v63, %v12946_v61  ;;  %10717 = vmatmul.mubr.msk.f32.vlgmr.msra.gmra.mrb[0].mxu1 %vm15854_vm7, %v12755_v35  ;;  %2056 = vmatprep.mubr.f32.mxu0 %v15711_v42  ;;  %vm15855_vm3 = vcmp.eq.s32.totalorder %v12789_v29, 1  ;;  %vm15856_vm15 = vnez %v15573_v7  ;;  %vm12981_vm13 = vcmp.ne.s32.totalorder %v10746_v37, 0 }
 0x114   : > { %5655 = vrot.lane.b32.xlu0 %v11674_v12, %s11444_s9  ;;  %v697_v52 = vsel %vm15855_vm3, %v400_v45, 0.0  ;;  %v15857_v28 = vmov 0  ;;  %v10745_v47 = vrot.slane %v2406_v46, 9  ;;  %1985 = vmatprep.mubr.f32.mxu1 %v15711_v42  ;;  %v12990_v29 = vrot.slane %v2456_v23, %v12066_v1  ;;  %v374_v46 = vpop.permute.xlu1 %373  ;;  %v372_v45 = vpop.permute.xlu0 %371  ;;  %v15864_v23 = vld [vmem:[#allocation31_spill] sm:$0xff] }
 0x115   : > { %v15858_v28 = vsel %vm12981_vm13, 4294967295, %v15857_v28  ;;  %10724 = vmatprep.subr.msk.mxu0 %vm15860_vm5, %v697_v52  ;;  %v12993_v58 = vrot.slane %v2460_v32, %v12066_v1  ;;  %v603_v37 = vrot.slane %v12957_v44, %v12066_v1  ;;  %vm12997_vm3 = vcmp.ne.s32.totalorder %v10737_v33, 0  ;;  %5661 = vrot.lane.b32.xlu1 %v11668_v10, %s11444_s9 }
 0x116   : > { %15859 = vst [vmem:[#allocation27_spill] sm:$0xff] %v15858_v28  ;;  %v15861_v25 = vmov 0  ;;  %vm15863_vm5 = vcmp.ge.s32.totalorder %v12920_v51, 0  ;;  %v13007_v32 = vadd.s32 1, %v15864_v23  ;;  %vm15866_vm7 = vcmask 138240  }
 0x117   : > { %v15862_v25 = vsel %vm12997_vm3, 4294967295, %v15861_v25  ;;  %v2361_v52 = vsel %vm15863_vm5, 1, %v15633_v30  ;;  %v399_v48 = vsel %vm15866_vm7, %v374_v46, %v376_v63  ;;  %vm15867_vm0 = vmmov %vm15866_vm7  ;;  %vm15872_vm9 = vcmp.ge.s32.totalorder %v12933_v62, 0 }
 0x118   : > { %15865 = vst [vmem:[#allocation31_spill] sm:$0xff] %v13007_v32  ;;  %v397_v33 = vsel %vm15867_vm0, %v12844_v26, %v372_v45  ;;  %vm15868_vm11 = vmmov %vm15867_vm0  ;;  %v2360_v63 = vsel %vm15872_vm9, 1, %v15633_v30  ;;  %vm15873_vm7 = vcmp.eq.s32.totalorder %v12835_v50, 1  ;;  %5651 = vrot.lane.b32.xlu0 %v11660_v9, %s11444_s9  ;;  %vm15875_vm0 = vcmp.eq.s32.totalorder %v12878_v60, 1  ;;  %v13053_v60 = vpop.permute.xlu1 %385 }
 0x119   : > { %v398_v49 = vsel %vm15868_vm11, %v372_v45, %v374_v46  ;;  %vm15869_vm5 = vmand %vm15856_vm15, %vm12939_vm1  ;;  %v696_v26 = vsel %vm15873_vm7, %v399_v48, 0.0  ;;  %vm15874_vm11 = vcmp.eq.s32.totalorder %v12875_v34, 1  ;;  %v15876_v48 = vmov 0  ;;  %5657 = vrot.lane.b32.xlu1 %v11683_v15, %s11444_s9 }
 0x11a   : > { %vm13020_vm10 = vmand %vm15869_vm5, %vm12981_vm13  ;;  %v694_v46 = vsel %vm15874_vm11, %v397_v33, 0.0  ;;  %v695_v7 = vsel %vm15875_vm0, %v398_v49, 0.0  ;;  %vm13041_vm5 = vcmp.ne.s32.totalorder %v10745_v47, 0  ;;  %vm15879_vm7 = vcmask 1043456   ;;  %v384_v47 = vpop.permute.xlu0 %383 }
 0x11b   : > { %v15877_v48 = vsel %vm13041_vm5, 4294967295, %v15876_v48  ;;  %10721 = vmatprep.subr.msk.mxu1 %vm15879_vm7, %v695_v7  ;;  %vm15880_vm11 = vmmov %vm15879_vm7  ;;  %v607_v50 = vrot.slane %v12957_v44, %v12069_v4  ;;  %v10740_v49 = vrot.slane %v2361_v52, 9  ;;  %vm15881_vm0 = vcmp.lt.s32.totalorder %v12920_v51, 16 }
 0x11c   : > { %15878 = vst [vmem:[#allocation63_spill] sm:$0xff] %v15877_v48  ;;  %10725 = vmatpush1.msk.msra.mxu0 %vm15880_vm11, %v696_v26  ;;  %v2409_v34 = vsel %vm15881_vm0, 1, %v15633_v30  ;;  %vm15882_vm15 = vmmov %vm15879_vm7  ;;  %vm15883_vm9 = vcmask 31744   ;;  %v13062_v45 = vsel %vm13020_vm10, 1, %v15633_v30  ;;  %v10739_v44 = vrot.slane %v2360_v63, 9  ;;  %v15890_v63 = vld [vmem:[#allocation35_spill] sm:$0xff]  ;;  %5663 = vrot.lane.b32.xlu0 %v11708_v24, %s11444_s9 }
 0x11d   : > { %10722 = vmatpush1.msk.msra.mxu1 %vm15882_vm15, %v694_v46  ;;  %10726 = vmatmul.mubr.msk.f32.vlgmr.msra.gmra.mrb[4].mxu0 %vm15883_vm9, %v12755_v35  ;;  %vm15884_vm11 = vcmp.lt.s32.totalorder %v12933_v62, 16  ;;  %vm15885_vm0 = vcmask 138240   ;;  %vm15886_vm15 = vmmov %vm15883_vm9  ;;  %v13086_v26 = vadd.s32 1, %v15890_v63  ;;  %v13096_v46 = vrot.slane %v603_v37, %v12066_v1 }
 0x11e   : > { %v2408_v52 = vsel %vm15884_vm11, 1, %v15633_v30  ;;  %v404_v33 = vsel %vm15885_vm0, %v384_v47, %v13053_v60  ;;  %10723 = vmatmul.mubr.msk.f32.vlgmr.msra.gmra.mrb[2].mxu1 %vm15886_vm15, %v12755_v35  ;;  %2198 = vmatprep.mubr.f32.mxu0 %v15711_v42  ;;  %vm15887_vm10 = vmand %vm15726_vm8, %vm12997_vm3  ;;  %vm15441_vm11 = vcmp.ge.s32.totalorder %v13007_v32, 0  ;;  %vm15892_vm0 = vcmp.eq.s32.totalorder %v12892_v40, 1  ;;  %v380_v28 = vpop.permute.xlu0 %379 }
 0x11f   : > { %vm13080_vm7 = vmand %vm15887_vm10, %vm13041_vm5  ;;  %15891 = vst [vmem:[#allocation35_spill] sm:$0xff] %v13086_v26  ;;  %v701_v14 = vsel %vm15892_vm0, %v404_v33, 0.0  ;;  %v10748_v7 = vrot.slane %v2409_v34, 9  ;;  %vm15893_vm15 = vcmask 1043456   ;;  %v13100_v62 = vrot.slane %v607_v50, %v12066_v1  ;;  %2127 = vmatprep.mubr.f32.mxu1 %v15711_v42  ;;  %v382_v33 = vpop.permute.xlu1 %381  ;;  %5669 = vrot.lane.b32.xlu1 %v11701_v20, %s11444_s9 }
 0x120   : > { %10730 = vmatprep.subr.msk.mxu0 %vm15893_vm15, %v701_v14  ;;  %v2476_v51 = vrot.slane %v13062_v45, %v12069_v4  ;;  %vm13105_vm10 = vcmp.ne.s32.totalorder %v10740_v49, 0  ;;  %v15894_v48 = vmov 0  ;;  %v10747_v40 = vrot.slane %v2408_v52, 9  ;;  %5659 = vrot.lane.b32.xlu0 %v11658_v8, %s11444_s9 }
 0x121   : > { %v15895_v48 = vsel %vm13105_vm10, 4294967295, %v15894_v48  ;;  %v2446_v37 = vsel %vm13080_vm7, 1, %v15633_v30  ;;  %vm13112_vm0 = vcmp.ne.s32.totalorder %v10739_v44, 0  ;;  %v15896_v34 = vmov 0 }
 0x122   : > { %v15897_v34 = vsel %vm13112_vm0, 4294967295, %v15896_v34  ;;  %v2363_v50 = vsel %vm15441_vm11, 1, %v15633_v30  ;;  %vm15442_vm15 = vcmp.lt.s32.totalorder %v13007_v32, 16  ;;  %vm15898_vm8 = vcmask 138240  }
 0x123   : > { %v403_v49 = vsel %vm15898_vm8, %v382_v33, %v384_v47  ;;  %vm15899_vm9 = vmmov %vm15898_vm8  ;;  %vm15445_vm5 = vcmp.ge.s32.totalorder %v13086_v26, 0  ;;  %vm15901_vm7 = vcmp.eq.s32.totalorder %v12895_v3, 1  ;;  %vm15902_vm3 = vcmp.eq.s32.totalorder %v12964_v43, 1  ;;  %5665 = vrot.lane.b32.xlu1 %v11721_v31, %s11444_s9 }
 0x124   : > { %v401_v52 = vsel %vm15899_vm9, %v12946_v61, %v380_v28  ;;  %vm15900_vm13 = vmmov %vm15898_vm8  ;;  %v700_v44 = vsel %vm15901_vm7, %v403_v49, 0.0  ;;  %vm15903_vm8 = vcmp.eq.s32.totalorder %v12968_v19, 1  ;;  %vm13139_vm9 = vcmp.ne.s32.totalorder %v10748_v7, 0  ;;  %v13158_v7 = vpop.permute.xlu1 %2278  ;;  %5671 = vrot.lane.b32.xlu0 %v11770_v41, %s11444_s9 }
 0x125   : > { %v402_v14 = vsel %vm15900_vm13, %v380_v28, %v382_v33  ;;  %v698_v6 = vsel %vm15902_vm3, %v401_v52, 0.0  ;;  %v15904_v3 = vmov 0  ;;  %vm15906_vm7 = vcmask 1043456   ;;  %v2277_v33 = vpop.permute.xlu0 %2276 }
 0x126   : > { %v699_v47 = vsel %vm15903_vm8, %v402_v14, 0.0  ;;  %v15905_v3 = vsel %vm13139_vm9, 4294967295, %v15904_v3  ;;  %vm15907_vm3 = vmmov %vm15906_vm7  ;;  %v2472_v61 = vrot.slane %v13062_v45, %v12066_v1  ;;  %vm13151_vm11 = vcmp.ne.s32.totalorder %v10747_v40, 0  ;;  %v15919_v14 = vld [vmem:[#allocation43_spill] sm:$0xff] }
 0x127   : > { %10727 = vmatprep.subr.msk.mxu1 %vm15906_vm7, %v699_v47  ;;  %10731 = vmatpush1.msk.msra.mxu0 %vm15907_vm3, %v700_v44  ;;  %v15908_v43 = vmov 0  ;;  %v10742_v19 = vrot.slane %v2363_v50, 9  ;;  %v2411_v28 = vsel %vm15442_vm15, 1, %v15633_v30  ;;  %vm15911_vm7 = vmmov %vm15907_vm3  ;;  %vm15912_vm3 = vcmask 31744   ;;  %v13202_v47 = vld [vmem:[%s15239_s1 + $0x10] sm:$0xff] }
 0x128   : > { %v15909_v43 = vsel %vm13151_vm11, 4294967295, %v15908_v43  ;;  %10728 = vmatpush1.msk.msra.mxu1 %vm15911_vm7, %v698_v6  ;;  %10732 = vmatmul.mubr.msk.f32.vlgmr.msra.gmra.mrb[6].mxu0 %vm15912_vm3, %v12755_v35  ;;  %v2464_v45 = vrot.slane %v2446_v37, %v12066_v1  ;;  %v2468_v40 = vrot.slane %v2446_v37, %v12069_v4  ;;  %v2362_v50 = vsel %vm15445_vm5, 1, %v15633_v30  ;;  %vm15915_vm1 = vmmov %vm15912_vm3  ;;  %v390_v32 = vpop.permute.xlu1 %389 }
 0x129   : > { %15910 = vst [vmem:[#allocation64_spill] sm:$0xff] %v15909_v43  ;;  %vm15452_vm8 = vcmp.lt.s32.totalorder %v13086_v26, 16  ;;  %vm15913_vm15 = vcmask 121856   ;;  %vm686_vm7 = vcmp.eq.s32.totalorder %v13096_v46, 1  ;;  %10729 = vmatmul.mubr.msk.f32.vlgmr.msra.gmra.mrb[4].mxu1 %vm15915_vm1, %v12755_v35  ;;  %2730 = vmatprep.mubr.f32.mxu0 %v15711_v42  ;;  %vm15916_vm3 = vmand %vm15736_vm6, %vm13105_vm10  ;;  %v13188_v44 = vadd.s32 1, %v15919_v14  ;;  %v388_v43 = vpop.permute.xlu0 %387 }
 0x12a   : > { %v2309_v49 = vsel %vm15913_vm15, %v2277_v33, %v13158_v7  ;;  %vm15914_vm13 = vmmov %vm15913_vm15  ;;  %vm15921_vm15 = vcmp.eq.s32.totalorder %v12990_v29, 1  ;;  %vm15922_vm1 = vcmp.eq.s32.totalorder %v12993_v58, 1  ;;  %vm687_vm6 = vcmp.eq.s32.totalorder %v13100_v62, 1  ;;  %2269 = vmatprep.mubr.f32.mxu1 %v15711_v42  ;;  %5677 = vrot.lane.b32.xlu1 %v11762_v39, %s11444_s9 }
 0x12b   : > { %v2340_v52 = vsel %vm15914_vm13, 0.0, %v2277_v33  ;;  %vm13183_vm5 = vmand %vm15916_vm3, %vm13139_vm9  ;;  %15920 = vst [vmem:[#allocation43_spill] sm:$0xff] %v13188_v44  ;;  %v2598_v36 = vsel %vm15922_vm1, %v2309_v49, 0.0  ;;  %v10750_v58 = vrot.slane %v2411_v28, 9  ;;  %v2540_v33 = vrot.slane %v2476_v51, %v12066_v1  ;;  %5667 = vrot.lane.b32.xlu0 %v15812_v38, %s11444_s9 }
 0x12c   : > { %v2597_v6 = vsel %vm15921_vm15, %v2340_v52, 0.0  ;;  %vm15923_vm13 = vmand %vm12075_vm12, %vm13112_vm0  ;;  %vm15926_vm15 = vcmask 1043456   ;;  %vm13218_vm1 = vcmp.ne.s32.totalorder %v10742_v19, 0  ;;  %v15927_v49 = vmov 0  ;;  %v13264_v46 = vpop.permute.xlu1 %2286 }
 0x12d   : > { %vm13211_vm3 = vmand %vm15923_vm13, %vm13151_vm11  ;;  %10753 = vmatprep.subr.msk.mxu0 %vm15926_vm15, %v2598_v36  ;;  %v15928_v49 = vsel %vm13218_vm1, 4294967295, %v15927_v49  ;;  %v10741_v52 = vrot.slane %v2362_v50, 9  ;;  %v2410_v5 = vsel %vm15452_vm8, 1, %v15633_v30  ;;  %v2536_v28 = vrot.slane %v2472_v61, %v12066_v1 }
 0x12e   : > { %15929 = vst [vmem:[#allocation65_spill] sm:$0xff] %v15928_v49  ;;  %vm15930_vm12 = vmmov %vm15926_vm15  ;;  %v2528_v36 = vrot.slane %v2464_v45, %v12066_v1  ;;  %v2532_v51 = vrot.slane %v2468_v40, %v12066_v1  ;;  %v2449_v19 = vsel %vm13183_vm5, 1, %v15633_v30  ;;  %vm15931_vm13 = vcmask 138240   ;;  %5673 = vrot.lane.b32.xlu1 %v15826_v16, %s11444_s9 }
 0x12f   : > { %10754 = vmatpush1.msk.msra.mxu0 %vm15930_vm12, %v2597_v6  ;;  %v405_v50 = vsel %vm15931_vm13, %v13053_v60, %v388_v43  ;;  %vm15932_vm15 = vmmov %vm15931_vm13  ;;  %vm15933_vm8 = vcmask 31744   ;;  %v2448_v61 = vsel %vm13211_vm3, 1, %v15633_v30  ;;  %vm15457_vm12 = vcmp.ge.s32.totalorder %v13188_v44, 0  ;;  %5679 = vrot.lane.b32.xlu0 %v11816_v53, %s11444_s9 }
 0x130   : > { %v406_v26 = vsel %vm15932_vm15, %v388_v43, %v390_v32  ;;  %10755 = vmatmul.mubr.msk.f32.vlgmr.msra.gmra.mrb[0].mxu0 %vm15933_vm8, %v13202_v47  ;;  %v702_v45 = vsel %vm686_vm7, %v405_v50, 0.0  ;;  %vm15934_vm5 = vnez %v15637_v18  ;;  %vm13253_vm3 = vcmp.ne.s32.totalorder %v10750_v58, 0  ;;  %v2285_v43 = vpop.permute.xlu0 %2284  ;;  %vm15943_vm11 = vmmov %vm15933_vm8  ;;  %v15953_v50 = vld [vmem:[#allocation14_spill] sm:$0xff] }
 0x131   : > { %v703_v40 = vsel %vm687_vm6, %v406_v26, 0.0  ;;  %v15935_v32 = vmov 0  ;;  %v10749_v60 = vrot.slane %v2410_v5, 9  ;;  %vm15938_vm7 = vcmask 1043456   ;;  %2872 = vmatprep.mubr.f32.mxu0 %v15711_v42 }
 0x132   : > { %v15936_v32 = vsel %vm13253_vm3, 4294967295, %v15935_v32  ;;  %10733 = vmatprep.subr.msk.mxu1 %vm15938_vm7, %v703_v40  ;;  %v2492_v62 = vrot.slane %v2449_v19, %v12069_v4  ;;  %vm13260_vm6 = vcmp.ne.s32.totalorder %v10741_v52, 0  ;;  %v15939_v26 = vmov 0  ;;  %vm15941_vm15 = vmmov %vm15938_vm7  ;;  %6547 = vrot.lane.b32.xlu1 %v11672_v11, %s11445_s17 }
 0x133   : > { %15937 = vst [vmem:[#allocation66_spill] sm:$0xff] %v15936_v32  ;;  %v15940_v26 = vsel %vm13260_vm6, 4294967295, %v15939_v26  ;;  %10734 = vmatpush1.msk.msra.mxu1 %vm15941_vm15, %v702_v45  ;;  %v2488_v37 = vrot.slane %v2449_v19, %v12066_v1  ;;  %v2364_v6 = vsel %vm15457_vm12, 1, %v15633_v30  ;;  %vm15464_vm7 = vcmp.lt.s32.totalorder %v13188_v44, 16  ;;  %vm15944_vm15 = vmand %vm15934_vm5, %vm13218_vm1  ;;  %v15951_v19 = vld [vmem:[#allocation39_spill] sm:$0xff]  ;;  %5675 = vrot.lane.b32.xlu0 %v15842_v22, %s11444_s9 }
 0x134   : > { %vm15942_vm13 = vcmask 121856   ;;  %10735 = vmatmul.mubr.msk.f32.vlgmr.msra.gmra.mrb[6].mxu1 %vm15943_vm11, %v12755_v35  ;;  %v2480_v58 = vrot.slane %v2448_v61, %v12066_v1  ;;  %vm13284_vm9 = vmand %vm15944_vm15, %vm13253_vm3  ;;  %vm15947_vm12 = vcmp.eq.s32.totalorder %v2540_v33, 1  ;;  %vm13297_vm5 = vcmp.ne.s32.totalorder %v10749_v60, 0  ;;  %v2283_v60 = vpop.permute.xlu1 %2282 }
 0x135   : > { %v2313_v29 = vsel %vm15942_vm13, %v2285_v43, %v13264_v46  ;;  %v15948_v18 = vmov 0  ;;  %vm15950_vm15 = vcmask 1043456   ;;  %v2556_v35 = vrot.slane %v2492_v62, %v12066_v1  ;;  %2801 = vmatprep.mubr.f32.mxu1 %v15711_v42 }
 0x136   : > { %v2602_v5 = vsel %vm15947_vm12, %v2313_v29, 0.0  ;;  %v15949_v18 = vsel %vm13297_vm5, 4294967295, %v15948_v18  ;;  %v2484_v33 = vrot.slane %v2448_v61, %v12069_v4  ;;  %vm15952_vm12 = vnez %v15951_v19  ;;  %v2281_v29 = vpop.permute.xlu0 %2280  ;;  %5681 = vrot.lane.b32.xlu1 %v11836_v56, %s11444_s9 }
 0x137   : > { %10759 = vmatprep.subr.msk.mxu0 %vm15950_vm15, %v2602_v5  ;;  %vm15954_vm13 = vnez %v15953_v50  ;;  %v10743_v45 = vrot.slane %v2364_v6, 9  ;;  %v2412_v40 = vsel %vm15464_vm7, 1, %v15633_v30  ;;  %v2552_v5 = vrot.slane %v2488_v37, %v12066_v1  ;;  %vm15958_vm7 = vmand %vm15795_vm14, %vm13260_vm6  ;;  %6549 = vrot.lane.b32.xlu0 %v11674_v12, %s11445_s17 }
 0x138   : > { %v2451_v61 = vsel %vm13284_vm9, 1, %v15633_v30  ;;  %vm15955_vm15 = vcmask 121856   ;;  %v2544_v6 = vrot.slane %v2480_v58, %v12066_v1  ;;  %vm13328_vm11 = vmand %vm15958_vm7, %vm13297_vm5  ;;  %vm15961_vm9 = vcmp.eq.s32.totalorder %v2536_v28, 1  ;;  %v13358_v58 = vpop.permute.xlu1 %2294 }
 0x139   : > { %v2312_v62 = vsel %vm15955_vm15, %v2283_v60, %v2285_v43  ;;  %vm15956_vm8 = vmmov %vm15955_vm15  ;;  %vm15962_vm15 = vcmp.eq.s32.totalorder %v2528_v36, 1  ;;  %v10751_v36 = vrot.slane %v2412_v40, 9  ;;  %vm13354_vm5 = vcmp.ne.s32.totalorder %v10743_v45, 0 }
 0x13a   : > { %v2310_v32 = vsel %vm15956_vm8, %v13158_v7, %v2281_v29  ;;  %vm15957_vm3 = vmmov %vm15956_vm8  ;;  %v2601_v43 = vsel %vm15961_vm9, %v2312_v62, 0.0  ;;  %vm15963_vm8 = vcmp.eq.s32.totalorder %v2532_v51, 1  ;;  %vm15969_vm9 = vcmask 1043456   ;;  %6555 = vrot.lane.b32.xlu1 %v11668_v10, %s11445_s17 }
 0x13b   : > { %v2311_v49 = vsel %vm15957_vm3, %v2281_v29, %v2283_v60  ;;  %v2599_v52 = vsel %vm15962_vm15, %v2310_v32, 0.0  ;;  %vm15965_vm3 = vnez %v15964_v54  ;;  %vm15966_vm14 = vmand %vm15954_vm13, %vm15952_vm12  ;;  %v2508_v51 = vrot.slane %v2451_v61, %v12069_v4  ;;  %v2293_v60 = vpop.permute.xlu0 %2292  ;;  %6545 = vrot.lane.b32.xlu0 %v11660_v9, %s11445_s17 }
 0x13c   : > { %v2600_v7 = vsel %vm15963_vm8, %v2311_v49, 0.0  ;;  %vm13346_vm7 = vmand %vm15966_vm14, %vm15965_vm3  ;;  %v2548_v49 = vrot.slane %v2484_v33, %v12066_v1  ;;  %v15971_v32 = vmov 0  ;;  %vm15974_vm3 = vcmask 31744  }
 0x13d   : > { %10756 = vmatprep.subr.msk.mxu1 %vm15969_vm9, %v2600_v7  ;;  %vm15970_vm15 = vmmov %vm15969_vm9  ;;  %v15972_v32 = vsel %vm13354_vm5, 4294967295, %v15971_v32  ;;  %v2450_v40 = vsel %vm13328_vm11, 1, %v15633_v30  ;;  %v3339_v45 = vsel %vm13346_vm7, 1, %v15633_v30  ;;  %vm15981_vm11 = vcmp.eq.s32.totalorder %v2556_v35, 1 }
 0x13e   : > { %10760 = vmatpush1.msk.msra.mxu0 %vm15970_vm15, %v2601_v43  ;;  %vm15973_vm14 = vmmov %vm15969_vm9  ;;  %vm15975_vm9 = vcmask 121856   ;;  %v2504_v37 = vrot.slane %v2451_v61, %v12066_v1  ;;  %v2572_v35 = vrot.slane %v2508_v51, %v12066_v1  ;;  %v2496_v43 = vrot.slane %v2450_v40, %v12066_v1  ;;  %v2291_v61 = vpop.permute.xlu1 %2290  ;;  %6551 = vrot.lane.b32.xlu1 %v11683_v15, %s11445_s17 }
 0x13f   : > { %10757 = vmatpush1.msk.msra.mxu1 %vm15973_vm14, %v2599_v52  ;;  %10761 = vmatmul.mubr.msk.f32.vlgmr.msra.gmra.mrb[2].mxu0 %vm15974_vm3, %v13202_v47  ;;  %v2317_v33 = vsel %vm15975_vm9, %v2293_v60, %v13358_v58  ;;  %vm15976_vm8 = vmmov %vm15974_vm3  ;;  %vm15977_vm14 = vcmp.lt.s32.totalorder %v11875_v57, 16  ;;  %vm15978_vm3 = vcmp.ge.s32.totalorder %v11875_v57, 0  ;;  %vm13392_vm9 = vcmp.ne.s32.totalorder %v10751_v36, 0  ;;  %v2289_v7 = vpop.permute.xlu0 %2288 }
 0x140   : > { %10758 = vmatmul.mubr.msk.f32.vlgmr.msra.gmra.mrb[0].mxu1 %vm15976_vm8, %v13202_v47  ;;  %3014 = vmatprep.mubr.f32.mxu0 %v15711_v42  ;;  %vm13378_vm12 = vmand %vm15978_vm3, %vm15977_vm14  ;;  %v2606_v62 = vsel %vm15981_vm11, %v2317_v33, 0.0  ;;  %v15982_v57 = vmov 0  ;;  %v2500_v52 = vrot.slane %v2450_v40, %v12069_v4  ;;  %v3350_v28 = vrot.slane %v3339_v45, %v12066_v1 }
 0x141   : > { %vm2396_vm7 = vmand %vm12337_vm4, %vm13354_vm5  ;;  %v15983_v57 = vsel %vm13392_vm9, 4294967295, %v15982_v57  ;;  %2943 = vmatprep.mubr.f32.mxu1 %v15711_v42  ;;  %vm15985_vm11 = vnez %v15685_v55  ;;  %v3354_v40 = vrot.slane %v3339_v45, %v12069_v4  ;;  %vm15991_vm8 = vcmp.eq.s32.totalorder %v2552_v5, 1  ;;  %6557 = vrot.lane.b32.xlu0 %v11708_v24, %s11445_s17 }
 0x142   : > { %vm15984_vm14 = vmmov %vm15970_vm15  ;;  %vm15986_vm15 = vcmask 121856   ;;  %v2568_v0 = vrot.slane %v2504_v37, %v12066_v1  ;;  %v2560_v5 = vrot.slane %v2496_v43, %v12066_v1  ;;  %v13434_v45 = vpop.permute.xlu1 %2302  ;;  %v3414_v43 = vrot.slane %v3350_v28, %v12066_v1  ;;  %6563 = vrot.lane.b32.xlu1 %v11701_v20, %s11445_s17 }
 0x143   : > { %10765 = vmatprep.subr.msk.mxu0 %vm15984_vm14, %v2606_v62  ;;  %v2316_v36 = vsel %vm15986_vm15, %v2291_v61, %v2293_v60  ;;  %vm15987_vm14 = vmmov %vm15986_vm15  ;;  %vm15992_vm15 = vcmp.eq.s32.totalorder %v2544_v6, 1  ;;  %v2564_v6 = vrot.slane %v2500_v52, %v12066_v1  ;;  %v16005_v52 = vld [vmem:[#allocation21_spill] sm:$0xff]  ;;  %vm16009_vm5 = vcmp.ge.s32.totalorder %v15839_v21, 0 }
 0x144   : > { %v2314_v51 = vsel %vm15987_vm14, %v13264_v46, %v2289_v7  ;;  %vm15988_vm3 = vmmov %vm15987_vm14  ;;  %v2605_v60 = vsel %vm15991_vm8, %v2316_v36, 0.0  ;;  %vm15993_vm14 = vcmp.eq.s32.totalorder %v2548_v49, 1  ;;  %v2301_v49 = vpop.permute.xlu0 %2300  ;;  %v3418_v36 = vrot.slane %v3354_v40, %v12066_v1 }
 0x145   : > { %v2315_v33 = vsel %vm15988_vm3, %v2289_v7, %v2291_v61  ;;  %vm13418_vm6 = vmand %vm2396_vm7, %vm13392_vm9  ;;  %v2603_v44 = vsel %vm15992_vm15, %v2314_v51, 0.0  ;;  %vm15994_vm3 = vcmask 1043456   ;;  %vm2594_vm7 = vcmp.eq.s32.totalorder %v2572_v35, 1  ;;  %v15998_v61 = vld [vmem:[#allocation52_spill] sm:$0xff]  ;;  %6553 = vrot.lane.b32.xlu0 %v11658_v8, %s11445_s17 }
 0x146   : > { %v2604_v46 = vsel %vm15993_vm14, %v2315_v33, 0.0  ;;  %vm15995_vm4 = vmmov %vm15994_vm3  ;;  %vm15997_vm15 = vcmask 31744   ;;  %v2452_v37 = vsel %vm13418_vm6, 1, %v15633_v30  ;;  %vm15999_vm14 = vnez %v15998_v61  ;;  %v2299_v62 = vpop.permute.xlu1 %2298  ;;  %6559 = vrot.lane.b32.xlu1 %v11721_v31, %s11445_s17 }
 0x147   : > { %10762 = vmatprep.subr.msk.mxu1 %vm15994_vm3, %v2604_v46  ;;  %10766 = vmatpush1.msk.msra.mxu0 %vm15995_vm4, %v2605_v60  ;;  %vm15996_vm8 = vmmov %vm15994_vm3  ;;  %vm16004_vm6 = vnez %v15719_v13  ;;  %vm16006_vm9 = vnez %v16005_v52  ;;  %v2512_v28 = vrot.slane %v2452_v37, %v12066_v1  ;;  %v2516_v51 = vrot.slane %v2452_v37, %v12069_v4 }
 0x148   : > { %10763 = vmatpush1.msk.msra.mxu1 %vm15996_vm8, %v2603_v44  ;;  %10767 = vmatmul.mubr.msk.f32.vlgmr.msra.gmra.mrb[4].mxu0 %vm15997_vm15, %v13202_v47  ;;  %vm16000_vm3 = vmand %vm13378_vm12, %vm15985_vm11  ;;  %vm16003_vm8 = vcmask 121856   ;;  %v16010_v33 = vmov 0  ;;  %v2297_v40 = vpop.permute.xlu0 %2296  ;;  %vm16020_vm0 = vcmp.eq.s32.totalorder %v2560_v5, 1  ;;  %vm16021_vm10 = vcmp.eq.s32.totalorder %v2564_v6, 1 }
 0x149   : > { %vm13449_vm4 = vmand %vm16000_vm3, %vm15999_vm14  ;;  %v2321_v44 = vsel %vm16003_vm8, %v2301_v49, %v13434_v45  ;;  %10764 = vmatmul.mubr.msk.f32.vlgmr.msra.gmra.mrb[2].mxu1 %vm15997_vm15, %v13202_v47  ;;  %3156 = vmatprep.mubr.f32.mxu0 %v15711_v42  ;;  %vm16007_vm8 = vcmask 1043456  }
 0x14a   : > { %v2610_v7 = vsel %vm2594_vm7, %v2321_v44, 0.0  ;;  %3085 = vmatprep.mubr.f32.mxu1 %v15711_v42  ;;  %vm16008_vm7 = vcmp.lt.s32.totalorder %v15839_v21, 16  ;;  %v3341_v60 = vsel %vm13449_vm4, 1, %v15633_v30  ;;  %vm16013_vm14 = vmand %vm16006_vm9, %vm16004_vm6  ;;  %vm16019_vm4 = vcmp.eq.s32.totalorder %v2568_v0, 1  ;;  %6565 = vrot.lane.b32.xlu0 %v11770_v41, %s11445_s17 }
 0x14b   : > { %10771 = vmatprep.subr.msk.mxu0 %vm16007_vm8, %v2610_v7  ;;  %vm13476_vm11 = vmand %vm16009_vm5, %vm16008_vm7  ;;  %vm16012_vm8 = vnez %v15690_v17  ;;  %vm16016_vm5 = vcmask 121856   ;;  %v2580_v0 = vrot.slane %v2516_v51, %v12066_v1  ;;  %v3370_v5 = vrot.slane %v3341_v60, %v12069_v4  ;;  %6571 = vrot.lane.b32.xlu1 %v11762_v39, %s11445_s17 }
 0x14c   : > { %v16011_v33 = vsel %vm13476_vm11, 4294967295, %v16010_v33  ;;  %vm13490_vm15 = vmand %vm16013_vm14, %vm16012_vm8  ;;  %v2320_v46 = vsel %vm16016_vm5, %v2299_v62, %v2301_v49  ;;  %v16027_v49 = vmov 0  ;;  %vm16030_vm14 = vcmask 7168  }
 0x14d   : > { %vm16017_vm7 = vmmov %vm16016_vm5  ;;  %v2609_v35 = vsel %vm16019_vm4, %v2320_v46, 0.0  ;;  %v3340_v6 = vsel %vm13490_vm15, 1, %v15633_v30 }
 0x14e   : > { %v2318_v37 = vsel %vm16017_vm7, %v13358_v58, %v2297_v40  ;;  %vm16018_vm3 = vmmov %vm16016_vm5  ;;  %vm16022_vm5 = vnez %v15725_v27  ;;  %v2576_v58 = vrot.slane %v2512_v28, %v12066_v1  ;;  %v3251_v28 = vpop.permute.xlu0 %3250  ;;  %6561 = vrot.lane.b32.xlu0 %v15812_v38, %s11445_s17 }
 0x14f   : > { %v2319_v44 = vsel %vm16018_vm3, %v2297_v40, %v2299_v62  ;;  %v2607_v7 = vsel %vm16020_vm0, %v2318_v37, 0.0  ;;  %vm16023_vm3 = vcmask 1043456   ;;  %vm16026_vm0 = vcmp.ge.s32.totalorder %v15844_v2, 0  ;;  %vm16031_vm15 = vmmov %vm16030_vm14  ;;  %6567 = vrot.lane.b32.xlu1 %v15826_v16, %s11445_s17 }
 0x150   : > { %v2608_v17 = vsel %vm16021_vm10, %v2319_v44, 0.0  ;;  %vm16024_vm1 = vmmov %vm16023_vm3  ;;  %vm16025_vm10 = vcmp.lt.s32.totalorder %v15844_v2, 16  ;;  %v3314_v62 = vsel %vm16031_vm15, 0.0, %v3251_v28  ;;  %v16033_v2 = vld [vmem:[#allocation53_spill] sm:$0xff]  ;;  %v3366_v37 = vrot.slane %v3341_v60, %v12066_v1 }
 0x151   : > { %10768 = vmatprep.subr.msk.mxu1 %vm16023_vm3, %v2608_v17  ;;  %10772 = vmatpush1.msk.msra.mxu0 %vm16024_vm1, %v2609_v35  ;;  %vm13521_vm4 = vmand %vm16026_vm0, %vm16025_vm10  ;;  %v13525_v17 = vpop.permute.xlu1 %3252  ;;  %vm16029_vm3 = vcmask 31744   ;;  %vm16034_vm10 = vnez %v16033_v2  ;;  %v3358_v44 = vrot.slane %v3340_v6, %v12066_v1  ;;  %v13558_v35 = vld [vmem:[%s15239_s1 + $0x18] sm:$0xff]  ;;  %v16045_v60 = vmov 0 }
 0x152   : > { %v16028_v49 = vsel %vm13521_vm4, 4294967295, %v16027_v49  ;;  %10769 = vmatpush1.msk.msra.mxu1 %vm16024_vm1, %v2607_v7  ;;  %10773 = vmatmul.mubr.msk.f32.vlgmr.msra.gmra.mrb[6].mxu0 %vm16029_vm3, %v13202_v47  ;;  %v3283_v51 = vsel %vm16030_vm14, %v3251_v28, %v13525_v17  ;;  %vm16032_vm7 = vmmov %vm16029_vm3  ;;  %vm16038_vm3 = vcmp.eq.s32.totalorder %v3414_v43, 1  ;;  %vm16039_vm14 = vcmp.eq.s32.totalorder %v3418_v36, 1  ;;  %v16040_v7 = vld [vmem:[#allocation54_spill] sm:$0xff] }
 0x153   : > { %10770 = vmatmul.mubr.msk.f32.vlgmr.msra.gmra.mrb[4].mxu1 %vm16032_vm7, %v13202_v47  ;;  %3624 = vmatprep.mubr.f32.mxu0 %v15711_v42  ;;  %vm16035_vm0 = vmand %vm13476_vm11, %vm16022_vm5  ;;  %v3491_v21 = vsel %vm16038_vm3, %v3314_v62, 0.0  ;;  %v3492_v46 = vsel %vm16039_vm14, %v3283_v51, 0.0  ;;  %vm16041_vm7 = vnez %v16040_v7  ;;  %vm2596_vm14 = vcmp.eq.s32.totalorder %v2580_v0, 1  ;;  %v2305_v51 = vpop.permute.xlu0 %2304  ;;  %v16055_v62 = vld [vmem:[#allocation55_spill] sm:$0xff] }
 0x154   : > { %vm13543_vm1 = vmand %vm16035_vm0, %vm16034_vm10  ;;  %vm16042_vm0 = vcmask 1043456   ;;  %v3434_v43 = vrot.slane %v3370_v5, %v12066_v1  ;;  %v3362_v36 = vrot.slane %v3340_v6, %v12069_v4  ;;  %3227 = vmatprep.mubr.f32.mxu1 %v15711_v42  ;;  %vm16043_vm10 = vcmp.lt.s32.totalorder %v15864_v23, 16  ;;  %6573 = vrot.lane.b32.xlu0 %v11816_v53, %s11445_s17 }
 0x155   : > { %10778 = vmatprep.subr.msk.mxu0 %vm16042_vm0, %v3492_v46  ;;  %vm16044_vm5 = vcmp.ge.s32.totalorder %v15864_v23, 0  ;;  %v2307_v28 = vpop.permute.xlu1 %2306  ;;  %vm16047_vm15 = vmmov %vm16042_vm0  ;;  %v3343_v0 = vsel %vm13543_vm1, 1, %v15633_v30  ;;  %vm16048_vm0 = vcmp.lt.s32.totalorder %v15890_v63, 16  ;;  %vm16049_vm3 = vcmp.ge.s32.totalorder %v15890_v63, 0  ;;  %7433 = vrot.lane.b32.xlu1 %v11672_v11, %s11446_s13 }
 0x156   : > { %vm13572_vm8 = vmand %vm16044_vm5, %vm16043_vm10  ;;  %10779 = vmatpush1.msk.msra.mxu0 %vm16047_vm15, %v3491_v21  ;;  %v16050_v5 = vmov 0  ;;  %vm16052_vm5 = vcmask 121856   ;;  %vm16054_vm15 = vcmask 31744   ;;  %vm16056_vm11 = vnez %v16055_v62 }
 0x157   : > { %v16046_v60 = vsel %vm13572_vm8, 4294967295, %v16045_v60  ;;  %vm13584_vm6 = vmand %vm16049_vm3, %vm16048_vm0  ;;  %v2322_v23 = vsel %vm16052_vm5, %v13434_v45, %v2305_v51  ;;  %10780 = vmatmul.mubr.msk.f32.vlgmr.msra.gmra.mrb[0].mxu0 %vm16054_vm15, %v13558_v35  ;;  %vm16060_vm3 = vcmp.eq.s32.totalorder %v2576_v58, 1  ;;  %v3430_v45 = vrot.slane %v3366_v37, %v12066_v1 }
 0x158   : > { %v16051_v5 = vsel %vm13584_vm6, 4294967295, %v16050_v5  ;;  %vm16053_vm10 = vmmov %vm16052_vm5  ;;  %v2611_v40 = vsel %vm16060_vm3, %v2322_v23, 0.0  ;;  %v3422_v46 = vrot.slane %v3358_v44, %v12066_v1  ;;  %vm3480_vm15 = vcmp.eq.s32.totalorder %v3434_v43, 1  ;;  %3766 = vmatprep.mubr.f32.mxu0 %v15711_v42  ;;  %v3259_v44 = vpop.permute.xlu0 %3258  ;;  %6569 = vrot.lane.b32.xlu0 %v15842_v22, %s11445_s17 }
 0x159   : > { %v2323_v6 = vsel %vm16053_vm10, %v2305_v51, %v2307_v28  ;;  %vm16057_vm1 = vmand %vm13521_vm4, %vm16041_vm7  ;;  %v16061_v28 = vld [vmem:[#allocation56_spill] sm:$0xff]  ;;  %vm16063_vm10 = vcmask 1043456   ;;  %v3426_v58 = vrot.slane %v3362_v36, %v12066_v1  ;;  %v3386_v51 = vrot.slane %v3343_v0, %v12069_v4  ;;  %v13623_v37 = vpop.permute.xlu1 %3260  ;;  %6575 = vrot.lane.b32.xlu1 %v11836_v56, %s11445_s17  ;;  %s10992_s17 = sshll.u32 %s11417_s27, 7 }
 0x15a   : > { %vm13600_vm9 = vmand %vm16057_vm1, %vm16056_vm11  ;;  %v2612_v21 = vsel %vm2596_vm14, %v2323_v6, 0.0  ;;  %vm16062_vm0 = vnez %v16061_v28  ;;  %vm16066_vm3 = vcmask 7168   ;;  %v16068_v6 = vld [vmem:[#allocation57_spill] sm:$0xff]  ;;  %v3382_v63 = vrot.slane %v3343_v0, %v12066_v1  ;;  %s15127_s14 = scalar_lea.vmem [#allocation2], %s10992_s17 }
 0x15b   : > { %vm3329_vm5 = vmand %vm13572_vm8, %vm16062_vm0  ;;  %10774 = vmatprep.subr.msk.mxu1 %vm16063_vm10, %v2612_v21  ;;  %v3342_v43 = vsel %vm13600_vm9, 1, %v15633_v30  ;;  %v3287_v36 = vsel %vm16066_vm3, %v3259_v44, %v13623_v37  ;;  %vm16069_vm0 = vnez %v16068_v6  ;;  %v16077_v0 = vmov 0  ;;  %v16084_v21 = vld [vmem:[#allocation13_spill] sm:$0xff] }
 0x15c   : > { %vm3328_vm14 = vmand %vm13584_vm6, %vm12702_vm2  ;;  %v3496_v23 = vsel %vm3480_vm15, %v3287_v36, 0.0  ;;  %v3374_v36 = vrot.slane %v3342_v43, %v12066_v1  ;;  %v3378_v6 = vrot.slane %v3342_v43, %v12069_v4  ;;  %vm16075_vm15 = vcmp.lt.s32.totalorder %v15919_v14, 16  ;;  %v3255_v28 = vpop.permute.xlu0 %3254  ;;  %7435 = vrot.lane.b32.xlu0 %v11674_v12, %s11446_s13 }
 0x15d   : > { %vm16065_vm1 = vmmov %vm16063_vm10  ;;  %vm16067_vm10 = vcmask 31744   ;;  %7441 = vrot.lane.b32.xlu1 %v11668_v10, %s11446_s13  ;;  %vm16110_vm7 = vnez %v15849_v59  ;;  %vm16120_vm8 = vnez %v16005_v52 }
 0x15e   : > { %10775 = vmatpush1.msk.msra.mxu1 %vm16065_vm1, %v2611_v40  ;;  %vm13635_vm11 = vmand %vm3329_vm5, %vm16069_vm0  ;;  %v16072_v40 = vld [vmem:[#allocation61_spill] sm:$0xff]  ;;  %vm3478_vm5 = vcmp.eq.s32.totalorder %v3426_v58, 1  ;;  %vm16082_vm0 = vcmp.eq.s32.totalorder %v3430_v45, 1  ;;  %v3442_v45 = vrot.slane %v3378_v6, %v12066_v1 }
 0x15f   : > { %10776 = vmatmul.mubr.msk.f32.vlgmr.msra.gmra.mrb[6].mxu1 %vm16067_vm10, %v13202_v47  ;;  %vm16073_vm3 = vnez %v16072_v40  ;;  %vm16074_vm2 = vmmov %vm16065_vm1  ;;  %v3450_v47 = vrot.slane %v3386_v51, %v12066_v1  ;;  %vm16076_vm1 = vcmp.ge.s32.totalorder %v15919_v14, 0  ;;  %v3257_v40 = vpop.permute.xlu1 %3256  ;;  %v3345_v58 = vsel %vm13635_vm11, 1, %v15633_v30 }
 0x160   : > { %vm3336_vm10 = vmand %vm3328_vm14, %vm16073_vm3  ;;  %10784 = vmatprep.subr.msk.mxu0 %vm16074_vm2, %v3496_v23  ;;  %3695 = vmatprep.mubr.f32.mxu1 %v15711_v42  ;;  %vm16079_vm2 = vcmask 7168   ;;  %vm16085_vm11 = vnez %v16084_v21 }
 0x161   : > { %vm13655_vm9 = vmand %vm16076_vm1, %vm16075_vm15  ;;  %v3286_v51 = vsel %vm16079_vm2, %v3257_v40, %v3259_v44  ;;  %v3344_v62 = vsel %vm3336_vm10, 1, %v15633_v30  ;;  %vm16083_vm1 = vcmp.eq.s32.totalorder %v3422_v46, 1  ;;  %v3446_v44 = vrot.slane %v3382_v63, %v12066_v1  ;;  %v3267_v63 = vpop.permute.xlu0 %3266  ;;  %7431 = vrot.lane.b32.xlu0 %v11660_v9, %s11446_s13  ;;  %7437 = vrot.lane.b32.xlu1 %v11683_v15, %s11446_s13 }
 0x162   : > { %v16078_v0 = vsel %vm13655_vm9, 4294967295, %v16077_v0  ;;  %vm16080_vm14 = vmmov %vm16079_vm2  ;;  %v3495_v14 = vsel %vm16082_vm0, %v3286_v51, 0.0  ;;  %vm16086_vm10 = vcmask 1043456   ;;  %vm3484_vm15 = vcmp.eq.s32.totalorder %v3450_v47, 1  ;;  %v16091_v47 = vld [vmem:[#allocation20_spill] sm:$0xff] }
 0x163   : > { %v3284_v23 = vsel %vm16080_vm14, %v13525_v17, %v3255_v28  ;;  %vm16081_vm3 = vmmov %vm16079_vm2  ;;  %v3438_v17 = vrot.slane %v3374_v36, %v12066_v1  ;;  %v3402_v46 = vrot.slane %v3345_v58, %v12069_v4  ;;  %vm16089_vm2 = vcmask 31744  }
 0x164   : > { %v3285_v43 = vsel %vm16081_vm3, %v3255_v28, %v3257_v40  ;;  %v3493_v2 = vsel %vm16083_vm1, %v3284_v23, 0.0  ;;  %vm3330_vm3 = vmand %vm13655_vm9, %vm16085_vm11  ;;  %v3269_v28 = vpop.permute.xlu1 %3268  ;;  %v3390_v6 = vrot.slane %v3344_v62, %v12066_v1  ;;  %vm16116_vm9 = vcmask 7168  }
 0x165   : > { %v3494_v7 = vsel %vm3478_vm5, %v3285_v43, 0.0  ;;  %vm16087_vm0 = vmmov %vm16086_vm10  ;;  %v3291_v40 = vsel %vm16080_vm14, %v3267_v63, %v3269_v28  ;;  %vm3481_vm14 = vcmp.eq.s32.totalorder %v3438_v17, 1  ;;  %v3466_v36 = vrot.slane %v3402_v46, %v12066_v1  ;;  %v3263_v23 = vpop.permute.xlu0 %3262  ;;  %7443 = vrot.lane.b32.xlu0 %v11708_v24, %s11446_s13  ;;  %7449 = vrot.lane.b32.xlu1 %v11701_v20, %s11446_s13 }
 0x166   : > { %10781 = vmatprep.subr.msk.mxu1 %vm16086_vm10, %v3494_v7  ;;  %10785 = vmatpush1.msk.msra.mxu0 %vm16087_vm0, %v3495_v14  ;;  %vm16088_vm5 = vmmov %vm16087_vm0  ;;  %v3398_v7 = vrot.slane %v3345_v58, %v12066_v1  ;;  %vm16092_vm10 = vnez %v16091_v47  ;;  %v3394_v58 = vrot.slane %v3344_v62, %v12069_v4  ;;  %v3454_v62 = vrot.slane %v3390_v6, %v12066_v1 }
 0x167   : > { %10782 = vmatpush1.msk.msra.mxu1 %vm16088_vm5, %v3493_v2  ;;  %10786 = vmatmul.mubr.msk.f32.vlgmr.msra.gmra.mrb[2].mxu0 %vm16089_vm2, %v13558_v35  ;;  %vm16090_vm1 = vmmov %vm16089_vm2  ;;  %v3500_v2 = vsel %vm3484_vm15, %v3291_v40, 0.0  ;;  %vm3483_vm5 = vcmp.eq.s32.totalorder %v3446_v44, 1  ;;  %vm16093_vm2 = vcmask 1043456  }
 0x168   : > { %10783 = vmatmul.mubr.msk.f32.vlgmr.msra.gmra.mrb[0].mxu1 %vm16090_vm1, %v13558_v35  ;;  %3908 = vmatprep.mubr.f32.mxu0 %v15711_v42  ;;  %vm3338_vm0 = vmand %vm3330_vm3, %vm16092_vm10  ;;  %vm3482_vm1 = vcmp.eq.s32.totalorder %v3442_v45, 1  ;;  %v3265_v51 = vpop.permute.xlu1 %3264  ;;  %vm16094_vm3 = vcmask 7168   ;;  %v3462_v17 = vrot.slane %v3398_v7, %v12066_v1 }
 0x169   : > { %10790 = vmatprep.subr.msk.mxu0 %vm16093_vm2, %v3500_v2  ;;  %3837 = vmatprep.mubr.f32.mxu1 %v15711_v42  ;;  %v3346_v43 = vsel %vm3338_vm0, 1, %v15633_v30  ;;  %v3290_v14 = vsel %vm16094_vm3, %v3265_v51, %v3267_v63  ;;  %vm16095_vm15 = vmmov %vm16094_vm3 }
 0x16a   : > { %v3288_v44 = vsel %vm16095_vm15, %v13623_v37, %v3263_v23  ;;  %vm16096_vm10 = vmmov %vm16094_vm3  ;;  %v3499_v45 = vsel %vm3483_vm5, %v3290_v14, 0.0  ;;  %vm3488_vm3 = vcmp.eq.s32.totalorder %v3466_v36, 1  ;;  %v3458_v37 = vrot.slane %v3394_v58, %v12066_v1  ;;  %7439 = vrot.lane.b32.xlu0 %v11658_v8, %s11446_s13  ;;  %7445 = vrot.lane.b32.xlu1 %v11721_v31, %s11446_s13 }
 0x16b   : > { %v3289_v40 = vsel %vm16096_vm10, %v3263_v23, %v3265_v51  ;;  %v3497_v2 = vsel %vm3481_vm14, %v3288_v44, 0.0  ;;  %vm16097_vm0 = vmmov %vm16093_vm2  ;;  %v3406_v63 = vrot.slane %v3346_v43, %v12066_v1  ;;  %v3410_v7 = vrot.slane %v3346_v43, %v12069_v4  ;;  %v3275_v23 = vpop.permute.xlu0 %3274 }
 0x16c   : > { %v3498_v46 = vsel %vm3482_vm1, %v3289_v40, 0.0  ;;  %vm16098_vm2 = vmmov %vm16097_vm0  ;;  %v3277_v51 = vpop.permute.xlu1 %3276  ;;  %vm16100_vm5 = vcmask 31744  }
 0x16d   : > { %10787 = vmatprep.subr.msk.mxu1 %vm16097_vm0, %v3498_v46  ;;  %10791 = vmatpush1.msk.msra.mxu0 %vm16098_vm2, %v3499_v45  ;;  %vm16099_vm10 = vmmov %vm16097_vm0  ;;  %vm3485_vm2 = vcmp.eq.s32.totalorder %v3454_v62, 1  ;;  %v3470_v58 = vrot.slane %v3406_v63, %v12066_v1  ;;  %v3474_v43 = vrot.slane %v3410_v7, %v12066_v1  ;;  %v16106_v46 = vld [vmem:[#allocation59_spill] sm:$0xff]  ;;  %v16113_v7 = vld [vmem:[#allocation62_spill] sm:$0xff] }
 0x16e   : > { %10788 = vmatpush1.msk.msra.mxu1 %vm16099_vm10, %v3497_v2  ;;  %10792 = vmatmul.mubr.msk.f32.vlgmr.msra.gmra.mrb[4].mxu0 %vm16100_vm5, %v13558_v35  ;;  %vm16101_vm14 = vmmov %vm16095_vm15  ;;  %vm3487_vm15 = vcmp.eq.s32.totalorder %v3462_v17, 1  ;;  %vm3486_vm10 = vcmp.eq.s32.totalorder %v3458_v37, 1 }
 0x16f   : > { %v3295_v6 = vsel %vm16101_vm14, %v3275_v23, %v3277_v51  ;;  %vm16102_vm1 = vmmov %vm16100_vm5  ;;  %4050 = vmatprep.mubr.f32.mxu0 %v15711_v42  ;;  %v3271_v44 = vpop.permute.xlu0 %3270  ;;  %7451 = vrot.lane.b32.xlu0 %v11770_v41, %s11446_s13 }
 0x170   : > { %10789 = vmatmul.mubr.msk.f32.vlgmr.msra.gmra.mrb[2].mxu1 %vm16102_vm1, %v13558_v35  ;;  %v3504_v36 = vsel %vm3488_vm3, %v3295_v6, 0.0  ;;  %v3273_v14 = vpop.permute.xlu1 %3272  ;;  %vm16103_vm3 = vmmov %vm16101_vm14  ;;  %vm16107_vm1 = vnez %v16106_v46  ;;  %7457 = vrot.lane.b32.xlu1 %v11762_v39, %s11446_s13 }
 0x171   : > { %10796 = vmatprep.subr.msk.mxu0 %vm16097_vm0, %v3504_v36  ;;  %3979 = vmatprep.mubr.f32.mxu1 %v15711_v42  ;;  %v3294_v40 = vsel %vm16103_vm3, %v3273_v14, %v3275_v23  ;;  %vm16104_vm5 = vmmov %vm16103_vm3 }
 0x172   : > { %v3292_v45 = vsel %vm16104_vm5, %v3269_v28, %v3271_v44  ;;  %vm16105_vm14 = vmmov %vm16103_vm3  ;;  %v3503_v17 = vsel %vm3487_vm15, %v3294_v40, 0.0  ;;  %vm3489_vm5 = vcmp.eq.s32.totalorder %v3470_v58, 1  ;;  %v16121_v58 = vld [vmem:[#allocation27_spill] sm:$0xff] }
 0x173   : > { %v3293_v2 = vsel %vm16105_vm14, %v3271_v44, %v3273_v14  ;;  %v3501_v62 = vsel %vm3485_vm2, %v3292_v45, 0.0  ;;  %vm16108_vm11 = vmmov %vm16097_vm0  ;;  %vm3490_vm14 = vcmp.eq.s32.totalorder %v3474_v43, 1  ;;  %vm16112_vm2 = vcmask 31744   ;;  %v3279_v63 = vpop.permute.xlu0 %3278  ;;  %v16131_v44 = vld [vmem:[#allocation63_spill] sm:$0xff]  ;;  %7447 = vrot.lane.b32.xlu0 %v15812_v38, %s11446_s13  ;;  %v16143_v45 = vld [vmem:[#allocation64_spill] sm:$0xff] }
 0x174   : > { %v3502_v37 = vsel %vm3486_vm10, %v3293_v2, 0.0  ;;  %vm16109_vm3 = vmmov %vm16097_vm0  ;;  %v3281_v28 = vpop.permute.xlu1 %3280  ;;  %vm16114_vm10 = vnez %v16113_v7  ;;  %v3296_v23 = vsel %vm16116_vm9, %v3277_v51, %v3279_v63  ;;  %v13782_v51 = vld [vmem:[%s15239_s1 + $0x20] sm:$0xff]  ;;  %7453 = vrot.lane.b32.xlu1 %v15826_v16, %s11446_s13 }
 0x175   : > { %10793 = vmatprep.subr.msk.mxu1 %vm16108_vm11, %v3502_v37  ;;  %10797 = vmatpush1.msk.msra.mxu0 %vm16109_vm3, %v3503_v17  ;;  %vm16111_vm15 = vmmov %vm16097_vm0  ;;  %v3505_v50 = vsel %vm3489_vm5, %v3296_v23, 0.0  ;;  %v16147_v17 = vld [vmem:[#allocation65_spill] sm:$0xff] }
 0x176   : > { %10794 = vmatpush1.msk.msra.mxu1 %vm16111_vm15, %v3501_v62  ;;  %10798 = vmatmul.mubr.msk.f32.vlgmr.msra.gmra.mrb[6].mxu0 %vm16112_vm2, %v13558_v35  ;;  %vm16115_vm11 = vmand %vm15954_vm13, %vm16107_vm1  ;;  %vm16122_vm13 = vnez %v16121_v58 }
 0x177   : > { %vm4838_vm3 = vmand %vm16115_vm11, %vm16114_vm10  ;;  %10803 = vmatprep.subr.msk.mxu0 %vm16111_vm15, %v11672_v11  ;;  %vm16129_vm11 = vnez %v16011_v33  ;;  %4245 = vmatprep.mubr.f32.mxu0 %v15711_v42  ;;  %v13807_v14 = vpop.permute.xlu0 %4767  ;;  %vm16261_vm10 = vcmask 31744  }
 0x178   : > { %vm16117_vm6 = vmmov %vm16116_vm9  ;;  %v4846_v43 = vsel %vm4838_vm3, 1, %v15633_v30  ;;  %v13804_v29 = vpop.permute.xlu1 %4769  ;;  %7459 = vrot.lane.b32.xlu0 %v11816_v53, %s11446_s13  ;;  %7461 = vrot.lane.b32.xlu1 %v11836_v56, %s11446_s13 }
 0x179   : > { %v3297_v6 = vsel %vm16117_vm6, %v3279_v63, %v3281_v28  ;;  %vm16118_vm0 = vmmov %vm16112_vm2  ;;  %vm16119_vm2 = vnez %v15862_v25  ;;  %v4861_v33 = vrot.slane %v4846_v43, %v12069_v4 }
 0x17a   : > { %10795 = vmatmul.mubr.msk.f32.vlgmr.msra.gmra.mrb[4].mxu1 %vm16118_vm0, %v13558_v35  ;;  %vm4831_vm4 = vmand %vm16120_vm8, %vm16119_vm2  ;;  %v3506_v36 = vsel %vm3490_vm14, %v3297_v6, 0.0  ;;  %vm16128_vm14 = vnez %v15895_v48  ;;  %vm16139_vm8 = vnez %v15905_v3 }
 0x17b   : > { %vm16123_vm6 = vmand %vm13378_vm12, %vm16110_vm7  ;;  %4121 = vmatprep.mubr.f32.mxu1 %v15711_v42  ;;  %v4766_v40 = vpop.permute.xlu0 %4765  ;;  %v4925_v62 = vrot.slane %v4861_v33, %v12066_v1  ;;  %vm16235_vm7 = vcmask 1039360  }
 0x17c   : > { %vm13791_vm9 = vmand %vm16123_vm6, %vm16122_vm13  ;;  %vm16132_vm6 = vnez %v16131_v44  ;;  %7455 = vrot.lane.b32.xlu0 %v15842_v22, %s11446_s13  ;;  %vm16187_vm13 = vcmask 1039360  }
 0x17d   : > { %vm16126_vm0 = vmmov %vm16111_vm15  ;;  %v4848_v52 = vsel %vm13791_vm9, 1, %v15633_v30  ;;  %vm16144_vm9 = vnez %v16143_v45 }
 0x17e   : > { %10799 = vmatprep.subr.msk.mxu1 %vm16126_vm0, %v3506_v36  ;;  %vm16127_vm5 = vmmov %vm16126_vm0  ;;  %v4873_v37 = vrot.slane %v4848_v52, %v12066_v1 }
 0x17f   : > { %10804 = vmatpush1.msk.msra.mxu0 %vm16127_vm5, %v11660_v9  ;;  %vm4834_vm15 = vmand %vm16129_vm11, %vm16128_vm14  ;;  %vm16136_vm5 = vnez %v15897_v34  ;;  %vm16137_vm11 = vnez %v16028_v49  ;;  %v13845_v49 = vpop.permute.xlu1 %4775  ;;  %v13885_v23 = vpop.permute.xlu0 %4777 }
 0x180   : > { %vm16130_vm12 = vmmov %vm16126_vm0  ;;  %vm16135_vm0 = vcmask 31744  }
 0x181   : > { %10800 = vmatpush1.msk.msra.mxu1 %vm16130_vm12, %v3505_v50  ;;  %vm13816_vm3 = vmand %vm4831_vm4, %vm16132_vm6  ;;  %10805 = vmatmul.mubr.msk.f32.vlgmr.msra.gmra.mrb[0].mxu0 %vm16135_vm0, %v13782_v51  ;;  %v16153_v50 = vld [vmem:[#allocation66_spill] sm:$0xff] }
 0x182   : > { %vm4833_vm12 = vmand %vm16137_vm11, %vm16136_vm5  ;;  %4387 = vmatprep.mubr.f32.mxu0 %v15711_v42  ;;  %vm16174_vm5 = vnez %v15951_v19 }
 0x183   : > { %vm16138_vm14 = vmmov %vm16135_vm0  ;;  %vm16140_vm0 = vcmask 1043456   ;;  %v13883_v63 = vpop.permute.xlu1 %4771 }
 0x184   : > { %10801 = vmatmul.mubr.msk.f32.vlgmr.msra.gmra.mrb[6].mxu1 %vm16138_vm14, %v13558_v35  ;;  %vm4842_vm4 = vmand %vm4834_vm15, %vm16139_vm8  ;;  %10809 = vmatprep.subr.msk.mxu0 %vm16140_vm0, %v11668_v10  ;;  %v4857_v35 = vrot.slane %v4846_v43, %v12066_v1  ;;  %v4877_v10 = vrot.slane %v4848_v52, %v12069_v4 }
 0x185   : > { %vm16141_vm11 = vmmov %vm16140_vm0  ;;  %4316 = vmatprep.mubr.f32.mxu1 %v15711_v42 }
 0x186   : > { %10806 = vmatprep.subr.msk.mxu1 %vm16141_vm11, %v11683_v15  ;;  %vm16142_vm14 = vmmov %vm16140_vm0  ;;  %v13862_v15 = vsel %vm4842_vm4, 1, %v15633_v30  ;;  %vm16148_vm11 = vnez %v16147_v17  ;;  %vm16152_vm4 = vcmask 1043456   ;;  %v4921_v28 = vrot.slane %v4857_v35, %v12066_v1 }
 0x187   : > { %10810 = vmatpush1.msk.msra.mxu0 %vm16142_vm14, %v11658_v8  ;;  %vm13850_vm15 = vmand %vm4833_vm12, %vm16144_vm9  ;;  %10807 = vmatpush1.msk.msra.mxu1 %vm16140_vm0, %v11674_v12  ;;  %v4847_v8 = vsel %vm13816_vm3, 1, %v15633_v30  ;;  %vm16149_vm12 = vnez %v16046_v60  ;;  %vm16150_vm0 = vcmask 31744   ;;  %v4941_v43 = vrot.slane %v4877_v10, %v12066_v1 }
 0x188   : > { %vm4836_vm14 = vmand %vm16149_vm12, %vm16148_vm11  ;;  %10811 = vmatmul.mubr.msk.f32.vlgmr.msra.gmra.mrb[2].mxu0 %vm16150_vm0, %v13782_v51  ;;  %v4869_v12 = vrot.slane %v4847_v8, %v12069_v4  ;;  %10815 = vmatprep.subr.msk.mxu0 %vm16152_vm4, %v11701_v20  ;;  %v4849_v6 = vsel %vm13850_vm15, 1, %v15633_v30  ;;  %v4893_v20 = vrot.slane %v13862_v15, %v12069_v4  ;;  %v4865_v11 = vrot.slane %v4847_v8, %v12066_v1 }
 0x189   : > { %vm16151_vm9 = vmmov %vm16150_vm0  ;;  %10816 = vmatpush1.msk.msra.mxu0 %vm16152_vm4, %v15812_v38  ;;  %v4885_v9 = vrot.slane %v4849_v6, %v12069_v4  ;;  %vm16158_vm15 = vnez %v15940_v26  ;;  %vm16159_vm12 = vnez %v16051_v5  ;;  %vm16160_vm11 = vcmask 1039360   ;;  %4529 = vmatprep.mubr.f32.mxu0 %v15711_v42 }
 0x18a   : > { %10808 = vmatmul.mubr.msk.f32.vlgmr.msra.gmra.mrb[0].mxu1 %vm16151_vm9, %v13782_v51  ;;  %vm16154_vm9 = vnez %v16153_v50  ;;  %vm16157_vm3 = vmmov %vm16152_vm4  ;;  %v4799_v60 = vsel %vm16160_vm11, %v13807_v14, %v13804_v29  ;;  %v4937_v38 = vrot.slane %v4873_v37, %v12066_v1  ;;  %v4881_v33 = vrot.slane %v4849_v6, %v12066_v1  ;;  %v16175_v6 = vld [vmem:[#allocation17_spill] sm:$0xff] }
 0x18b   : > { %vm13899_vm0 = vmand %vm4836_vm14, %vm16154_vm9  ;;  %10812 = vmatprep.subr.msk.mxu1 %vm16157_vm3, %v11721_v31  ;;  %10821 = vmatprep.subr.msk.mxu0 %vm16157_vm3, %v11762_v39  ;;  %v4933_v31 = vrot.slane %v4869_v12, %v12066_v1  ;;  %vm16162_vm9 = vcmask 31744   ;;  %v13935_v39 = vpop.permute.xlu1 %4783  ;;  %v4957_v35 = vrot.slane %v4893_v20, %v12066_v1  ;;  %v4889_v2 = vrot.slane %v13862_v15, %v12066_v1 }
 0x18c   : > { %vm4835_vm14 = vmand %vm16159_vm12, %vm16158_vm15  ;;  %4458 = vmatprep.mubr.f32.mxu1 %v15711_v42  ;;  %v13929_v52 = vsel %vm13899_vm0, 1, %v15633_v30  ;;  %10817 = vmatmul.mubr.msk.f32.vlgmr.msra.gmra.mrb[4].mxu0 %vm16162_vm9, %v13782_v51  ;;  %v13953_v12 = vrot.slane %v4865_v11, %v12066_v1  ;;  %v13960_v5 = vrot.slane %v4885_v9, %v12066_v1  ;;  %vm16169_vm12 = vnez %v15972_v32 }
 0x18d   : > { %vm16161_vm4 = vmmov %vm16157_vm3  ;;  %v4909_v37 = vrot.slane %v13929_v52, %v12069_v4  ;;  %vm16176_vm8 = vnez %v16175_v6  ;;  %4671 = vmatprep.mubr.f32.mxu0 %v15711_v42  ;;  %v4953_v11 = vrot.slane %v4889_v2, %v12066_v1  ;;  %v16199_v2 = vld [vmem:[#allocation60_spill] sm:$0xff]  ;;  %v16202_v8 = vmov 0 }
 0x18e   : > { %10813 = vmatpush1.msk.msra.mxu1 %vm16161_vm4, %v11708_v24  ;;  %vm16163_vm3 = vmmov %vm16162_vm9  ;;  %v4774_v24 = vpop.permute.xlu0 %4773  ;;  %vm16164_vm4 = vnez %v15949_v18  ;;  %vm16167_vm9 = vcmp.eq.s32.totalorder %v4925_v62, 1 }
 0x18f   : > { %10814 = vmatmul.mubr.msk.f32.vlgmr.msra.gmra.mrb[2].mxu1 %vm16163_vm3, %v13782_v51  ;;  %vm13947_vm0 = vmand %vm4835_vm14, %vm16164_vm4  ;;  %v4999_v10 = vsel %vm16167_vm9, %v4799_v60, 0.0  ;;  %vm16168_vm3 = vcmask 1043456   ;;  %vm16170_vm14 = vnez %v16078_v0  ;;  %v4780_v36 = vpop.permute.xlu1 %4779  ;;  %vm16185_vm4 = vcmp.eq.s32.totalorder %v4933_v31, 1 }
 0x190   : > { %10822 = vmatpush1.msk.msra.mxu0 %vm16168_vm3, %v15842_v22  ;;  %vm16171_vm9 = vmmov %vm16160_vm11  ;;  %v13986_v22 = vrot.slane %v4881_v33, %v12066_v1  ;;  %4600 = vmatprep.mubr.f32.mxu1 %v15711_v42  ;;  %v4905_v33 = vrot.slane %v13929_v52, %v12066_v1  ;;  %v4973_v19 = vrot.slane %v4909_v37, %v12066_v1 }
 0x191   : > { %v4798_v15 = vsel %vm16171_vm9, %v4766_v40, %v13807_v14  ;;  %vm16172_vm15 = vmmov %vm16168_vm3  ;;  %v4803_v14 = vsel %vm16171_vm9, %v13845_v49, %v13885_v23  ;;  %v4851_v40 = vsel %vm13947_vm0, 1, %v15633_v30  ;;  %v4802_v20 = vsel %vm16171_vm9, %v4774_v24, %v13845_v49 }
 0x192   : > { %10828 = vmatprep.subr.msk.mxu0 %vm16172_vm15, %v4999_v10  ;;  %vm16173_vm11 = vmmov %vm16171_vm9  ;;  %v4901_v9 = vrot.slane %v4851_v40, %v12069_v4  ;;  %vm16183_vm9 = vcmp.eq.s32.totalorder %v4921_v28, 1 }
 0x193   : > { %v4801_v62 = vsel %vm16173_vm11, %v13883_v63, %v4774_v24  ;;  %vm16177_vm15 = vmmov %vm16168_vm3  ;;  %v4998_v49 = vsel %vm16183_vm9, %v4798_v15, 0.0  ;;  %vm16193_vm9 = vcmask 1043456  }
 0x194   : > { %10818 = vmatprep.subr.msk.mxu1 %vm16177_vm15, %v15826_v16  ;;  %vm16178_vm11 = vmmov %vm16168_vm3  ;;  %v13996_v16 = vpop.permute.xlu0 %4785  ;;  %vm16179_vm3 = vnez %v15983_v57  ;;  %vm16184_vm15 = vcmask 31744   ;;  %v5001_v60 = vsel %vm16185_vm4, %v4801_v62, 0.0  ;;  %vm16192_vm4 = vcmp.eq.s32.totalorder %v4941_v43, 1 }
 0x195   : > { %10819 = vmatpush1.msk.msra.mxu1 %vm16178_vm11, %v11770_v41  ;;  %vm16180_vm0 = vmand %vm16170_vm14, %vm16169_vm12  ;;  %10823 = vmatmul.mubr.msk.f32.vlgmr.msra.gmra.mrb[6].mxu0 %vm16184_vm15, %v13782_v51  ;;  %v4807_v0 = vsel %vm16187_vm13, %v13935_v39, %v13996_v16  ;;  %vm16188_vm14 = vnez %v15964_v54  ;;  %v5003_v31 = vsel %vm16192_vm4, %v4803_v14, 0.0  ;;  %v14041_v54 = vld [vmem:[%s15239_s1 + $0x28] sm:$0xff]  ;;  %v4969_v62 = vrot.slane %v4905_v33, %v12066_v1 }
 0x196   : > { %vm14007_vm11 = vmand %vm16180_vm0, %vm16179_vm3  ;;  %10829 = vmatpush1.msk.msra.mxu0 %vm16193_vm9, %v4998_v49  ;;  %5131 = vmatprep.mubr.f32.mxu0 %v15711_v42  ;;  %vm16215_vm3 = vcmp.eq.s32.totalorder %v4953_v11, 1  ;;  %v16230_v33 = vld [vmem:[#allocation24_spill] sm:$0xff] }
 0x197   : > { %vm16186_vm6 = vmmov %vm16184_vm15  ;;  %v4853_v24 = vsel %vm14007_vm11, 1, %v15633_v30  ;;  %vm16212_vm11 = vcmp.eq.s32.totalorder %v13960_v5, 1 }
 0x198   : > { %10820 = vmatmul.mubr.msk.f32.vlgmr.msra.gmra.mrb[4].mxu1 %vm16186_vm6, %v13782_v51  ;;  %vm16189_vm0 = vmand %vm16176_vm8, %vm16174_vm5  ;;  %vm16201_vm5 = vcmp.ge.s32.totalorder %v16199_v2, 0 }
 0x199   : > { %vm14029_vm15 = vmand %vm16189_vm0, %vm16188_vm14  ;;  %vm16195_vm14 = vcmask 1039360   ;;  %vm16196_vm0 = vcmp.eq.s32.totalorder %v4937_v38, 1  ;;  %v4965_v38 = vrot.slane %v4901_v9, %v12066_v1  ;;  %4742 = vmatprep.mubr.f32.mxu1 %v15711_v42 }
 0x19a   : > { %vm16194_vm13 = vmmov %vm16193_vm9  ;;  %v4800_v52 = vsel %vm16195_vm14, %v13804_v29, %v13883_v63  ;;  %v5002_v43 = vsel %vm16196_vm0, %v4802_v20, 0.0  ;;  %vm16205_vm0 = vcmp.eq.s32.totalorder %v4957_v35, 1  ;;  %v4792_v29 = vpop.permute.xlu1 %4791  ;;  %v4782_v63 = vpop.permute.xlu0 %4781  ;;  %v5740_v10 = vsel %vm14029_vm15, 1, %v15633_v30 }
 0x19b   : > { %10824 = vmatprep.subr.msk.mxu1 %vm16194_vm13, %v11836_v56  ;;  %vm16197_vm4 = vmmov %vm16193_vm9  ;;  %v4897_v56 = vrot.slane %v4851_v40, %v12066_v1  ;;  %vm16200_vm13 = vcmp.lt.s32.totalorder %v16199_v2, 16  ;;  %v4913_v40 = vrot.slane %v4853_v24, %v12066_v1  ;;  %v5755_v5 = vrot.slane %v5740_v10, %v12069_v4 }
 0x19c   : > { %10834 = vmatprep.subr.msk.mxu0 %vm16197_vm4, %v5003_v31  ;;  %vm16198_vm9 = vmmov %vm16197_vm4 }
 0x19d   : > { %10825 = vmatpush1.msk.msra.mxu1 %vm16198_vm9, %v11816_v53  ;;  %vm14060_vm6 = vmand %vm16201_vm5, %vm16200_vm13  ;;  %v5007_v53 = vsel %vm16205_vm0, %v4807_v0, 0.0  ;;  %vm16206_vm5 = vcmask 31744   ;;  %vm16207_vm9 = vcmask 1039360   ;;  %v4961_v20 = vrot.slane %v4897_v56, %v12066_v1 }
 0x19e   : > { %v16203_v8 = vsel %vm14060_vm6, 4294967295, %v16202_v8  ;;  %vm16204_vm14 = vmmov %vm16197_vm4  ;;  %10830 = vmatmul.mubr.msk.f32.vlgmr.msra.gmra.mrb[0].mxu0 %vm16206_vm5, %v14041_v54  ;;  %v4805_v15 = vsel %vm16207_vm9, %v4780_v36, %v4782_v63  ;;  %v4788_v9 = vpop.permute.xlu1 %4787  ;;  %v4794_v41 = vpop.permute.xlu0 %4793  ;;  %v5751_v0 = vrot.slane %v5740_v10, %v12066_v1 }
 0x19f   : > { %10831 = vmatprep.subr.msk.mxu1 %vm16204_vm14, %v5001_v60  ;;  %vm16208_vm13 = vmmov %vm16207_vm9  ;;  %vm16209_vm14 = vcmp.eq.s32.totalorder %v13953_v12, 1  ;;  %v5005_v14 = vsel %vm16212_vm11, %v4805_v15, 0.0  ;;  %v4917_v12 = vrot.slane %v4853_v24, %v12069_v4  ;;  %5273 = vmatprep.mubr.f32.mxu0 %v15711_v42  ;;  %vm16216_vm11 = vnez %v15719_v13 }
 0x1a0   : > { %v4806_v35 = vsel %vm16208_vm13, %v4782_v63, %v13935_v39  ;;  %v5000_v37 = vsel %vm16209_vm14, %v4800_v52, 0.0  ;;  %vm16210_vm0 = vmmov %vm16197_vm4  ;;  %v4804_v39 = vsel %vm16208_vm13, %v13885_v23, %v4780_v36  ;;  %v16217_v23 = vld [vmem:[#allocation22_spill] sm:$0xff]  ;;  %vm16222_vm4 = vnez %v15998_v61  ;;  %v16243_v63 = vld [vmem:[#allocation16_spill] sm:$0xff] }
 0x1a1   : > { %10835 = vmatpush1.msk.msra.mxu0 %vm16210_vm0, %v5002_v43  ;;  %vm16211_vm15 = vmmov %vm16206_vm5  ;;  %vm16213_vm5 = vnez %v15685_v55  ;;  %v4977_v61 = vrot.slane %v4913_v40, %v12066_v1  ;;  %v4981_v55 = vrot.slane %v4917_v12, %v12066_v1  ;;  %v4808_v31 = vsel %vm16235_vm7, %v13996_v16, %v4788_v9  ;;  %v16236_v43 = vld [vmem:[#allocation51_spill] sm:$0xff] }
 0x1a2   : > { %10826 = vmatmul.mubr.msk.f32.vlgmr.msra.gmra.mrb[6].mxu1 %vm16211_vm15, %v13782_v51  ;;  %vm5726_vm9 = vmand %vm14060_vm6, %vm16213_vm5  ;;  %10840 = vmatprep.subr.msk.mxu0 %vm16210_vm0, %v5007_v53  ;;  %v5006_v51 = vsel %vm16215_vm3, %v4806_v35, 0.0  ;;  %vm16218_vm15 = vnez %v16217_v23  ;;  %v4790_v52 = vpop.permute.xlu0 %4789  ;;  %vm16244_vm5 = vcmp.lt.s32.totalorder %v16243_v63, 16  ;;  %v16246_v13 = vmov 0 }
 0x1a3   : > { %vm16214_vm14 = vmmov %vm16210_vm0  ;;  %5202 = vmatprep.mubr.f32.mxu1 %v15711_v42  ;;  %v4809_v24 = vsel %vm16235_vm7, %v4788_v9, %v4790_v52 }
 0x1a4   : > { %10832 = vmatpush1.msk.msra.mxu1 %vm16214_vm14, %v5000_v37  ;;  %vm16219_vm14 = vcmask 31744   ;;  %vm16220_vm3 = vmmov %vm16210_vm0 }
 0x1a5   : > { %10836 = vmatmul.mubr.msk.f32.vlgmr.msra.gmra.mrb[2].mxu0 %vm16219_vm14, %v14041_v54  ;;  %10837 = vmatprep.subr.msk.mxu1 %vm16220_vm3, %v5005_v14  ;;  %vm16221_vm0 = vmmov %vm16208_vm13  ;;  %vm16225_vm13 = vcmp.eq.s32.totalorder %v13986_v22, 1  ;;  %v5819_v22 = vrot.slane %v5755_v5, %v12066_v1  ;;  %v16256_v14 = vld [vmem:[#allocation54_spill] sm:$0xff]  ;;  %v16262_v5 = vld [vmem:[#allocation53_spill] sm:$0xff] }
 0x1a6   : > { %v4811_v36 = vsel %vm16221_vm0, %v4792_v29, %v4794_v41  ;;  %vm14116_vm12 = vmand %vm5726_vm9, %vm16222_vm4  ;;  %v5004_v49 = vsel %vm16225_vm13, %v4804_v39, 0.0  ;;  %10833 = vmatmul.mubr.msk.f32.vlgmr.msra.gmra.mrb[0].mxu1 %vm16219_vm14, %v14041_v54  ;;  %vm16232_vm13 = vcmp.ge.s32.totalorder %v16230_v33, 0  ;;  %5415 = vmatprep.mubr.f32.mxu0 %v15711_v42  ;;  %v5656_v37 = vpop.permute.xlu0 %5655  ;;  %vm16257_vm9 = vnez %v16256_v14  ;;  %v16292_v14 = vld [vmem:[#allocation58_spill] sm:$0xff] }
 0x1a7   : > { %vm16226_vm2 = vmmov %vm16220_vm3  ;;  %vm16227_vm3 = vcmp.eq.s32.totalorder %v4973_v19, 1  ;;  %v5654_v19 = vpop.permute.xlu1 %5653  ;;  %5344 = vmatprep.mubr.f32.mxu1 %v15711_v42  ;;  %v5742_v16 = vsel %vm14116_vm12, 1, %v15633_v30  ;;  %vm5877_vm12 = vcmp.eq.s32.totalorder %v5819_v22, 1 }
 0x1a8   : > { %10841 = vmatpush1.msk.msra.mxu0 %vm16226_vm2, %v5006_v51  ;;  %v5011_v60 = vsel %vm16227_vm3, %v4811_v36, 0.0  ;;  %vm16228_vm0 = vmmov %vm16226_vm2  ;;  %vm16231_vm2 = vcmp.lt.s32.totalorder %v16230_v33, 16  ;;  %vm16242_vm3 = vcmask 31744  }
 0x1a9   : > { %10838 = vmatpush1.msk.msra.mxu1 %vm16228_vm0, %v5004_v49  ;;  %vm16229_vm4 = vmmov %vm16228_vm0  ;;  %vm16237_vm0 = vnez %v16236_v43  ;;  %10842 = vmatmul.mubr.msk.f32.vlgmr.msra.gmra.mrb[4].mxu0 %vm16242_vm3, %v14041_v54  ;;  %v5767_v49 = vrot.slane %v5742_v16, %v12066_v1 }
 0x1aa   : > { %10846 = vmatprep.subr.msk.mxu0 %vm16229_vm4, %v5011_v60  ;;  %vm14136_vm14 = vmand %vm16232_vm13, %vm16231_vm2  ;;  %5557 = vmatprep.mubr.f32.mxu0 %v15711_v42  ;;  %v16270_v60 = vld [vmem:[#allocation31_spill] sm:$0xff] }
 0x1ab   : > { %vm16238_vm4 = vmand %vm16218_vm15, %vm16216_vm11  ;;  %vm16245_vm11 = vcmp.ge.s32.totalorder %v16243_v63, 0  ;;  %vm16249_vm15 = vcmp.eq.s32.totalorder %v4969_v62, 1  ;;  %v4796_v62 = vpop.permute.xlu1 %4795 }
 0x1ac   : > { %vm14151_vm2 = vmand %vm16238_vm4, %vm16237_vm0  ;;  %vm16248_vm4 = vcmp.eq.s32.totalorder %v4965_v38, 1  ;;  %v5771_v38 = vrot.slane %v5742_v16, %v12069_v4  ;;  %v14247_v16 = vld [vmem:[%s15239_s1 + $0x30] sm:$0xff] }
 0x1ad   : > { %vm16241_vm13 = vmmov %vm16235_vm7  ;;  %v5009_v10 = vsel %vm16248_vm4, %v4809_v24, 0.0  ;;  %v5741_v12 = vsel %vm14151_vm2, 1, %v15633_v30  ;;  %vm16268_vm2 = vcmask 1043456   ;;  %v16282_v24 = vld [vmem:[#allocation35_spill] sm:$0xff] }
 0x1ae   : > { %v4810_v53 = vsel %vm16241_vm13, %v4790_v52, %v4792_v29  ;;  %vm14166_vm0 = vmand %vm16245_vm11, %vm16244_vm5  ;;  %v5815_v29 = vrot.slane %v5751_v0, %v12066_v1  ;;  %vm16252_vm13 = vcmp.eq.s32.totalorder %v4961_v20, 1  ;;  %vm16253_vm11 = vcmask 1043456  }
 0x1af   : > { %v16247_v13 = vsel %vm14166_vm0, 4294967295, %v16246_v13  ;;  %v5010_v15 = vsel %vm16249_vm15, %v4810_v53, 0.0  ;;  %vm16250_vm7 = vmmov %vm16242_vm3  ;;  %vm16251_vm3 = vnez %v15725_v27  ;;  %v5008_v35 = vsel %vm16252_vm13, %v4808_v31, 0.0  ;;  %10843 = vmatprep.subr.msk.mxu1 %vm16253_vm11, %v5009_v10  ;;  %v5662_v0 = vpop.permute.xlu1 %5661  ;;  %v16276_v31 = vld [vmem:[#allocation55_spill] sm:$0xff] }
 0x1b0   : > { %10839 = vmatmul.mubr.msk.f32.vlgmr.msra.gmra.mrb[2].mxu1 %vm16250_vm7, %v14041_v54  ;;  %vm16254_vm4 = vmmov %vm16253_vm11  ;;  %vm4997_vm15 = vcmp.eq.s32.totalorder %v4981_v55, 1  ;;  %vm16258_vm13 = vcmask 1039360   ;;  %v5835_v27 = vrot.slane %v5771_v38, %v12066_v1  ;;  %v5763_v11 = vrot.slane %v5741_v12, %v12069_v4  ;;  %v5652_v55 = vpop.permute.xlu0 %5651 }
 0x1b1   : > { %10847 = vmatpush1.msk.msra.mxu0 %vm16254_vm4, %v5010_v15  ;;  %vm16255_vm7 = vmmov %vm16254_vm4  ;;  %5486 = vmatprep.mubr.f32.mxu1 %v15711_v42  ;;  %v4812_v40 = vsel %vm16258_vm13, %v4794_v41, %v4796_v62  ;;  %vm16260_vm4 = vcmask 924672   ;;  %v5759_v22 = vrot.slane %v5741_v12, %v12066_v1  ;;  %v16285_v53 = vmov 0  ;;  %v16288_v15 = vld [vmem:[#allocation56_spill] sm:$0xff] }
 0x1b2   : > { %10844 = vmatpush1.msk.msra.mxu1 %vm16255_vm7, %v5008_v35  ;;  %vm16259_vm11 = vmmov %vm16258_vm13  ;;  %v5685_v51 = vsel %vm16260_vm4, %v5654_v19, %v5656_v37  ;;  %10848 = vmatmul.mubr.msk.f32.vlgmr.msra.gmra.mrb[6].mxu0 %vm16261_vm10, %v14041_v54  ;;  %vm16263_vm7 = vnez %v16262_v5  ;;  %vm16267_vm13 = vcmp.eq.s32.totalorder %v4977_v61, 1  ;;  %vm5876_vm4 = vcmp.eq.s32.totalorder %v5815_v29, 1 }
 0x1b3   : > { %v4829_v39 = vsel %vm16259_vm11, %v4796_v62, 0.0  ;;  %vm16264_vm5 = vmand %vm14136_vm14, %vm16251_vm3  ;;  %v5012_v9 = vsel %vm16267_vm13, %v4812_v40, 0.0  ;;  %v5893_v36 = vsel %vm5877_vm12, %v5685_v51, 0.0  ;;  %6025 = vmatprep.mubr.f32.mxu0 %v15711_v42  ;;  %vm16271_vm3 = vcmp.lt.s32.totalorder %v16270_v60, 16  ;;  %v5658_v62 = vpop.permute.xlu1 %5657  ;;  %v16295_v51 = vld [vmem:[#allocation57_spill] sm:$0xff] }
 0x1b4   : > { %vm14205_vm8 = vmand %vm16264_vm5, %vm16263_vm7  ;;  %v5013_v41 = vsel %vm4997_vm15, %v4829_v39, 0.0  ;;  %10845 = vmatmul.mubr.msk.f32.vlgmr.msra.gmra.mrb[4].mxu1 %vm16261_vm10, %v14041_v54  ;;  %vm16272_vm12 = vcmp.ge.s32.totalorder %v16270_v60, 0  ;;  %v16273_v61 = vmov 0  ;;  %vm16277_vm7 = vnez %v16276_v31  ;;  %v16306_v31 = vld [vmem:[#allocation61_spill] sm:$0xff] }
 0x1b5   : > { %10849 = vmatprep.subr.msk.mxu1 %vm16268_vm2, %v5013_v41  ;;  %vm16269_vm11 = vmmov %vm16268_vm2  ;;  %5628 = vmatprep.mubr.f32.mxu1 %v15711_v42  ;;  %v5744_v43 = vsel %vm14205_vm8, 1, %v15633_v30  ;;  %vm16289_vm8 = vnez %v16288_v15  ;;  %v5831_v35 = vrot.slane %v5767_v49, %v12066_v1  ;;  %v5823_v29 = vrot.slane %v5759_v22, %v12066_v1 }
 0x1b6   : > { %10853 = vmatprep.subr.msk.mxu0 %vm16269_vm11, %v5893_v36  ;;  %vm14222_vm5 = vmand %vm16272_vm12, %vm16271_vm3  ;;  %vm16283_vm11 = vcmp.lt.s32.totalorder %v16282_v24, 16  ;;  %vm16284_vm3 = vcmp.ge.s32.totalorder %v16282_v24, 0  ;;  %vm16287_vm12 = vcmask 31744   ;;  %v5787_v38 = vrot.slane %v5744_v43, %v12069_v4 }
 0x1b7   : > { %v16274_v61 = vsel %vm14222_vm5, 4294967295, %v16273_v61  ;;  %vm16275_vm15 = vmmov %vm16268_vm2  ;;  %vm16281_vm2 = vcmask 924672   ;;  %v16302_v41 = vmov 0  ;;  %v5670_v49 = vpop.permute.xlu1 %5669 }
 0x1b8   : > { %10850 = vmatpush1.msk.msra.mxu1 %vm16275_vm15, %v5012_v9  ;;  %vm16278_vm13 = vmand %vm14166_vm0, %vm16257_vm9  ;;  %v5684_v56 = vsel %vm16281_vm2, %v5652_v55, %v5654_v19  ;;  %v5827_v19 = vrot.slane %v5763_v11, %v12066_v1  ;;  %vm16293_vm2 = vnez %v16292_v14  ;;  %v16299_v9 = vld [vmem:[#allocation43_spill] sm:$0xff]  ;;  %vm5880_vm0 = vcmp.eq.s32.totalorder %v5831_v35, 1 }
 0x1b9   : > { %vm14236_vm10 = vmand %vm16278_vm13, %vm16277_vm7  ;;  %v5892_v10 = vsel %vm5876_vm4, %v5684_v56, 0.0  ;;  %10851 = vmatmul.mubr.msk.f32.vlgmr.msra.gmra.mrb[6].mxu1 %vm16287_vm12, %v14041_v54  ;;  %vm16290_vm7 = vcmask 1043456   ;;  %vm5881_vm13 = vcmp.eq.s32.totalorder %v5835_v27, 1  ;;  %v5664_v54 = vpop.permute.xlu0 %5663  ;;  %v5851_v36 = vrot.slane %v5787_v38, %v12066_v1 }
 0x1ba   : > { %vm14253_vm9 = vmand %vm16284_vm3, %vm16283_vm11  ;;  %10854 = vmatpush1.msk.msra.mxu0 %vm16290_vm7, %v5892_v10  ;;  %6096 = vmatprep.mubr.f32.mxu1 %v15711_v42  ;;  %vm16294_vm3 = vcmask 924672   ;;  %v5743_v39 = vsel %vm14236_vm10, 1, %v15633_v30  ;;  %vm16301_vm10 = vcmp.ge.s32.totalorder %v16299_v9, 0  ;;  %vm16304_vm11 = vcmask 1043456  }
 0x1bb   : > { %v16286_v53 = vsel %vm14253_vm9, 4294967295, %v16285_v53  ;;  %vm5730_vm15 = vmand %vm14222_vm5, %vm16289_vm8  ;;  %v5689_v40 = vsel %vm16294_vm3, %v5662_v0, %v5664_v54  ;;  %v5779_v20 = vrot.slane %v5743_v39, %v12069_v4  ;;  %vm5879_vm1 = vcmp.eq.s32.totalorder %v5827_v19, 1 }
 0x1bc   : > { %vm16291_vm4 = vmmov %vm16287_vm12  ;;  %vm16296_vm12 = vnez %v16295_v51  ;;  %v5897_v5 = vsel %vm5881_vm13, %v5689_v40, 0.0  ;;  %v5783_v27 = vrot.slane %v5744_v43, %v12066_v1  ;;  %vm5878_vm8 = vcmp.eq.s32.totalorder %v5823_v29, 1 }
 0x1bd   : > { %10855 = vmatmul.mubr.msk.f32.vlgmr.msra.gmra.mrb[0].mxu0 %vm16291_vm4, %v14247_v16  ;;  %vm14288_vm7 = vmand %vm5730_vm15, %vm16296_vm12  ;;  %vm16300_vm4 = vcmp.lt.s32.totalorder %v16299_v9, 16  ;;  %10859 = vmatprep.subr.msk.mxu0 %vm16304_vm11, %v5897_v5  ;;  %vm16305_vm15 = vcmask 924672   ;;  %v5660_v55 = vpop.permute.xlu0 %5659  ;;  %v5775_v22 = vrot.slane %v5743_v39, %v12066_v1  ;;  %vm16307_vm13 = vnez %v16306_v31 }
 0x1be   : > { %6167 = vmatprep.mubr.f32.mxu0 %v15711_v42  ;;  %vm14297_vm3 = vmand %vm16301_vm10, %vm16300_vm4  ;;  %v5686_v11 = vsel %vm16305_vm15, %v5656_v37, %v5658_v62  ;;  %v5746_v43 = vsel %vm14288_vm7, 1, %v15633_v30  ;;  %v5843_v19 = vrot.slane %v5779_v20, %v12066_v1  ;;  %v5847_v38 = vrot.slane %v5783_v27, %v12066_v1 }
 0x1bf   : > { %v16303_v41 = vsel %vm14297_vm3, 4294967295, %v16302_v41  ;;  %vm16308_vm11 = vmand %vm14253_vm9, %vm16293_vm2  ;;  %v5894_v35 = vsel %vm5878_vm8, %v5686_v11, 0.0  ;;  %vm16314_vm2 = vcmask 1043456   ;;  %v5803_v29 = vrot.slane %v5746_v43, %v12069_v4  ;;  %v16322_v11 = vld [vmem:[#allocation18_spill] sm:$0xff] }
 0x1c0   : > { %vm14313_vm12 = vmand %vm16308_vm11, %vm16307_vm13  ;;  %vm5885_vm11 = vcmp.eq.s32.totalorder %v5851_v36, 1 }
 0x1c1   : > { %vm16311_vm4 = vmmov %vm16305_vm15  ;;  %vm16313_vm15 = vnez %v16084_v21  ;;  %v5672_v14 = vpop.permute.xlu0 %5671  ;;  %v5745_v40 = vsel %vm14313_vm12, 1, %v15633_v30  ;;  %v5867_v21 = vrot.slane %v5803_v29, %v12066_v1 }
 0x1c2   : > { %v5687_v37 = vsel %vm16311_vm4, %v5658_v62, %v5660_v55  ;;  %vm16312_vm10 = vmmov %vm16311_vm4  ;;  %v5666_v62 = vpop.permute.xlu1 %5665  ;;  %v5693_v39 = vsel %vm16311_vm4, %v5670_v49, %v5672_v14  ;;  %v5795_v51 = vrot.slane %v5745_v40, %v12069_v4  ;;  %v5791_v27 = vrot.slane %v5745_v40, %v12066_v1 }
 0x1c3   : > { %v5688_v56 = vsel %vm16312_vm10, %v5660_v55, %v5662_v0  ;;  %vm5731_vm5 = vmand %vm14297_vm3, %vm16313_vm15  ;;  %v5895_v10 = vsel %vm5879_vm1, %v5687_v37, 0.0  ;;  %v5839_v0 = vrot.slane %v5775_v22, %v12066_v1  ;;  %vm16317_vm1 = vcmask 31744  }
 0x1c4   : > { %v5896_v15 = vsel %vm5880_vm0, %v5688_v56, 0.0  ;;  %10856 = vmatprep.subr.msk.mxu1 %vm16314_vm2, %v5895_v10  ;;  %vm16315_vm13 = vmmov %vm16314_vm2  ;;  %vm16318_vm0 = vnez %v16091_v47  ;;  %v5901_v12 = vsel %vm5885_vm11, %v5693_v39, 0.0  ;;  %v5799_v47 = vrot.slane %v5746_v43, %v12066_v1  ;;  %v16326_v10 = vld [vmem:[#allocation29_spill] sm:$0xff] }
 0x1c5   : > { %10860 = vmatpush1.msk.msra.mxu0 %vm16315_vm13, %v5896_v15  ;;  %vm16316_vm7 = vmmov %vm16314_vm2  ;;  %vm5883_vm2 = vcmp.eq.s32.totalorder %v5843_v19, 1  ;;  %vm5884_vm13 = vcmp.eq.s32.totalorder %v5847_v38, 1  ;;  %v5668_v36 = vpop.permute.xlu0 %5667  ;;  %vm16323_vm11 = vnez %v16322_v11  ;;  %v5859_v52 = vrot.slane %v5795_v51, %v12066_v1 }
 0x1c6   : > { %10857 = vmatpush1.msk.msra.mxu1 %vm16316_vm7, %v5894_v35  ;;  %10861 = vmatmul.mubr.msk.f32.vlgmr.msra.gmra.mrb[2].mxu0 %vm16317_vm1, %v14247_v16  ;;  %vm5739_vm8 = vmand %vm5731_vm5, %vm16318_vm0  ;;  %vm5882_vm5 = vcmp.eq.s32.totalorder %v5839_v0, 1  ;;  %v5678_v9 = vpop.permute.xlu1 %5677  ;;  %v6626_v55 = vsel %vm16323_vm11, 1, %v15633_v30  ;;  %vm16327_vm0 = vnez %v16326_v10  ;;  %v5855_v35 = vrot.slane %v5791_v27, %v12066_v1 }
 0x1c7   : > { %vm16319_vm10 = vmmov %vm16317_vm1  ;;  %6309 = vmatprep.mubr.f32.mxu0 %v15711_v42  ;;  %v5747_v5 = vsel %vm5739_vm8, 1, %v15633_v30  ;;  %v6641_v19 = vrot.slane %v6626_v55, %v12069_v4 }
 0x1c8   : > { %10858 = vmatmul.mubr.msk.f32.vlgmr.msra.gmra.mrb[0].mxu1 %vm16319_vm10, %v14247_v16  ;;  %vm16320_vm12 = vmmov %vm16316_vm7  ;;  %v5807_v56 = vrot.slane %v5747_v5, %v12066_v1 }
 0x1c9   : > { %6238 = vmatprep.mubr.f32.mxu1 %v15711_v42  ;;  %10865 = vmatprep.subr.msk.mxu0 %vm16320_vm12, %v5901_v12  ;;  %vm16321_vm15 = vmmov %vm16311_vm4  ;;  %v5680_v29 = vpop.permute.xlu0 %5679  ;;  %v6705_v12 = vrot.slane %v6641_v19, %v12066_v1  ;;  %v16350_v19 = vld [vmem:[#allocation37_spill] sm:$0xff] }
 0x1ca   : > { %v5690_v20 = vsel %vm16321_vm15, %v5664_v54, %v5666_v62  ;;  %vm16324_vm7 = vmmov %vm16311_vm4  ;;  %v5811_v54 = vrot.slane %v5747_v5, %v12069_v4  ;;  %v5674_v38 = vpop.permute.xlu1 %5673  ;;  %v5871_v39 = vrot.slane %v5807_v56, %v12066_v1 }
 0x1cb   : > { %v5691_v22 = vsel %vm16324_vm7, %v5666_v62, %v5668_v36  ;;  %vm16325_vm1 = vmmov %vm16311_vm4  ;;  %v5898_v15 = vsel %vm5882_vm5, %v5690_v20, 0.0  ;;  %v16334_v62 = vld [vmem:[#allocation32_spill] sm:$0xff] }
 0x1cc   : > { %v5692_v31 = vsel %vm16325_vm1, %v5668_v36, %v5670_v49  ;;  %v5899_v43 = vsel %vm5883_vm2, %v5691_v22, 0.0  ;;  %vm6612_vm8 = vmand %vm14060_vm6, %vm16327_vm0  ;;  %v5863_v49 = vrot.slane %v5799_v47, %v12066_v1  ;;  %vm16335_vm11 = vnez %v16334_v62  ;;  %v16354_v62 = vld [vmem:[#allocation38_spill] sm:$0xff] }
 0x1cd   : > { %v5900_v37 = vsel %vm5884_vm13, %v5692_v31, 0.0  ;;  %vm16328_vm4 = vmmov %vm16320_vm12  ;;  %vm5889_vm12 = vcmp.eq.s32.totalorder %v5867_v21, 1  ;;  %vm16331_vm13 = vcmask 31744   ;;  %v5875_v51 = vrot.slane %v5811_v54, %v12066_v1  ;;  %v5676_v20 = vpop.permute.xlu0 %5675 }
 0x1ce   : > { %10862 = vmatprep.subr.msk.mxu1 %vm16328_vm4, %v5899_v43  ;;  %vm16329_vm10 = vmmov %vm16328_vm4  ;;  %v6637_v21 = vrot.slane %v6626_v55, %v12066_v1  ;;  %v6548_v5 = vpop.permute.xlu1 %6547 }
 0x1cf   : > { %10866 = vmatpush1.msk.msra.mxu0 %vm16329_vm10, %v5900_v37  ;;  %vm16330_vm2 = vmmov %vm16328_vm4  ;;  %vm5887_vm4 = vcmp.eq.s32.totalorder %v5859_v52, 1  ;;  %vm5888_vm10 = vcmp.eq.s32.totalorder %v5863_v49, 1  ;;  %v16340_v52 = vld [vmem:[#allocation34_spill] sm:$0xff] }
 0x1d0   : > { %10863 = vmatpush1.msk.msra.mxu1 %vm16330_vm2, %v5898_v15  ;;  %10867 = vmatmul.mubr.msk.f32.vlgmr.msra.gmra.mrb[4].mxu0 %vm16331_vm13, %v14247_v16  ;;  %vm16332_vm15 = vmmov %vm16325_vm1  ;;  %v16348_v15 = vld [vmem:[#allocation23_spill] sm:$0xff] }
 0x1d1   : > { %v5697_v0 = vsel %vm16332_vm15, %v5678_v9, %v5680_v29  ;;  %vm16333_vm5 = vmmov %vm16331_vm13  ;;  %6451 = vmatprep.mubr.f32.mxu0 %v15711_v42  ;;  %v6550_v37 = vpop.permute.xlu0 %6549 }
 0x1d2   : > { %10864 = vmatmul.mubr.msk.f32.vlgmr.msra.gmra.mrb[2].mxu1 %vm16333_vm5, %v14247_v16  ;;  %vm6620_vm7 = vmand %vm6612_vm8, %vm16335_vm11  ;;  %v5905_v40 = vsel %vm5889_vm12, %v5697_v0, 0.0  ;;  %vm15514_vm12 = vcmask 916480   ;;  %vm5891_vm5 = vcmp.eq.s32.totalorder %v5875_v51, 1  ;;  %vm16341_vm11 = vnez %v16340_v52  ;;  %v5682_v43 = vpop.permute.xlu1 %5681 }
 0x1d3   : > { %6380 = vmatprep.mubr.f32.mxu1 %v15711_v42  ;;  %vm16336_vm1 = vmmov %vm16330_vm2  ;;  %vm5886_vm2 = vcmp.eq.s32.totalorder %v5855_v35, 1  ;;  %v6628_v36 = vsel %vm6620_vm7, 1, %v15633_v30  ;;  %vm6763_vm7 = vcmp.eq.s32.totalorder %v6705_v12, 1  ;;  %v6579_v10 = vsel %vm15514_vm12, %v6548_v5, %v6550_v37 }
 0x1d4   : > { %10871 = vmatprep.subr.msk.mxu0 %vm16336_vm1, %v5905_v40  ;;  %vm16337_vm13 = vmmov %vm16332_vm15  ;;  %vm5890_vm15 = vcmp.eq.s32.totalorder %v5871_v39, 1  ;;  %v6779_v0 = vsel %vm6763_vm7, %v6579_v10, 0.0  ;;  %v6653_v51 = vrot.slane %v6628_v36, %v12066_v1 }
 0x1d5   : > { %v5694_v47 = vsel %vm16337_vm13, %v5672_v14, %v5674_v38  ;;  %vm16338_vm0 = vmmov %vm16337_vm13  ;;  %vm16342_vm13 = vcmask 1043456   ;;  %v6701_v14 = vrot.slane %v6637_v21, %v12066_v1  ;;  %v6546_v21 = vpop.permute.xlu0 %6545 }
 0x1d6   : > { %v5695_v27 = vsel %vm16338_vm0, %v5674_v38, %v5676_v20  ;;  %vm16339_vm8 = vmmov %vm16338_vm0  ;;  %v5902_v55 = vsel %vm5886_vm2, %v5694_v47, 0.0  ;;  %v5698_v56 = vsel %vm16338_vm0, %v5680_v29, %v5682_v43  ;;  %vm16349_vm2 = vnez %v16348_v15  ;;  %v6556_v12 = vpop.permute.xlu1 %6555 }
 0x1d7   : > { %v5696_v11 = vsel %vm16339_vm8, %v5676_v20, %v5678_v9  ;;  %v5903_v22 = vsel %vm5887_vm4, %v5695_v27, 0.0  ;;  %vm6614_vm1 = vmand %vm14136_vm14, %vm16341_vm11  ;;  %v6657_v9 = vrot.slane %v6628_v36, %v12069_v4  ;;  %v6627_v49 = vsel %vm16349_vm2, 1, %v15633_v30 }
 0x1d8   : > { %v5904_v31 = vsel %vm5888_vm10, %v5696_v11, 0.0  ;;  %10868 = vmatprep.subr.msk.mxu1 %vm16342_vm13, %v5903_v22  ;;  %vm16343_vm6 = vmmov %vm16342_vm13  ;;  %vm16345_vm10 = vcmask 31744   ;;  %vm16351_vm13 = vnez %v16350_v19  ;;  %v5906_v38 = vsel %vm5890_vm15, %v5698_v56, 0.0  ;;  %v14452_v11 = vld [vmem:[%s15239_s1 + $0x38] sm:$0xff]  ;;  %v16360_v22 = vld [vmem:[#allocation40_spill] sm:$0xff] }
 0x1d9   : > { %10872 = vmatpush1.msk.msra.mxu0 %vm16343_vm6, %v5904_v31  ;;  %vm16344_vm4 = vmmov %vm16343_vm6  ;;  %v6721_v40 = vrot.slane %v6657_v9, %v12066_v1  ;;  %v6649_v39 = vrot.slane %v6627_v49, %v12069_v4  ;;  %v6645_v47 = vrot.slane %v6627_v49, %v12066_v1  ;;  %v6578_v27 = vsel %vm15514_vm12, %v6546_v21, %v6548_v5  ;;  %v16363_v31 = vld [vmem:[#allocation44_spill] sm:$0xff]  ;;  %v6558_v9 = vpop.permute.xlu0 %6557  ;;  %v16369_v49 = vld [vmem:[#allocation46_spill] sm:$0xff] }
 0x1da   : > { %10869 = vmatpush1.msk.msra.mxu1 %vm16344_vm4, %v5902_v55  ;;  %10873 = vmatmul.mubr.msk.f32.vlgmr.msra.gmra.mrb[6].mxu0 %vm16345_vm10, %v14247_v16  ;;  %vm16346_vm8 = vmmov %vm16338_vm0  ;;  %vm16356_vm0 = vnez %v16247_v13  ;;  %vm16362_vm2 = vcmask 31744   ;;  %v6717_v52 = vrot.slane %v6653_v51, %v12066_v1 }
 0x1db   : > { %v5715_v54 = vsel %vm16346_vm8, %v5682_v43, 0.0  ;;  %vm16347_vm6 = vmmov %vm16345_vm10  ;;  %6911 = vmatprep.mubr.f32.mxu0 %v15711_v42  ;;  %vm16355_vm10 = vnez %v16354_v62  ;;  %v6713_v5 = vrot.slane %v6649_v39, %v12066_v1  ;;  %v6583_v43 = vsel %vm15514_vm12, %v6556_v12, %v6558_v9  ;;  %v16372_v39 = vld [vmem:[#allocation49_spill] sm:$0xff] }
 0x1dc   : > { %10870 = vmatmul.mubr.msk.f32.vlgmr.msra.gmra.mrb[4].mxu1 %vm16347_vm6, %v14247_v16  ;;  %vm14426_vm4 = vmand %vm6614_vm1, %vm16351_vm13  ;;  %v5907_v29 = vsel %vm5891_vm5, %v5715_v54, 0.0  ;;  %vm16357_vm6 = vcmask 1043456   ;;  %vm6762_vm1 = vcmp.eq.s32.totalorder %v6701_v14, 1  ;;  %vm16361_vm5 = vnez %v16360_v22  ;;  %v16367_v54 = vld [vmem:[#allocation45_spill] sm:$0xff] }
 0x1dd   : > { %6522 = vmatprep.mubr.f32.mxu1 %v15711_v42  ;;  %vm6613_vm8 = vmand %vm16356_vm0, %vm16355_vm10  ;;  %10874 = vmatprep.subr.msk.mxu1 %vm16357_vm6, %v5907_v29  ;;  %v6630_v20 = vsel %vm14426_vm4, 1, %v15633_v30  ;;  %v6778_v36 = vsel %vm6762_vm1, %v6578_v27, 0.0  ;;  %vm16364_vm13 = vnez %v16363_v31  ;;  %vm16365_vm4 = vnez %v16274_v61 }
 0x1de   : > { %vm16358_vm11 = vmmov %vm16357_vm6  ;;  %v6673_v55 = vrot.slane %v6630_v20, %v12069_v4  ;;  %v6709_v14 = vrot.slane %v6645_v47, %v12066_v1  ;;  %vm16368_vm1 = vnez %v16367_v54  ;;  %v6669_v35 = vrot.slane %v6630_v20, %v12066_v1  ;;  %v16374_v47 = vld [vmem:[#allocation48_spill] sm:$0xff] }
 0x1df   : > { %10878 = vmatprep.subr.msk.mxu0 %vm16358_vm11, %v6779_v0  ;;  %vm16359_vm15 = vmmov %vm16357_vm6  ;;  %vm6767_vm11 = vcmp.eq.s32.totalorder %v6721_v40, 1  ;;  %v6554_v0 = vpop.permute.xlu0 %6553 }
 0x1e0   : > { %10875 = vmatpush1.msk.msra.mxu1 %vm16359_vm15, %v5906_v38  ;;  %vm6621_vm7 = vmand %vm6613_vm8, %vm16361_vm5  ;;  %10879 = vmatpush1.msk.msra.mxu0 %vm16357_vm6, %v6778_v36  ;;  %v6783_v10 = vsel %vm6767_vm11, %v6583_v43, 0.0  ;;  %vm16370_vm5 = vnez %v16369_v49  ;;  %v6737_v19 = vrot.slane %v6673_v55, %v12066_v1  ;;  %v6582_v21 = vsel %vm15514_vm12, %v6554_v0, %v6556_v12 }
 0x1e1   : > { %10876 = vmatmul.mubr.msk.f32.vlgmr.msra.gmra.mrb[6].mxu1 %vm16362_vm2, %v14247_v16  ;;  %vm6616_vm10 = vmand %vm16365_vm4, %vm16364_vm13  ;;  %v6552_v16 = vpop.permute.xlu1 %6551  ;;  %v6629_v56 = vsel %vm6621_vm7, 1, %v15633_v30  ;;  %vm6764_vm7 = vcmp.eq.s32.totalorder %v6709_v14, 1  ;;  %v6733_v36 = vrot.slane %v6669_v35, %v12066_v1 }
 0x1e2   : > { %6982 = vmatprep.mubr.f32.mxu1 %v15711_v42  ;;  %vm16366_vm8 = vmmov %vm16362_vm2  ;;  %v6665_v15 = vrot.slane %v6629_v56, %v12069_v4  ;;  %v6580_v38 = vsel %vm15514_vm12, %v6550_v37, %v6552_v16  ;;  %v6661_v62 = vrot.slane %v6629_v56, %v12066_v1  ;;  %v6581_v51 = vsel %vm15514_vm12, %v6552_v16, %v6554_v0 }
 0x1e3   : > { %10880 = vmatmul.mubr.msk.f32.vlgmr.msra.gmra.mrb[0].mxu0 %vm16366_vm8, %v14452_v11  ;;  %vm6624_vm15 = vmand %vm6616_vm10, %vm16368_vm1  ;;  %vm6766_vm8 = vcmp.eq.s32.totalorder %v6717_v52, 1  ;;  %vm16373_vm10 = vnez %v16372_v39  ;;  %vm16375_vm1 = vnez %v16374_v47  ;;  %v6780_v12 = vsel %vm6764_vm7, %v6580_v38, 0.0  ;;  %v6566_v14 = vpop.permute.xlu0 %6565 }
 0x1e4   : > { %7053 = vmatprep.mubr.f32.mxu0 %v15711_v42  ;;  %vm6615_vm2 = vmand %vm14253_vm9, %vm16370_vm5  ;;  %v6632_v40 = vsel %vm6624_vm15, 1, %v15633_v30  ;;  %v6782_v27 = vsel %vm6766_vm8, %v6582_v21, 0.0  ;;  %v6729_v22 = vrot.slane %v6665_v15, %v12066_v1  ;;  %vm16378_vm15 = vnez %v16106_v46 }
 0x1e5   : > { %vm16371_vm13 = vmmov %vm16357_vm6  ;;  %vm6765_vm6 = vcmp.eq.s32.totalorder %v6713_v5, 1  ;;  %v6564_v29 = vpop.permute.xlu1 %6563  ;;  %vm6771_vm0 = vcmp.eq.s32.totalorder %v6737_v19, 1  ;;  %v6689_v31 = vrot.slane %v6632_v40, %v12069_v4  ;;  %v16382_v5 = vld [vmem:[#allocation50_spill] sm:$0xff]  ;;  %v6725_v52 = vrot.slane %v6661_v62, %v12066_v1 }
 0x1e6   : > { %10884 = vmatprep.subr.msk.mxu0 %vm16371_vm13, %v6783_v10  ;;  %vm6617_vm11 = vmand %vm14297_vm3, %vm16373_vm10  ;;  %v6781_v20 = vsel %vm6765_vm6, %v6581_v51, 0.0  ;;  %vm16379_vm10 = vnez %v16175_v6  ;;  %vm16380_vm3 = vcmask 1043456   ;;  %vm16383_vm5 = vnez %v16382_v5 }
 0x1e7   : > { %vm14499_vm13 = vmand %vm6615_vm2, %vm16375_vm1  ;;  %10881 = vmatprep.subr.msk.mxu1 %vm16380_vm3, %v6781_v20  ;;  %vm16385_vm8 = vcmask 31744   ;;  %vm16388_vm7 = vnez %v16113_v7  ;;  %v6753_v15 = vrot.slane %v6689_v31, %v12066_v1  ;;  %v6685_v7 = vrot.slane %v6632_v40, %v12066_v1  ;;  %v6562_v49 = vpop.permute.xlu0 %6561 }
 0x1e8   : > { %vm7496_vm12 = vmand %vm16379_vm10, %vm16378_vm15  ;;  %v6631_v43 = vsel %vm14499_vm13, 1, %v15633_v30  ;;  %vm6769_vm13 = vcmp.eq.s32.totalorder %v6729_v22, 1  ;;  %vm16393_vm15 = vnez %v15849_v59  ;;  %vm16394_vm10 = vnez %v16203_v8 }
 0x1e9   : > { %vm16381_vm4 = vmmov %vm16380_vm3  ;;  %v6560_v55 = vpop.permute.xlu1 %6559  ;;  %v6681_v54 = vrot.slane %v6631_v43, %v12069_v4  ;;  %v6677_v19 = vrot.slane %v6631_v43, %v12066_v1 }
 0x1ea   : > { %10885 = vmatpush1.msk.msra.mxu0 %vm16381_vm4, %v6782_v27  ;;  %vm6625_vm2 = vmand %vm6617_vm11, %vm16383_vm5  ;;  %vm6770_vm5 = vcmp.eq.s32.totalorder %v6733_v36, 1 }
 0x1eb   : > { %vm16384_vm6 = vmmov %vm16380_vm3  ;;  %10886 = vmatmul.mubr.msk.f32.vlgmr.msra.gmra.mrb[2].mxu0 %vm16385_vm8, %v14452_v11  ;;  %vm16386_vm3 = vcmask 916480   ;;  %v6633_v10 = vsel %vm6625_vm2, 1, %v15633_v30  ;;  %v6745_v21 = vrot.slane %v6681_v54, %v12066_v1  ;;  %v6741_v37 = vrot.slane %v6677_v19, %v12066_v1  ;;  %v6574_v27 = vpop.permute.xlu0 %6573 }
 0x1ec   : > { %10882 = vmatpush1.msk.msra.mxu1 %vm16384_vm6, %v6780_v12  ;;  %v6587_v16 = vsel %vm16386_vm3, %v6564_v29, %v6566_v14  ;;  %vm16387_vm4 = vmmov %vm16385_vm8  ;;  %7195 = vmatprep.mubr.f32.mxu0 %v15711_v42  ;;  %v6693_v62 = vrot.slane %v6633_v10, %v12066_v1  ;;  %v6697_v40 = vrot.slane %v6633_v10, %v12069_v4 }
 0x1ed   : > { %10883 = vmatmul.mubr.msk.f32.vlgmr.msra.gmra.mrb[0].mxu1 %vm16387_vm4, %v14452_v11  ;;  %vm7504_vm11 = vmand %vm7496_vm12, %vm16388_vm7  ;;  %v6787_v56 = vsel %vm6771_vm0, %v6587_v16, 0.0  ;;  %v6572_v6 = vpop.permute.xlu1 %6571  ;;  %vm6775_vm7 = vcmp.eq.s32.totalorder %v6753_v15, 1 }
 0x1ee   : > { %7124 = vmatprep.mubr.f32.mxu1 %v15711_v42  ;;  %vm16389_vm1 = vmmov %vm16384_vm6  ;;  %vm6768_vm6 = vcmp.eq.s32.totalorder %v6725_v52, 1  ;;  %v7512_v35 = vsel %vm7504_vm11, 1, %v15633_v30  ;;  %v6757_v12 = vrot.slane %v6693_v62, %v12066_v1  ;;  %v6761_v31 = vrot.slane %v6697_v40, %v12066_v1  ;;  %v14641_v40 = vld [vmem:[%s15239_s1 + $0x40] sm:$0xff] }
 0x1ef   : > { %10890 = vmatprep.subr.msk.mxu0 %vm16389_vm1, %v6787_v56  ;;  %vm16390_vm8 = vmmov %vm16386_vm3  ;;  %v7527_v47 = vrot.slane %v7512_v35, %v12069_v4  ;;  %v7523_v5 = vrot.slane %v7512_v35, %v12066_v1  ;;  %v6570_v59 = vpop.permute.xlu0 %6569 }
 0x1f0   : > { %v6584_v46 = vsel %vm16390_vm8, %v6558_v9, %v6560_v55  ;;  %vm16391_vm12 = vmmov %vm16386_vm3 }
 0x1f1   : > { %v6585_v38 = vsel %vm16391_vm12, %v6560_v55, %v6562_v49  ;;  %vm16392_vm0 = vmmov %vm16386_vm3  ;;  %v6784_v9 = vsel %vm6768_vm6, %v6584_v46, 0.0  ;;  %v6568_v20 = vpop.permute.xlu1 %6567  ;;  %v7591_v52 = vrot.slane %v7527_v47, %v12066_v1  ;;  %v7587_v54 = vrot.slane %v7523_v5, %v12066_v1 }
 0x1f2   : > { %v6586_v0 = vsel %vm16392_vm0, %v6562_v49, %v6564_v29  ;;  %v6785_v39 = vsel %vm6769_vm13, %v6585_v38, 0.0  ;;  %vm7498_vm2 = vmand %vm16394_vm10, %vm16393_vm15  ;;  %v6749_v29 = vrot.slane %v6685_v7, %v12066_v1  ;;  %vm16399_vm13 = vnez %v15862_v25 }
 0x1f3   : > { %v6786_v51 = vsel %vm6770_vm5, %v6586_v0, 0.0  ;;  %vm16395_vm3 = vmmov %vm16389_vm1  ;;  %vm16400_vm5 = vnez %v16217_v23  ;;  %vm16405_vm15 = vnez %v16131_v44  ;;  %v7436_v15 = vpop.permute.xlu0 %7435 }
 0x1f4   : > { %10887 = vmatprep.subr.msk.mxu1 %vm16395_vm3, %v6785_v39  ;;  %vm16396_vm4 = vmmov %vm16389_vm1 }
 0x1f5   : > { %10891 = vmatpush1.msk.msra.mxu0 %vm16396_vm4, %v6786_v51  ;;  %vm16397_vm11 = vmmov %vm16389_vm1  ;;  %vm16398_vm1 = vcmask 31744   ;;  %v7434_v8 = vpop.permute.xlu1 %7433 }
 0x1f6   : > { %10888 = vmatpush1.msk.msra.mxu1 %vm16397_vm11, %v6784_v9  ;;  %10892 = vmatmul.mubr.msk.f32.vlgmr.msra.gmra.mrb[4].mxu0 %vm16398_vm1, %v14452_v11  ;;  %vm7497_vm6 = vmand %vm16400_vm5, %vm16399_vm13  ;;  %vm6773_vm11 = vcmp.eq.s32.totalorder %v6745_v21, 1  ;;  %vm16409_vm13 = vcmp.eq.s32.totalorder %v6741_v37, 1  ;;  %vm16410_vm5 = vcmask 1043456  }
 0x1f7   : > { %vm16401_vm8 = vmmov %vm16392_vm0  ;;  %7337 = vmatprep.mubr.f32.mxu0 %v15711_v42  ;;  %vm16403_vm0 = vnez %v16121_v58  ;;  %v7432_v39 = vpop.permute.xlu0 %7431 }
 0x1f8   : > { %v6591_v22 = vsel %vm16401_vm8, %v6572_v6, %v6574_v27  ;;  %vm16402_vm12 = vmmov %vm16398_vm1  ;;  %vm6774_vm1 = vcmp.eq.s32.totalorder %v6749_v29, 1 }
 0x1f9   : > { %10889 = vmatmul.mubr.msk.f32.vlgmr.msra.gmra.mrb[2].mxu1 %vm16402_vm12, %v14452_v11  ;;  %vm7506_vm3 = vmand %vm7498_vm2, %vm16403_vm0  ;;  %v6791_v36 = vsel %vm6775_vm7, %v6591_v22, 0.0  ;;  %vm6776_vm0 = vcmp.eq.s32.totalorder %v6757_v12, 1  ;;  %v6576_v10 = vpop.permute.xlu1 %6575 }
 0x1fa   : > { %7266 = vmatprep.mubr.f32.mxu1 %v15711_v42  ;;  %10896 = vmatprep.subr.msk.mxu0 %vm16396_vm4, %v6791_v36  ;;  %vm16404_vm12 = vmmov %vm16401_vm8  ;;  %v7514_v55 = vsel %vm7506_vm3, 1, %v15633_v30  ;;  %vm7463_vm4 = vcmask 908288   ;;  %vm7649_vm3 = vcmp.eq.s32.totalorder %v7591_v52, 1 }
 0x1fb   : > { %v6588_v58 = vsel %vm16404_vm12, %v6566_v14, %v6568_v20  ;;  %vm7505_vm10 = vmand %vm7497_vm6, %vm16405_vm15  ;;  %vm6777_vm12 = vcmp.eq.s32.totalorder %v6761_v31, 1  ;;  %v7543_v23 = vrot.slane %v7514_v55, %v12069_v4  ;;  %v7539_v28 = vrot.slane %v7514_v55, %v12066_v1 }
 0x1fc   : > { %vm16406_vm2 = vmmov %vm16401_vm8  ;;  %vm16408_vm8 = vnez %v15895_v48  ;;  %v6788_v25 = vsel %vm16409_vm13, %v6588_v58, 0.0  ;;  %v7513_v44 = vsel %vm7505_vm10, 1, %v15633_v30  ;;  %vm16416_vm10 = vnez %v15905_v3 }
 0x1fd   : > { %v6589_v16 = vsel %vm16406_vm2, %v6568_v20, %v6570_v59  ;;  %vm16407_vm7 = vmmov %vm16406_vm2  ;;  %v6609_v46 = vsel %vm16406_vm2, %v6576_v10, 0.0  ;;  %v7531_v0 = vrot.slane %v7513_v44, %v12066_v1  ;;  %v7607_v48 = vrot.slane %v7543_v23, %v12066_v1  ;;  %v7442_v62 = vpop.permute.xlu1 %7441 }
 0x1fe   : > { %v6590_v43 = vsel %vm16407_vm7, %v6570_v59, %v6572_v6  ;;  %v6789_v56 = vsel %vm6773_vm11, %v6589_v16, 0.0  ;;  %vm7500_vm9 = vmand %vm14136_vm14, %vm16408_vm8  ;;  %v7465_v6 = vsel %vm7463_vm4, %v7434_v8, %v7436_v15  ;;  %v6793_v35 = vsel %vm6777_vm12, %v6609_v46, 0.0 }
 0x1ff   : > { %v6790_v14 = vsel %vm6774_vm1, %v6590_v43, 0.0  ;;  %10893 = vmatprep.subr.msk.mxu1 %vm16410_vm5, %v6789_v56  ;;  %vm16411_vm6 = vmmov %vm16410_vm5  ;;  %vm16413_vm1 = vcmask 31744   ;;  %v7665_v38 = vsel %vm7649_vm3, %v7465_v6, 0.0  ;;  %v7535_v3 = vrot.slane %v7513_v44, %v12069_v4 }
 0x200   : > { %10897 = vmatpush1.msk.msra.mxu0 %vm16411_vm6, %v6790_v14  ;;  %vm16412_vm11 = vmmov %vm16410_vm5  ;;  %vm16420_vm14 = vnez %v15897_v34  ;;  %v7464_v21 = vsel %vm7463_vm4, %v7432_v39, %v7434_v8  ;;  %vm16424_vm3 = vnez %v16143_v45  ;;  %v7603_v29 = vrot.slane %v7539_v28, %v12066_v1 }
 0x201   : > { %10894 = vmatpush1.msk.msra.mxu1 %vm16412_vm11, %v6788_v25  ;;  %10898 = vmatmul.mubr.msk.f32.vlgmr.msra.gmra.mrb[6].mxu0 %vm16413_vm1, %v14452_v11  ;;  %vm16414_vm15 = vmmov %vm16406_vm2  ;;  %vm7648_vm11 = vcmp.eq.s32.totalorder %v7587_v54, 1  ;;  %vm7653_vm2 = vcmp.eq.s32.totalorder %v7607_v48, 1  ;;  %v7599_v9 = vrot.slane %v7535_v3, %v12066_v1  ;;  %v7438_v37 = vpop.permute.xlu1 %7437 }
 0x202   : > { %v6592_v7 = vsel %vm16414_vm15, %v6574_v27, %v6576_v10  ;;  %vm16415_vm7 = vmmov %vm16413_vm1  ;;  %7797 = vmatprep.mubr.f32.mxu0 %v15711_v42  ;;  %10899 = vmatprep.subr.msk.mxu1 %vm16410_vm5, %v6793_v35  ;;  %v7664_v34 = vsel %vm7648_vm11, %v7464_v21, 0.0 }
 0x203   : > { %10895 = vmatmul.mubr.msk.f32.vlgmr.msra.gmra.mrb[4].mxu1 %vm16415_vm7, %v14452_v11  ;;  %vm14616_vm13 = vmand %vm7500_vm9, %vm16416_vm10  ;;  %v6792_v19 = vsel %vm6776_vm0, %v6592_v7, 0.0  ;;  %vm16421_vm9 = vnez %v16247_v13  ;;  %v7595_v13 = vrot.slane %v7531_v0, %v12066_v1  ;;  %vm16426_vm10 = vnez %v16147_v17 }
 0x204   : > { %7408 = vmatprep.mubr.f32.mxu1 %v15711_v42  ;;  %vm16419_vm6 = vmmov %vm16410_vm5  ;;  %v7516_v51 = vsel %vm14616_vm13, 1, %v15633_v30  ;;  %vm16427_vm13 = vnez %v16274_v61  ;;  %v7466_v17 = vsel %vm7463_vm4, %v7436_v15, %v7438_v37 }
 0x205   : > { %10903 = vmatprep.subr.msk.mxu0 %vm16419_vm6, %v7665_v38  ;;  %vm7499_vm8 = vmand %vm16421_vm9, %vm16420_vm14  ;;  %v7559_v47 = vrot.slane %v7516_v51, %v12069_v4  ;;  %vm7650_vm6 = vcmp.eq.s32.totalorder %v7595_v13, 1  ;;  %vm7651_vm14 = vcmp.eq.s32.totalorder %v7599_v9, 1  ;;  %vm7652_vm9 = vcmp.eq.s32.totalorder %v7603_v29, 1  ;;  %v7450_v61 = vpop.permute.xlu1 %7449 }
 0x206   : > { %vm16422_vm0 = vmmov %vm16410_vm5  ;;  %v7555_v5 = vrot.slane %v7516_v51, %v12066_v1  ;;  %v7666_v55 = vsel %vm7650_vm6, %v7466_v17, 0.0 }
 0x207   : > { %10900 = vmatpush1.msk.msra.mxu1 %vm16422_vm0, %v6792_v19  ;;  %vm16423_vm12 = vmmov %vm16413_vm1  ;;  %v7623_v22 = vrot.slane %v7559_v47, %v12066_v1 }
 0x208   : > { %10901 = vmatmul.mubr.msk.f32.vlgmr.msra.gmra.mrb[6].mxu1 %vm16423_vm12, %v14452_v11  ;;  %vm7507_vm1 = vmand %vm7499_vm8, %vm16424_vm3  ;;  %v7444_v11 = vpop.permute.xlu0 %7443  ;;  %vm16429_vm8 = vnez %v16153_v50  ;;  %vm16430_vm12 = vnez %v15940_v26  ;;  %vm16431_vm3 = vnez %v16286_v53  ;;  %v7619_v54 = vrot.slane %v7555_v5, %v12066_v1 }
 0x209   : > { %7868 = vmatprep.mubr.f32.mxu1 %v15711_v42  ;;  %vm16425_vm15 = vmmov %vm16422_vm0  ;;  %v7469_v45 = vsel %vm7463_vm4, %v7442_v62, %v7444_v11  ;;  %v7515_v20 = vsel %vm7507_vm1, 1, %v15633_v30  ;;  %v7446_v43 = vpop.permute.xlu1 %7445 }
 0x20a   : > { %10904 = vmatpush1.msk.msra.mxu0 %vm16425_vm15, %v7664_v34  ;;  %vm7502_vm5 = vmand %vm16427_vm13, %vm16426_vm10  ;;  %v7669_v27 = vsel %vm7653_vm2, %v7469_v45, 0.0  ;;  %v7547_v36 = vrot.slane %v7515_v20, %v12066_v1  ;;  %v7551_v31 = vrot.slane %v7515_v20, %v12069_v4  ;;  %vm16434_vm10 = vnez %v15972_v32 }
 0x20b   : > { %10905 = vmatmul.mubr.msk.f32.vlgmr.msra.gmra.mrb[0].mxu0 %vm16415_vm7, %v14641_v40  ;;  %vm16428_vm11 = vmmov %vm16422_vm0  ;;  %vm7657_vm7 = vcmp.eq.s32.totalorder %v7623_v22, 1  ;;  %vm16435_vm13 = vnez %v16303_v41  ;;  %v7470_v26 = vsel %vm7463_vm4, %v7444_v11, %v7446_v43 }
 0x20c   : > { %7939 = vmatprep.mubr.f32.mxu0 %v15711_v42  ;;  %10909 = vmatprep.subr.msk.mxu0 %vm16428_vm11, %v7669_v27  ;;  %vm7510_vm0 = vmand %vm7502_vm5, %vm16429_vm8  ;;  %v7440_v12 = vpop.permute.xlu0 %7439  ;;  %v7611_v16 = vrot.slane %v7547_v36, %v12066_v1  ;;  %v7615_v14 = vrot.slane %v7551_v31, %v12066_v1  ;;  %v14765_v36 = vld [vmem:[%s15240_s2 + $0x8] sm:$0xff] }
 0x20d   : > { %v7467_v52 = vsel %vm7463_vm4, %v7438_v37, %v7440_v12  ;;  %v7468_v58 = vsel %vm7463_vm4, %v7440_v12, %v7442_v62  ;;  %vm7501_vm1 = vmand %vm16431_vm3, %vm16430_vm12  ;;  %v7518_v50 = vsel %vm7510_vm0, 1, %v15633_v30  ;;  %vm16440_vm0 = vnez %v15983_v57 }
 0x20e   : > { %v7667_v8 = vsel %vm7651_vm14, %v7467_v52, 0.0  ;;  %v7668_v59 = vsel %vm7652_vm9, %v7468_v58, 0.0  ;;  %vm16432_vm15 = vmmov %vm16428_vm11  ;;  %vm16437_vm14 = vcmask 31744   ;;  %vm16439_vm9 = vnez %v15949_v18  ;;  %v7458_v18 = vpop.permute.xlu1 %7457  ;;  %v16455_v58 = vld [vmem:[#allocation25_spill] sm:$0xff] }
 0x20f   : > { %10906 = vmatprep.subr.msk.mxu1 %vm16432_vm15, %v7667_v8  ;;  %vm16433_vm2 = vmmov %vm16428_vm11  ;;  %v7575_v44 = vrot.slane %v7518_v50, %v12069_v4  ;;  %vm7656_vm12 = vcmp.eq.s32.totalorder %v7619_v54, 1  ;;  %v7571_v19 = vrot.slane %v7518_v50, %v12066_v1  ;;  %v16461_v54 = vld [vmem:[#allocation30_spill] sm:$0xff] }
 0x210   : > { %10910 = vmatpush1.msk.msra.mxu0 %vm16433_vm2, %v7668_v59  ;;  %vm7503_vm5 = vmand %vm16435_vm13, %vm16434_vm10  ;;  %v7452_v56 = vpop.permute.xlu0 %7451  ;;  %v16456_v59 = vld [vmem:[#allocation26_spill] sm:$0xff] }
 0x211   : > { %vm16436_vm11 = vmmov %vm16433_vm2  ;;  %10911 = vmatmul.mubr.msk.f32.vlgmr.msra.gmra.mrb[2].mxu0 %vm16437_vm14, %v14641_v40  ;;  %v7473_v25 = vsel %vm7463_vm4, %v7450_v61, %v7452_v56  ;;  %v7639_v15 = vrot.slane %v7575_v44, %v12066_v1  ;;  %v7635_v39 = vrot.slane %v7571_v19, %v12066_v1 }
 0x212   : > { %10907 = vmatpush1.msk.msra.mxu1 %vm16436_vm11, %v7666_v55  ;;  %vm16438_vm6 = vmmov %vm16437_vm14  ;;  %8081 = vmatprep.mubr.f32.mxu0 %v15711_v42  ;;  %v7673_v23 = vsel %vm7657_vm7, %v7473_v25, 0.0  ;;  %vm7654_vm11 = vcmp.eq.s32.totalorder %v7611_v16, 1  ;;  %vm7655_vm14 = vcmp.eq.s32.totalorder %v7615_v14, 1  ;;  %v7454_v48 = vpop.permute.xlu1 %7453 }
 0x213   : > { %10908 = vmatmul.mubr.msk.f32.vlgmr.msra.gmra.mrb[0].mxu1 %vm16438_vm6, %v14641_v40  ;;  %vm7509_vm8 = vmand %vm7501_vm1, %vm16439_vm9  ;;  %10915 = vmatprep.subr.msk.mxu0 %vm16433_vm2, %v7673_v23  ;;  %v7670_v35 = vsel %vm7654_vm11, %v7470_v26, 0.0  ;;  %vm7661_vm13 = vcmp.eq.s32.totalorder %v7639_v15, 1  ;;  %v7474_v9 = vsel %vm7463_vm4, %v7452_v56, %v7454_v48  ;;  %v16459_v56 = vld [vmem:[#allocation33_spill] sm:$0xff]  ;;  %v16463_v23 = vld [vmem:[#allocation36_spill] sm:$0xff] }
 0x214   : > { %8010 = vmatprep.mubr.f32.mxu1 %v15711_v42  ;;  %vm7511_vm15 = vmand %vm7503_vm5, %vm16440_vm0  ;;  %v7448_v53 = vpop.permute.xlu0 %7447  ;;  %v7517_v10 = vsel %vm7509_vm8, 1, %v15633_v30  ;;  %vm7660_vm0 = vcmp.eq.s32.totalorder %v7635_v39, 1  ;;  %v14807_v14 = vsub.s32 4, %v16459_v56  ;;  %v14817_v44 = vsub.s32 0, %v16459_v56 }
 0x215   : > { %v7519_v57 = vsel %vm7511_vm15, 1, %v15633_v30  ;;  %v7471_v41 = vsel %vm7463_vm4, %v7446_v43, %v7448_v53  ;;  %v7472_v32 = vsel %vm7463_vm4, %v7448_v53, %v7450_v61  ;;  %v7567_v49 = vrot.slane %v7517_v10, %v12069_v4  ;;  %vm16441_vm3 = vmmov %vm16433_vm2  ;;  %v16458_v43 = vld [vmem:[#allocation28_spill] sm:$0xff]  ;;  %v16465_v53 = vld [vmem:[#allocation41_spill] sm:$0xff] }
 0x216   : > { %v7583_v7 = vrot.slane %v7519_v57, %v12069_v4  ;;  %v7671_v46 = vsel %vm7655_vm14, %v7471_v41, 0.0  ;;  %v7672_v6 = vsel %vm7656_vm12, %v7472_v32, 0.0  ;;  %vm16442_vm1 = vmmov %vm16433_vm2  ;;  %v7563_v38 = vrot.slane %v7517_v10, %v12066_v1  ;;  %v7462_v13 = vpop.permute.xlu1 %7461 }
 0x217   : > { %10912 = vmatprep.subr.msk.mxu1 %vm16441_vm3, %v7671_v46  ;;  %10916 = vmatpush1.msk.msra.mxu0 %vm16442_vm1, %v7672_v6  ;;  %vm16443_vm7 = vmmov %vm16442_vm1  ;;  %v7579_v0 = vrot.slane %v7519_v57, %v12066_v1  ;;  %v7631_v62 = vrot.slane %v7567_v49, %v12066_v1  ;;  %v7495_v29 = vsel %vm7463_vm4, %v7462_v13, 0.0  ;;  %v16470_v46 = vld [vmem:[#allocation15_spill] sm:$0xff] }
 0x218   : > { %10913 = vmatpush1.msk.msra.mxu1 %vm16443_vm7, %v7670_v35  ;;  %vm16444_vm10 = vmmov %vm16438_vm6  ;;  %v7460_v4 = vpop.permute.xlu0 %7459  ;;  %v7647_v28 = vrot.slane %v7583_v7, %v12066_v1  ;;  %v7627_v51 = vrot.slane %v7563_v38, %v12066_v1  ;;  %v16471_v38 = vld [vmem:[#allocation47_spill] sm:$0xff] }
 0x219   : > { %10917 = vmatmul.mubr.msk.f32.vlgmr.msra.gmra.mrb[4].mxu0 %vm16444_vm10, %v14641_v40  ;;  %vm16445_vm5 = vmmov %vm16438_vm6  ;;  %v7477_v3 = vsel %vm7463_vm4, %v7458_v18, %v7460_v4  ;;  %v7643_v34 = vrot.slane %v7579_v0, %v12066_v1  ;;  %vm7659_vm8 = vcmp.eq.s32.totalorder %v7631_v62, 1  ;;  %v7478_v45 = vsel %vm7463_vm4, %v7460_v4, %v7462_v13 }
 0x21a   : > { %10914 = vmatmul.mubr.msk.f32.vlgmr.msra.gmra.mrb[2].mxu1 %vm16445_vm5, %v14641_v40  ;;  %8223 = vmatprep.mubr.f32.mxu0 %v15711_v42  ;;  %v7677_v21 = vsel %vm7661_vm13, %v7477_v3, 0.0  ;;  %vm16446_vm6 = vmmov %vm16442_vm1  ;;  %vm7663_vm9 = vcmp.eq.s32.totalorder %v7647_v28, 1  ;;  %vm7658_vm15 = vcmp.eq.s32.totalorder %v7627_v51, 1  ;;  %vm8481_vm13 = vcmask 64512  }
 0x21b   : > { %8152 = vmatprep.mubr.f32.mxu1 %v15711_v42  ;;  %10921 = vmatprep.subr.msk.mxu0 %vm16446_vm6, %v7677_v21  ;;  %vm7662_vm2 = vcmp.eq.s32.totalorder %v7643_v34, 1  ;;  %v7679_v20 = vsel %vm7663_vm9, %v7495_v29, 0.0  ;;  %v7674_v22 = vsel %vm7658_vm15, %v7474_v9, 0.0  ;;  %vm16447_vm11 = vmmov %vm16442_vm1  ;;  %vm16457_vm9 = vcmp.ge.s32.totalorder %v16455_v58, 0 }
 0x21c   : > { %v7456_v47 = vpop.permute.xlu0 %7455  ;;  %vm16448_vm14 = vmmov %vm16442_vm1  ;;  %v7678_v17 = vsel %vm7662_vm2, %v7478_v45, 0.0  ;;  %vm16460_vm15 = vcmp.ge.s32.totalorder %v16456_v59, 0 }
 0x21d   : > { %v7475_v37 = vsel %vm7463_vm4, %v7454_v48, %v7456_v47  ;;  %v7476_v11 = vsel %vm7463_vm4, %v7456_v47, %v7458_v18  ;;  %vm16449_vm12 = vmmov %vm16442_vm1 }
 0x21e   : > { %v7675_v27 = vsel %vm7659_vm8, %v7475_v37, 0.0  ;;  %v7676_v1 = vsel %vm7660_vm0, %v7476_v11, 0.0  ;;  %vm16450_vm3 = vmmov %vm16445_vm5  ;;  %vm8318_vm5 = vcmp.lt.s32.totalorder %v16455_v58, 8  ;;  %vm8320_vm0 = vcmp.lt.s32.totalorder %v16458_v43, 8  ;;  %v16478_v37 = vld [vmem:[#allocation19_spill] sm:$0xff] }
 0x21f   : > { %10918 = vmatprep.subr.msk.mxu1 %vm16447_vm11, %v7675_v27  ;;  %10922 = vmatpush1.msk.msra.mxu0 %vm16448_vm14, %v7676_v1  ;;  %vm16451_vm1 = vmmov %vm16450_vm3  ;;  %vm8319_vm11 = vcmp.lt.s32.totalorder %v16461_v54, 8  ;;  %vm16462_vm14 = vcmp.ge.s32.totalorder %v16458_v43, 0 }
 0x220   : > { %10919 = vmatpush1.msk.msra.mxu1 %vm16449_vm12, %v7674_v22  ;;  %10923 = vmatmul.mubr.msk.f32.vlgmr.msra.gmra.mrb[6].mxu0 %vm16450_vm3, %v14641_v40  ;;  %vm16452_vm7 = vmmov %vm16446_vm6  ;;  %vm8322_vm3 = vcmp.lt.s32.totalorder %v16463_v23, 8  ;;  %v14916_v22 = vld [vmem:[%s15240_s2] sm:$0xff] }
 0x221   : > { %10920 = vmatmul.mubr.msk.f32.vlgmr.msra.gmra.mrb[4].mxu1 %vm16451_vm1, %v14641_v40  ;;  %10924 = vmatprep.subr.msk.mxu1 %vm16452_vm7, %v7679_v20  ;;  %vm16453_vm4 = vmmov %vm16446_vm6  ;;  %vm8317_vm6 = vcmp.lt.s32.totalorder %v16456_v59, 8 }
 0x222   : > { %10925 = vmatpush1.msk.msra.mxu1 %vm16453_vm4, %v7678_v17  ;;  %8294 = vmatprep.mubr.f32.mxu1 %v15711_v42  ;;  %vm16454_vm10 = vmmov %vm16451_vm1  ;;  %vm16464_vm1 = vcmp.ge.s32.totalorder %v16461_v54, 0  ;;  %vm8321_vm4 = vcmp.lt.s32.totalorder %v16465_v53, 8 }
 0x223   : > { %8549 = vmatprep.mubr.f32.mxu0 %v15711_v42  ;;  %vm8325_vm8 = vmand %vm16457_vm9, %vm8318_vm5 }
 0x224   : > { %vm8324_vm2 = vmand %vm16460_vm15, %vm8317_vm6  ;;  %v8332_v25 = vsel %vm8325_vm8, 1, %v15633_v30  ;;  %vm16467_vm6 = vcmp.ge.s32.totalorder %v16465_v53, 0  ;;  %vm9624_vm8 = vcmp.lt.s32.totalorder %v16470_v46, 8  ;;  %vm16472_vm15 = vcmp.ge.s32.totalorder %v16470_v46, 0 }
 0x225   : > { %10926 = vmatmul.mubr.msk.f32.vlgmr.msra.gmra.mrb[6].mxu1 %vm16454_vm10, %v14641_v40  ;;  %vm8327_vm12 = vmand %vm16462_vm14, %vm8320_vm0  ;;  %v8331_v18 = vsel %vm8324_vm2, 1, %v15633_v30  ;;  %v8353_v26 = vrot.slane %v8332_v25, %v14807_v14  ;;  %v8349_v10 = vrot.slane %v8332_v25, %v14817_v44  ;;  %vm16466_vm10 = vcmp.ge.s32.totalorder %v16463_v23, 0 }
 0x226   : > { %8620 = vmatprep.mubr.f32.mxu1 %v15711_v42  ;;  %vm8326_vm7 = vmand %vm16464_vm1, %vm8319_vm11  ;;  %v8334_v15 = vsel %vm8327_vm12, 1, %v15633_v30  ;;  %v8345_v57 = vrot.slane %v8331_v18, %v14807_v14  ;;  %v8341_v32 = vrot.slane %v8331_v18, %v14817_v44  ;;  %vm8323_vm0 = vcmp.lt.s32.totalorder %v16471_v38, 8 }
 0x227   : > { %vm8329_vm5 = vmand %vm16466_vm10, %vm8322_vm3  ;;  %v8333_v41 = vsel %vm8326_vm7, 1, %v15633_v30  ;;  %v8409_v49 = vrot.slane %v8353_v26, %v14817_v44  ;;  %v8369_v19 = vrot.slane %v8334_v15, %v14807_v14  ;;  %v8405_v4 = vrot.slane %v8349_v10, %v14817_v44 }
 0x228   : > { %vm14840_vm9 = vmand %vm16467_vm6, %vm8321_vm4  ;;  %v14850_v35 = vsel %vm8329_vm5, 1, %v15633_v30  ;;  %v8361_v3 = vrot.slane %v8333_v41, %v14807_v14  ;;  %v8401_v62 = vrot.slane %v8345_v57, %v14817_v44  ;;  %v8365_v39 = vrot.slane %v8334_v15, %v14817_v44 }
 0x229   : > { %v8357_v51 = vrot.slane %v8333_v41, %v14817_v44  ;;  %v14868_v21 = vsel %vm14840_vm9, 1, %v15633_v30  ;;  %vm14874_vm2 = vmand %vm16472_vm15, %vm9624_vm8  ;;  %v8397_v13 = vrot.slane %v8341_v32, %v14817_v44  ;;  %v8385_v9 = vrot.slane %v14850_v35, %v14807_v14 }
 0x22a   : > { %vm16475_vm11 = vcmp.ge.s32.totalorder %v16471_v38, 0  ;;  %vm9626_vm12 = vcmp.lt.s32.totalorder %v16199_v2, 8  ;;  %vm8453_vm3 = vcmp.eq.s32.totalorder %v8409_v49, 1  ;;  %v8425_v47 = vrot.slane %v8369_v19, %v14817_v44 }
 0x22b   : > { %vm14887_vm14 = vmand %vm16475_vm11, %vm8323_vm0  ;;  %vm9625_vm1 = vcmp.lt.s32.totalorder %v16478_v37, 8  ;;  %vm8452_vm7 = vcmp.eq.s32.totalorder %v8405_v4, 1  ;;  %v8417_v45 = vrot.slane %v8361_v3, %v14817_v44  ;;  %v8377_v20 = vrot.slane %v14868_v21, %v14807_v14 }
 0x22c   : > { %v9638_v27 = vsel %vm14874_vm2, 1, %v15633_v30  ;;  %vm11447_vm4 = vmmov 0   ;;  %vm8451_vm10 = vcmp.eq.s32.totalorder %v8401_v62, 1  ;;  %v8421_v17 = vrot.slane %v8365_v39, %v14817_v44 }
 0x22d   : > { %v8413_v58 = vrot.slane %v8357_v51, %v14817_v44  ;;  %v8337_v59 = vsel %vm14887_vm14, 1, %v15633_v30  ;;  %vm16479_vm5 = vcmp.ge.s32.totalorder %v16199_v2, 0  ;;  %vm8450_vm9 = vcmp.eq.s32.totalorder %v8397_v13, 1 }
 0x22e   : > { %vm14927_vm6 = vmand %vm16479_vm5, %vm9626_vm12  ;;  %v8381_v56 = vrot.slane %v14850_v35, %v14817_v44  ;;  %v8441_v54 = vrot.slane %v8385_v9, %v14817_v44  ;;  %vm16482_vm8 = vcmp.ge.s32.totalorder %v16478_v37, 0  ;;  %vm9628_vm15 = vcmp.lt.s32.totalorder %v16230_v33, 8 }
 0x22f   : > { %vm14941_vm0 = vmand %vm16482_vm8, %vm9625_vm1  ;;  %vm8457_vm2 = vcmp.eq.s32.totalorder %v8425_v47, 1  ;;  %v8373_v25 = vrot.slane %v14868_v21, %v14817_v44  ;;  %v9652_v23 = vrot.slane %v9638_v27, %v14807_v14  ;;  %vm9627_vm11 = vcmp.lt.s32.totalorder %v16243_v63, 8 }
 0x230   : > { %vm8455_vm14 = vcmp.eq.s32.totalorder %v8417_v45, 1  ;;  %v8433_v18 = vrot.slane %v8377_v20, %v14817_v44  ;;  %v8393_v26 = vrot.slane %v8337_v59, %v14807_v14  ;;  %v9640_v53 = vsel %vm14927_vm6, 1, %v15633_v30  ;;  %v10958_v20 = vld [vmem:[%s15240_s2 + $0x10] sm:$0xff] }
 0x231   : > { %vm8456_vm12 = vcmp.eq.s32.totalorder %v8421_v17, 1  ;;  %v9648_v10 = vrot.slane %v9638_v27, %v14817_v44  ;;  %vm16485_vm1 = vcmp.ge.s32.totalorder %v16230_v33, 0  ;;  %v8389_v57 = vrot.slane %v8337_v59, %v14817_v44 }
 0x232   : > { %vm14973_vm5 = vmand %vm16485_vm1, %vm9628_vm15  ;;  %vm9630_vm8 = vcmp.lt.s32.totalorder %v16270_v60, 8  ;;  %v9708_v41 = vrot.slane %v9652_v23, %v14817_v44  ;;  %v9668_v32 = vrot.slane %v9640_v53, %v14807_v14  ;;  %vm16491_vm15 = vcmp.ge.s32.totalorder %v16270_v60, 0 }
 0x233   : > { %v9642_v46 = vsel %vm14973_vm5, 1, %v15633_v30  ;;  %v9704_v49 = vrot.slane %v9648_v10, %v14817_v44  ;;  %v8445_v38 = vrot.slane %v8389_v57, %v14817_v44  ;;  %v9664_v4 = vrot.slane %v9640_v53, %v14817_v44 }
 0x234   : > { %vm9758_vm1 = vcmp.eq.s32.totalorder %v9708_v41, 1  ;;  %v9724_v62 = vrot.slane %v9668_v32, %v14817_v44  ;;  %v9684_v39 = vrot.slane %v9642_v46, %v14807_v14  ;;  %v9680_v29 = vrot.slane %v9642_v46, %v14817_v44 }
 0x235   : > { %v9720_v13 = vrot.slane %v9664_v4, %v14817_v44 }
 0x236   : > { %v9740_v47 = vrot.slane %v9684_v39, %v14817_v44  ;;  %v9736_v27 = vrot.slane %v9680_v29, %v14817_v44 }
 0x2de   : > { %v14758_v61 = vpop.f32.mrb[0].mxu0 }
 0x2df   : > { %v14760_v12 = vpop.f32.mrb[1].mxu0 }
 0x2e0   : > { %8485 = vmatprep.subr.mxu0 %v14760_v12 }
 0x2e1   : > { %8486 = vmatpush1.msra.mxu0 %v14758_v61 }
 0x2e2   : > { %10928 = vmatmul.mubr.msk.f32.vlgmr.msra.gmra.mrb[8].mxu0 %vm8481_vm13, %v14765_v36 }
 0x2e3   : > { %8691 = vmatprep.mubr.f32.mxu0 %v15711_v42 }
 0x2e4   : > { %v14772_v40 = vpop.f32.mrb[2].mxu0 }
 0x2e5   : > { %v14776_v5 = vpop.f32.mrb[3].mxu0 }
 0x2e6   : > { %v14774_v31 = vpop.f32.mrb[0].mxu1  ;;  %8627 = vmatprep.subr.mxu0 %v14776_v5 }
 0x2e7   : > { %v14778_v52 = vpop.f32.mrb[1].mxu1  ;;  %8628 = vmatpush1.msra.mxu0 %v14772_v40 }
 0x2e8   : > { %8556 = vmatprep.subr.mxu1 %v14778_v52  ;;  %10930 = vmatmul.mubr.msk.f32.vlgmr.msra.gmra.mrb[10].mxu0 %vm8481_vm13, %v14765_v36 }
 0x2e9   : > { %8557 = vmatpush1.msra.mxu1 %v14774_v31  ;;  %8833 = vmatprep.mubr.f32.mxu0 %v15711_v42 }
 0x2ea   : > { %10929 = vmatmul.mubr.msk.f32.vlgmr.msra.gmra.mrb[8].mxu1 %vm8481_vm13, %v14765_v36 }
 0x2eb   : > { %8762 = vmatprep.mubr.f32.mxu1 %v15711_v42 }
 0x2ec   : > { %v14791_v8 = vpop.f32.mrb[4].mxu0 }
 0x2ed   : > { %v14794_v50 = vpop.f32.mrb[2].mxu1  ;;  %v14796_v55 = vpop.f32.mrb[5].mxu0 }
 0x2ee   : > { %v14800_v16 = vpop.f32.mrb[3].mxu1  ;;  %8769 = vmatprep.subr.mxu0 %v14796_v55 }
 0x2ef   : > { %8698 = vmatprep.subr.mxu1 %v14800_v16  ;;  %8770 = vmatpush1.msra.mxu0 %v14791_v8 }
 0x2f0   : > { %8699 = vmatpush1.msra.mxu1 %v14794_v50  ;;  %10932 = vmatmul.mubr.msk.f32.vlgmr.msra.gmra.mrb[12].mxu0 %vm8481_vm13, %v14765_v36 }
 0x2f1   : > { %10931 = vmatmul.mubr.msk.f32.vlgmr.msra.gmra.mrb[10].mxu1 %vm8481_vm13, %v14765_v36  ;;  %8975 = vmatprep.mubr.f32.mxu0 %v15711_v42 }
 0x2f2   : > { %8904 = vmatprep.mubr.f32.mxu1 %v15711_v42 }
 0x2f3   : > { %v14845_v6 = vpop.f32.mrb[6].mxu0 }
 0x2f4   : > { %v14853_v0 = vpop.f32.mrb[4].mxu1  ;;  %v14855_v48 = vpop.f32.mrb[7].mxu0 }
 0x2f5   : > { %v14859_v28 = vpop.f32.mrb[5].mxu1  ;;  %8911 = vmatprep.subr.mxu0 %v14855_v48 }
 0x2f6   : > { %8840 = vmatprep.subr.mxu1 %v14859_v28  ;;  %8912 = vmatpush1.msra.mxu0 %v14845_v6 }
 0x2f7   : > { %8841 = vmatpush1.msra.mxu1 %v14853_v0  ;;  %10934 = vmatmul.mubr.msk.f32.vlgmr.msra.gmra.mrb[14].mxu0 %vm8481_vm13, %v14765_v36 }
 0x2f8   : > { %10999 = vmatprep.subr.mxu0 %v15711_v42  ;;  %v14898_v11 = vpop.f32.mrb[6].mxu1  ;;  %10933 = vmatmul.mubr.msk.f32.vlgmr.msra.gmra.mrb[12].mxu1 %vm8481_vm13, %v14765_v36 }
 0x2f9   : > { %11000 = vmatpush3.msra.mxu0 %v15711_v42  ;;  %v14909_v1 = vpop.f32.mrb[7].mxu1  ;;  %11001 = vmatprep.mubr.msk.f32.mxu0 %vm11447_vm4, %v15711_v42 }
 0x2fa   : > { %10940 = vmatprep.subr.msk.mxu0 %vm8453_vm3, %v14778_v52  ;;  %8982 = vmatprep.subr.mxu1 %v14909_v1  ;;  %vm8454_vm3 = vcmp.eq.s32.totalorder %v8413_v58, 1 }
 0x2fb   : > { %8983 = vmatpush1.msra.mxu1 %v14898_v11  ;;  %9046 = vmatprep.mubr.f32.mxu1 %v15711_v42 }
 0x2fc   : > { %11002 = vmatmul.mubr.msk.f32.vlgmr.msra.gmra.mrb[16].mxu0 %vm8481_vm13, %v14916_v22  ;;  %10935 = vmatmul.mubr.msk.f32.vlgmr.msra.gmra.mrb[14].mxu1 %vm8481_vm13, %v14765_v36  ;;  %v9639_v36 = vsel %vm14941_vm0, 1, %v15633_v30  ;;  %vm8459_vm0 = vcmp.eq.s32.totalorder %v8433_v18, 1 }
 0x2fd   : > { %10941 = vmatpush1.msk.msra.mxu0 %vm8452_vm7, %v14774_v31  ;;  %10937 = vmatprep.subr.msk.mxu1 %vm8451_vm10, %v14760_v12  ;;  %vm8461_vm7 = vcmp.eq.s32.totalorder %v8441_v54, 1  ;;  %v8437_v12 = vrot.slane %v8381_v56, %v14817_v44  ;;  %vm16488_vm10 = vcmp.ge.s32.totalorder %v16243_v63, 0  ;;  %v8449_v63 = vrot.slane %v8393_v26, %v14817_v44 }
 0x2fe   : > { %10946 = vmatprep.subr.msk.mxu0 %vm8457_vm2, %v14800_v16  ;;  %10938 = vmatpush1.msk.msra.mxu1 %vm8450_vm9, %v14758_v61  ;;  %vm14987_vm6 = vmand %vm16488_vm10, %vm9627_vm11  ;;  %v8429_v61 = vrot.slane %v8373_v25, %v14817_v44  ;;  %vm9629_vm9 = vcmp.lt.s32.totalorder %v16282_v24, 8  ;;  %v9660_v7 = vrot.slane %v9639_v36, %v14807_v14  ;;  %v9656_v3 = vrot.slane %v9639_v36, %v14817_v44 }
 0x2ff   : > { %9262 = vmatprep.mubr.f32.mxu0 %v15711_v42  ;;  %10943 = vmatprep.subr.msk.mxu1 %vm8455_vm14, %v14776_v5  ;;  %v9641_v19 = vsel %vm14987_vm6, 1, %v15633_v30  ;;  %vm15019_vm2 = vmand %vm16491_vm15, %vm9630_vm8  ;;  %vm8460_vm11 = vcmp.eq.s32.totalorder %v8437_v12, 1  ;;  %vm16494_vm14 = vcmp.ge.s32.totalorder %v16282_v24, 0  ;;  %vm8463_vm5 = vcmp.eq.s32.totalorder %v8449_v63, 1 }
 0x300   : > { %9191 = vmatprep.mubr.f32.mxu1 %v15711_v42  ;;  %10942 = vmatmul.mubr.msk.f32.vlgmr.msra.gmra.mrb[10].mxu0 %vm8481_vm13, %v14916_v22  ;;  %v9716_v24 = vrot.slane %v9660_v7, %v14817_v44  ;;  %v9676_v51 = vrot.slane %v9641_v19, %v14807_v14  ;;  %v9644_v21 = vsel %vm15019_vm2, 1, %v15633_v30  ;;  %vm8462_vm10 = vcmp.eq.s32.totalorder %v8445_v38, 1 }
 0x301   : > { %10947 = vmatpush1.msk.msra.mxu0 %vm8456_vm12, %v14794_v50  ;;  %10939 = vmatmul.mubr.msk.f32.vlgmr.msra.gmra.mrb[8].mxu1 %vm8481_vm13, %v14916_v22  ;;  %vm15034_vm12 = vmand %vm16494_vm14, %vm9629_vm9  ;;  %v9712_v9 = vrot.slane %v9656_v3, %v14817_v44  ;;  %vm9762_vm6 = vcmp.eq.s32.totalorder %v9724_v62, 1  ;;  %v9700_v37 = vrot.slane %v9644_v21, %v14807_v14  ;;  %vm9761_vm9 = vcmp.eq.s32.totalorder %v9720_v13, 1 }
 0x302   : > { %10944 = vmatpush1.msk.msra.mxu1 %vm8454_vm3, %v14772_v40  ;;  %10952 = vmatprep.subr.msk.mxu0 %vm8461_vm7, %v14859_v28  ;;  %vm8458_vm3 = vcmp.eq.s32.totalorder %v8429_v61, 1  ;;  %vm9757_vm7 = vcmp.eq.s32.totalorder %v9704_v49, 1  ;;  %v9643_v34 = vsel %vm15034_vm12, 1, %v15633_v30  ;;  %v9672_v30 = vrot.slane %v9641_v19, %v14817_v44 }
 0x303   : > { %10949 = vmatprep.subr.msk.mxu1 %vm8459_vm0, %v14796_v55  ;;  %9404 = vmatprep.mubr.f32.mxu0 %v15711_v42  ;;  %vm9760_vm8 = vcmp.eq.s32.totalorder %v9716_v24, 1  ;;  %v9692_v45 = vrot.slane %v9643_v34, %v14807_v14  ;;  %vm9759_vm0 = vcmp.eq.s32.totalorder %v9712_v9, 1  ;;  %v9696_v14 = vrot.slane %v9644_v21, %v14817_v44 }
 0x304   : > { %9333 = vmatprep.mubr.f32.mxu1 %v15711_v42  ;;  %10948 = vmatmul.mubr.msk.f32.vlgmr.msra.gmra.mrb[12].mxu0 %vm8481_vm13, %v14916_v22  ;;  %vm9766_vm15 = vcmp.eq.s32.totalorder %v9740_v47, 1  ;;  %v9756_v17 = vrot.slane %v9700_v37, %v14817_v44  ;;  %v9688_v58 = vrot.slane %v9643_v34, %v14817_v44 }
 0x305   : > { %10953 = vmatpush1.msk.msra.mxu0 %vm8460_vm11, %v14853_v0  ;;  %10945 = vmatmul.mubr.msk.f32.vlgmr.msra.gmra.mrb[10].mxu1 %vm8481_vm13, %v14916_v22  ;;  %vm9765_vm11 = vcmp.eq.s32.totalorder %v9736_v27, 1 }
 0x306   : > { %10950 = vmatpush1.msk.msra.mxu1 %vm8458_vm3, %v14791_v8  ;;  %10959 = vmatprep.subr.msk.mxu0 %vm9758_vm1, %v14778_v52  ;;  %v9732_v52 = vrot.slane %v9676_v51, %v14817_v44  ;;  %vm9770_vm12 = vcmp.eq.s32.totalorder %v9756_v17, 1  ;;  %v9744_v59 = vrot.slane %v9688_v58, %v14817_v44 }
 0x307   : > { %10955 = vmatprep.subr.msk.mxu1 %vm8463_vm5, %v14855_v48  ;;  %9546 = vmatprep.mubr.f32.mxu0 %v15711_v42 }
 0x308   : > { %9475 = vmatprep.mubr.f32.mxu1 %v15711_v42  ;;  %10954 = vmatmul.mubr.msk.f32.vlgmr.msra.gmra.mrb[14].mxu0 %vm8481_vm13, %v14916_v22  ;;  %vm9764_vm2 = vcmp.eq.s32.totalorder %v9732_v52, 1  ;;  %vm9767_vm5 = vcmp.eq.s32.totalorder %v9744_v59, 1 }
 0x309   : > { %10960 = vmatpush1.msk.msra.mxu0 %vm9757_vm7, %v14774_v31  ;;  %10951 = vmatmul.mubr.msk.f32.vlgmr.msra.gmra.mrb[12].mxu1 %vm8481_vm13, %v14916_v22  ;;  %v9728_v31 = vrot.slane %v9672_v30, %v14817_v44 }
 0x30a   : > { %10956 = vmatpush1.msk.msra.mxu1 %vm8462_vm10, %v14845_v6  ;;  %10965 = vmatprep.subr.msk.mxu0 %vm9762_vm6, %v14800_v16  ;;  %v9748_v16 = vrot.slane %v9692_v45, %v14817_v44 }
 0x30b   : > { %10962 = vmatprep.subr.msk.mxu1 %vm9760_vm8, %v14776_v5  ;;  %9854 = vmatprep.mubr.f32.mxu0 %v15711_v42  ;;  %v9752_v5 = vrot.slane %v9696_v14, %v14817_v44  ;;  %vm9763_vm14 = vcmp.eq.s32.totalorder %v9728_v31, 1 }
 0x30c   : > { %9617 = vmatprep.mubr.f32.mxu1 %v15711_v42  ;;  %10961 = vmatmul.mubr.msk.f32.vlgmr.msra.gmra.mrb[18].mxu0 %vm8481_vm13, %v10958_v20  ;;  %vm9768_vm3 = vcmp.eq.s32.totalorder %v9748_v16, 1 }
 0x30d   : > { %10966 = vmatpush1.msk.msra.mxu0 %vm9761_vm9, %v14794_v50  ;;  %10957 = vmatmul.mubr.msk.f32.vlgmr.msra.gmra.mrb[14].mxu1 %vm8481_vm13, %v14916_v22  ;;  %vm9769_vm1 = vcmp.eq.s32.totalorder %v9752_v5, 1 }
 0x30e   : > { %10963 = vmatpush1.msk.msra.mxu1 %vm9759_vm0, %v14772_v40  ;;  %10971 = vmatprep.subr.msk.mxu0 %vm9766_vm15, %v14859_v28 }
 0x30f   : > { %10968 = vmatprep.subr.msk.mxu1 %vm9764_vm2, %v14796_v55  ;;  %9996 = vmatprep.mubr.f32.mxu0 %v15711_v42 }
 0x310   : > { %9925 = vmatprep.mubr.f32.mxu1 %v15711_v42  ;;  %10967 = vmatmul.mubr.msk.f32.vlgmr.msra.gmra.mrb[10].mxu0 %vm8481_vm13, %v10958_v20 }
 0x311   : > { %10972 = vmatpush1.msk.msra.mxu0 %vm9765_vm11, %v14853_v0  ;;  %10964 = vmatmul.mubr.msk.f32.vlgmr.msra.gmra.mrb[8].mxu1 %vm8481_vm13, %v10958_v20 }
 0x312   : > { %10969 = vmatpush1.msk.msra.mxu1 %vm9763_vm14, %v14791_v8  ;;  %10977 = vmatprep.subr.msk.mxu0 %vm9770_vm12, %v14909_v1 }
 0x313   : > { %10974 = vmatprep.subr.msk.mxu1 %vm9768_vm3, %v14855_v48  ;;  %10138 = vmatprep.mubr.f32.mxu0 %v15711_v42 }
 0x314   : > { %10067 = vmatprep.mubr.f32.mxu1 %v15711_v42  ;;  %10973 = vmatmul.mubr.msk.f32.vlgmr.msra.gmra.mrb[12].mxu0 %vm8481_vm13, %v10958_v20 }
 0x315   : > { %10978 = vmatpush1.msk.msra.mxu0 %vm9769_vm1, %v14898_v11  ;;  %10970 = vmatmul.mubr.msk.f32.vlgmr.msra.gmra.mrb[10].mxu1 %vm8481_vm13, %v10958_v20 }
 0x316   : > { %10975 = vmatpush1.msk.msra.mxu1 %vm9767_vm5, %v14845_v6  ;;  %10280 = vmatprep.mubr.f32.mxu0 %v15711_v42 }
 0x317   : > { %10209 = vmatprep.mubr.f32.mxu1 %v15711_v42  ;;  %11004 = vmatprep.subr.mxu1 %v15711_v42 }
 0x318   : > { %10979 = vmatmul.mubr.msk.f32.vlgmr.msra.gmra.mrb[14].mxu0 %vm8481_vm13, %v10958_v20 }
 0x319   : > { %10976 = vmatmul.mubr.msk.f32.vlgmr.msra.gmra.mrb[12].mxu1 %vm8481_vm13, %v10958_v20 }
 0x31a   : > { %11005 = vmatpush3.msra.mxu1 %v15711_v42  ;;  %11006 = vmatprep.mubr.msk.f32.mxu1 %vm11447_vm4, %v15711_v42 }
 0x31d   : > { %11007 = vmatmul.mubr.msk.f32.vlgmr.msra.gmra.mrb[16].mxu1 %vm8481_vm13, %v10958_v20  ;;  %vm16497_vm13 = vcmask 7168  }
 0x31e   : > { %vm16498_vm4 = vmmov %vm16497_vm13 }
 0x3b5   : > { %v8551_v40 = vpop.f32.mrb[8].mxu0 }
 0x3b6   : > { %v8553_v8 = vpop.f32.mrb[9].mxu0 }
 0x3cf   : > { %v9122_v50 = vpop.f32.mrb[16].mxu0 }
 0x3d0   : > { %v9123_v55 = vadd.f32 %v9122_v50, %v8551_v40  ;;  %v11003_v44 = vpop.f32.mrb[17].mxu0 }
 0x3df   : > { %v9856_v6 = vpop.f32.mrb[18].mxu0 }
 0x3e0   : > { %v10358_v0 = vadd.f32 %v9856_v6, %v9123_v55  ;;  %v9619_v48 = vpop.f32.mrb[14].mxu1  ;;  %v9858_v28 = vpop.f32.mrb[19].mxu0 }
 0x3e1   : > { %v10359_v11 = vadd.f32 %v9858_v28, %v8553_v8  ;;  %v15125_v1 = vpop.f32.mrb[15].mxu1  ;;  %v10393_v28 = vld [vmem:[#allocation3] sm:$0xff] }
 0x3e2   : > { %10377 = vst [vmem:[%s15127_s14] sm:$0xff] %v10358_v0  ;;  %v10414_v42 = vmul.f32 %v10358_v0, %v10358_v0  ;;  %10392 = vst [vmem:[%s15127_s14 + $0x78] sm:$0xff] %v15125_v1  ;;  %v10429_v44 = vmul.f32 %v15125_v1, %v15125_v1 }
 0x3e3   : > { %10378 = vst [vmem:[%s15127_s14 + $0x8] sm:$0xff] %v10359_v11  ;;  %v10394_v22 = vadd.f32 %v10359_v11, %v10358_v0  ;;  %v10415_v43 = vmul.f32 %v10359_v11, %v10359_v11  ;;  %v9998_v56 = vpop.f32.mrb[10].mxu0 }
 0x3e4   : > { %10381 = vst [vmem:[%s15127_s14 + $0x20] sm:$0xff] %v9998_v56  ;;  %v9927_v54 = vpop.f32.mrb[8].mxu1  ;;  %v10000_v2 = vpop.f32.mrb[11].mxu0  ;;  %v10418_v33 = vmul.f32 %v9998_v56, %v9998_v56 }
 0x3e5   : > { %v10430_v25 = vadd.f32 %v10415_v43, %v10414_v42  ;;  %10379 = vst [vmem:[%s15127_s14 + $0x10] sm:$0xff] %v9927_v54  ;;  %v10395_v23 = vadd.f32 %v10394_v22, %v9927_v54  ;;  %v10416_v18 = vmul.f32 %v9927_v54, %v9927_v54  ;;  %10382 = vst [vmem:[%s15127_s14 + $0x28] sm:$0xff] %v10000_v2  ;;  %v9929_v26 = vpop.f32.mrb[9].mxu1  ;;  %v10413_v42 = vld [vmem:[#allocation4] sm:$0xff] }
 0x3e6   : > { %10380 = vst [vmem:[%s15127_s14 + $0x18] sm:$0xff] %v9929_v26  ;;  %v10417_v53 = vmul.f32 %v9929_v26, %v9929_v26  ;;  %v10419_v63 = vmul.f32 %v10000_v2, %v10000_v2 }
 0x3e7   : > { %v10431_v10 = vadd.f32 %v10430_v25, %v10416_v18  ;;  %v10396_v36 = vadd.f32 %v10395_v23, %v9929_v26  ;;  %v10140_v15 = vpop.f32.mrb[12].mxu0 }
 0x3e8   : > { %10385 = vst [vmem:[%s15127_s14 + $0x40] sm:$0xff] %v10140_v15  ;;  %v10069_v12 = vpop.f32.mrb[10].mxu1  ;;  %v10142_v57 = vpop.f32.mrb[13].mxu0  ;;  %v10422_v21 = vmul.f32 %v10140_v15, %v10140_v15 }
 0x3e9   : > { %v10397_v61 = vadd.f32 %v10396_v36, %v9998_v56  ;;  %v10432_v41 = vadd.f32 %v10431_v10, %v10417_v53  ;;  %10383 = vst [vmem:[%s15127_s14 + $0x30] sm:$0xff] %v10069_v12  ;;  %10386 = vst [vmem:[%s15127_s14 + $0x48] sm:$0xff] %v10142_v57  ;;  %v10071_v32 = vpop.f32.mrb[11].mxu1  ;;  %v10420_v4 = vmul.f32 %v10069_v12, %v10069_v12 }
 0x3ea   : > { %10384 = vst [vmem:[%s15127_s14 + $0x38] sm:$0xff] %v10071_v32  ;;  %v10421_v24 = vmul.f32 %v10071_v32, %v10071_v32  ;;  %v10423_v47 = vmul.f32 %v10142_v57, %v10142_v57 }
 0x3eb   : > { %v10433_v7 = vadd.f32 %v10432_v41, %v10418_v33  ;;  %v10398_v46 = vadd.f32 %v10397_v61, %v10000_v2  ;;  %v10282_v49 = vpop.f32.mrb[14].mxu0 }
 0x3ec   : > { %10389 = vst [vmem:[%s15127_s14 + $0x60] sm:$0xff] %v10282_v49  ;;  %v10211_v19 = vpop.f32.mrb[12].mxu1  ;;  %v10284_v35 = vpop.f32.mrb[15].mxu0  ;;  %v10426_v17 = vmul.f32 %v10282_v49, %v10282_v49 }
 0x3ed   : > { %v10399_v38 = vadd.f32 %v10398_v46, %v10069_v12  ;;  %v10434_v3 = vadd.f32 %v10433_v7, %v10419_v63  ;;  %10387 = vst [vmem:[%s15127_s14 + $0x50] sm:$0xff] %v10211_v19  ;;  %10390 = vst [vmem:[%s15127_s14 + $0x68] sm:$0xff] %v10284_v35  ;;  %v10213_v60 = vpop.f32.mrb[13].mxu1  ;;  %v10424_v45 = vmul.f32 %v10211_v19, %v10211_v19 }
 0x3ee   : > { %10388 = vst [vmem:[%s15127_s14 + $0x58] sm:$0xff] %v10213_v60  ;;  %v10425_v31 = vmul.f32 %v10213_v60, %v10213_v60  ;;  %v10427_v5 = vmul.f32 %v10284_v35, %v10284_v35 }
 0x3ef   : > { %v10435_v62 = vadd.f32 %v10434_v3, %v10420_v4  ;;  %v10400_v39 = vadd.f32 %v10399_v38, %v10071_v32 }
 0x3f0   : > { %v10353_v51 = vpop.f32.mrb[16].mxu1 }
 0x3f1   : > { %v10401_v34 = vadd.f32 %v10400_v39, %v10140_v15  ;;  %v10436_v13 = vadd.f32 %v10435_v62, %v10421_v24  ;;  %v10372_v9 = vadd.f32 %v10353_v51, %v9619_v48  ;;  %v11008_v29 = vpop.f32.mrb[17].mxu1 }
 0x3f3   : > { %v10437_v30 = vadd.f32 %v10436_v13, %v10422_v21  ;;  %v10402_v37 = vadd.f32 %v10401_v34, %v10142_v57  ;;  %10391 = vst [vmem:[%s15127_s14 + $0x70] sm:$0xff] %v10372_v9  ;;  %v10428_v50 = vmul.f32 %v10372_v9, %v10372_v9 }
 0x3f5   : > { %v10403_v52 = vadd.f32 %v10402_v37, %v10211_v19  ;;  %v10438_v20 = vadd.f32 %v10437_v30, %v10423_v47 }
 0x3f7   : > { %v10439_v27 = vadd.f32 %v10438_v20, %v10424_v45  ;;  %v10404_v14 = vadd.f32 %v10403_v52, %v10213_v60 }
 0x3f9   : > { %v10405_v58 = vadd.f32 %v10404_v14, %v10282_v49  ;;  %v10440_v16 = vadd.f32 %v10439_v27, %v10425_v31 }
 0x3fb   : > { %v10441_v59 = vadd.f32 %v10440_v16, %v10426_v17  ;;  %v10406_v40 = vadd.f32 %v10405_v58, %v10284_v35 }
 0x3fd   : > { %v10407_v8 = vadd.f32 %v10406_v40, %v10372_v9  ;;  %v10442_v55 = vadd.f32 %v10441_v59, %v10427_v5 }
 0x3ff   : > { %v10408_v6 = vadd.f32 %v10407_v8, %v15125_v1  ;;  %v10443_v0 = vadd.f32 %v10442_v55, %v10428_v50 }
 0x401   : > { %10409 = vadd.xlane.f32.xlu0 %v10408_v6  ;;  %v10444_v48 = vadd.f32 %v10443_v0, %v10429_v44 }
 0x403   : > { %10445 = vadd.xlane.f32.xlu1 %v10444_v48 }
 0x48e   : > { %v10410_v11 = vpop.xlane.xlu0 %10409 }
 0x48f   : > { %v10411_v22 = vadd.f32 %v10410_v11, %v10393_v28 }
 0x490   : > { %v10446_v43 = vpop.xlane.xlu1 %10445 }
 0x491   : > { %10412 = vst.msk [vmem:[#allocation3] sm:$0xff] %vm16497_vm13, %v10411_v22  ;;  %v10447_v56 = vadd.f32 %v10446_v43, %v10413_v42 }
 0x493   : > { %10448 = vst.msk [vmem:[#allocation4] sm:$0xff] %vm16498_vm4, %v10447_v56 }
 0x494 PF: > { %p10983_p11 = scmp.ne.s32.totalorder %s11421_s28, 1 }
 0x495   : > { %v11448_v2 = vmov (!%p10983_p11), 0   ;;  %v10461_v10 = vld [vmem:[%s15242_s4] sm:$0xff] (!%p10983_p11)  ;;  %s16499_s24 = sld [smem:[#allocation67_spill]] (!%p10983_p11)  ;;  %s10993_s9 = sshll.u32 (!%p10983_p11), %s11417_s27, 7 }
 0x496   : > { %10452 = sbr.rel (%p10983_p11) target bundleno = 1341 (0x53d), region = 60  ;;  %11278 = vset.pattern.permute.xlu0 (!%p10983_p11), %v11448_v2  ;;  %s10468_s20 = scalar_lea.vmem (!%p10983_p11), [#allocation2], %s10993_s9 }
 0x497   : > { %v10469_v61 = vld [vmem:[%s10468_s20] sm:$0xff] (!%p10983_p11)  ;;  %v10470_v41 = vld [vmem:[%s10468_s20 + $0x8] sm:$0xff] (!%p10983_p11)  ;;  %v10471_v32 = vld [vmem:[%s10468_s20 + $0x10] sm:$0xff] (!%p10983_p11) }
 0x498   : > { %v10453_v54 = vld [vmem:[#allocation3] sm:$0xff] (!%p10983_p11)  ;;  %v10472_v63 = vld [vmem:[%s10468_s20 + $0x18] sm:$0xff] (!%p10983_p11)  ;;  %v10474_v46 = vld [vmem:[%s10468_s20 + $0x28] sm:$0xff] (!%p10983_p11) }
 0x499   : > { %v10454_v25 = vmul.f32 (!%p10983_p11), 0.00024414063, %v10453_v54  ;;  %v10473_v7 = vld [vmem:[%s10468_s20 + $0x20] sm:$0xff] (!%p10983_p11)  ;;  %v10475_v49 = vld [vmem:[%s10468_s20 + $0x30] sm:$0xff] (!%p10983_p11)  ;;  %v10476_v19 = vld [vmem:[%s10468_s20 + $0x38] sm:$0xff] (!%p10983_p11) }
 0x49a   : > { %v10455_v1 = vld [vmem:[#allocation4] sm:$0xff] (!%p10983_p11)  ;;  %v10477_v35 = vld [vmem:[%s10468_s20 + $0x40] sm:$0xff] (!%p10983_p11)  ;;  %v10479_v3 = vld [vmem:[%s10468_s20 + $0x50] sm:$0xff] (!%p10983_p11) }
 0x49b   : > { %v10456_v23 = vmul.f32 (!%p10983_p11), 0.00024414063, %v10455_v1  ;;  %v10457_v18 = vmul.f32 (!%p10983_p11), %v10454_v25, %v10454_v25  ;;  %v10463_v12 = vld [vmem:[%s16499_s24] sm:$0xff] (!%p10983_p11)  ;;  %v10478_v38 = vld [vmem:[%s10468_s20 + $0x48] sm:$0xff] (!%p10983_p11)  ;;  %v10480_v60 = vld [vmem:[%s10468_s20 + $0x58] sm:$0xff] (!%p10983_p11) }
 0x49c   : > { %v10481_v62 = vld [vmem:[%s10468_s20 + $0x60] sm:$0xff] (!%p10983_p11)  ;;  %v10482_v39 = vld [vmem:[%s10468_s20 + $0x68] sm:$0xff] (!%p10983_p11)  ;;  %v10483_v24 = vld [vmem:[%s10468_s20 + $0x70] sm:$0xff] (!%p10983_p11) }
 0x49d   : > { %v10458_v26 = vsub.f32 %v10456_v23, %v10457_v18  ;;  %v10484_v51 = vld [vmem:[%s10468_s20 + $0x78] sm:$0xff] }
 0x49f   : > { %v10459_v53 = vadd.f32 1e-05, %v10458_v26 }
 0x4a1   : > { %11279 = vrsqrt.f32 %v10459_v53 }
 0x4ab   : > { %v11280_v36 = vpop.eup %11279 }
 0x4ac   : > { %v10462_v15 = vmul.f32 %v11280_v36, %v10461_v10 }
 0x4ae   : > { %10487 = vperm.xlu0 %11278, %v10462_v15   ;;  %v10464_v57 = vmul.f32 %v10462_v15, %v10454_v25 }
 0x4b0   : > { %v10465_v33 = vsub.f32 %v10463_v12, %v10464_v57 }
 0x4b2   : > { %10508 = vperm.xlu0 %11278, %v10465_v33  }
 0x52d   : > { %v10488_v4 = vpop.permute.xlu0 %10487 }
 0x52e   : > { %v10490_v21 = vmul.f32 %v10488_v4, %v10469_v61  ;;  %v10491_v34 = vmul.f32 %v10488_v4, %v10470_v41  ;;  %v10492_v13 = vmul.f32 %v10488_v4, %v10471_v32  ;;  %v10493_v9 = vmul.f32 %v10488_v4, %v10472_v63 }
 0x52f   : > { %v10494_v29 = vmul.f32 %v10488_v4, %v10473_v7  ;;  %v10495_v47 = vmul.f32 %v10488_v4, %v10474_v46  ;;  %v10496_v30 = vmul.f32 %v10488_v4, %v10475_v49  ;;  %v10497_v37 = vmul.f32 %v10488_v4, %v10476_v19 }
 0x530   : > { %v10498_v52 = vmul.f32 %v10488_v4, %v10477_v35  ;;  %v10499_v45 = vmul.f32 %v10488_v4, %v10478_v38  ;;  %v10500_v20 = vmul.f32 %v10488_v4, %v10479_v3  ;;  %v10501_v27 = vmul.f32 %v10488_v4, %v10480_v60 }
 0x531   : > { %v10502_v14 = vmul.f32 %v10488_v4, %v10481_v62  ;;  %v10503_v31 = vmul.f32 %v10488_v4, %v10482_v39  ;;  %v10504_v17 = vmul.f32 %v10488_v4, %v10483_v24  ;;  %v10505_v58 = vmul.f32 %v10488_v4, %v10484_v51  ;;  %v10509_v16 = vpop.permute.xlu0 %10508 }
 0x532   : > { %v10511_v5 = vadd.f32 %v10509_v16, %v10490_v21  ;;  %v10512_v59 = vadd.f32 %v10509_v16, %v10491_v34  ;;  %v10513_v40 = vadd.f32 %v10509_v16, %v10492_v13  ;;  %v10514_v8 = vadd.f32 %v10509_v16, %v10493_v9 }
 0x533   : > { %v10515_v50 = vadd.f32 %v10509_v16, %v10494_v29  ;;  %v10516_v55 = vadd.f32 %v10509_v16, %v10495_v47  ;;  %v10517_v44 = vadd.f32 %v10509_v16, %v10496_v30  ;;  %v10518_v6 = vadd.f32 %v10509_v16, %v10497_v37 }
 0x534   : > { %v10519_v0 = vadd.f32 %v10509_v16, %v10498_v52  ;;  %v10520_v48 = vadd.f32 %v10509_v16, %v10499_v45  ;;  %v10521_v28 = vadd.f32 %v10509_v16, %v10500_v20  ;;  %v10522_v11 = vadd.f32 %v10509_v16, %v10501_v27  ;;  %10527 = vst [vmem:[%s11651_s18] sm:$0xff] %v10511_v5 }
 0x535   : > { %10528 = vst [vmem:[%s11651_s18 + $0x8] sm:$0xff] %v10512_v59  ;;  %10529 = vst [vmem:[%s11651_s18 + $0x10] sm:$0xff] %v10513_v40  ;;  %v10523_v42 = vadd.f32 %v10509_v16, %v10502_v14  ;;  %v10524_v22 = vadd.f32 %v10509_v16, %v10503_v31  ;;  %v10525_v43 = vadd.f32 %v10509_v16, %v10504_v17 }
 0x536   : > { %10530 = vst [vmem:[%s11651_s18 + $0x18] sm:$0xff] %v10514_v8  ;;  %v10526_v56 = vadd.f32 %v10509_v16, %v10505_v58  ;;  %10531 = vst [vmem:[%s11651_s18 + $0x20] sm:$0xff] %v10515_v50 }
 0x537   : > { %10532 = vst [vmem:[%s11651_s18 + $0x28] sm:$0xff] %v10516_v55  ;;  %10533 = vst [vmem:[%s11651_s18 + $0x30] sm:$0xff] %v10517_v44 }
 0x538   : > { %10534 = vst [vmem:[%s11651_s18 + $0x38] sm:$0xff] %v10518_v6  ;;  %10535 = vst [vmem:[%s11651_s18 + $0x40] sm:$0xff] %v10519_v0 }
 0x539   : > { %10536 = vst [vmem:[%s11651_s18 + $0x48] sm:$0xff] %v10520_v48  ;;  %10537 = vst [vmem:[%s11651_s18 + $0x50] sm:$0xff] %v10521_v28 }
 0x53a   : > { %10538 = vst [vmem:[%s11651_s18 + $0x58] sm:$0xff] %v10522_v11  ;;  %10539 = vst [vmem:[%s11651_s18 + $0x60] sm:$0xff] %v10523_v42 }
 0x53b   : > { %10540 = vst [vmem:[%s11651_s18 + $0x68] sm:$0xff] %v10524_v22  ;;  %10541 = vst [vmem:[%s11651_s18 + $0x70] sm:$0xff] %v10525_v43 }
 0x53c   : > { %10542 = vst [vmem:[%s11651_s18 + $0x78] sm:$0xff] %v10526_v56 }
 0x53d PF: > { %s10551_s12 = smul.u32 %s11417_s27, %s11421_s28  ;;  %s10559_s17 = sshll.u32 %s11651_s18, 4  ;;  %s15178_s17 = int_to_ptr.vmem [resolvable:$true] %s10559_s17 }
 0x53e   : > { %s16500_s15 = sld [smem:[#allocation68_spill]]  ;;  %s10544_s24 = scalar_lea.sflag [#allocation7], %s285_s11 }
 0x53f   : > { %s10994_s14 = sshll.u32 %s10551_s12, 11  ;;  %s11311_s9 = scalar_lea.vmem %s15178_s17, 2048 }
 0x540   : > { %p11312_p1 = scmp.ne.s32.totalorder %s15178_s17, %s11311_s9  ;;  %p16501_p8 = scmp.ne.s32.totalorder %s15525_s30, 0 }
 0x541   : > { %s11449_s20 = smov [#allocation8]  }
 0x542   : > { %p11313_p10 = pnand %p11312_p1, %p16501_p8  ;;  %s11315_s27 = sshll.u32 %s11449_s20, 4  ;;  %s11316_s27 = int_to_ptr.vmem [resolvable:$false] %s11315_s27 }
 0x543   : > { %s11317_s28 = scalar_lea.vmem %s11316_s27, 4096  ;;  %p11318_p13 = scmp.lt.s32.totalorder %s15178_s17, %s11316_s27 }
 0x544   : > { %s10557_s8 = scalar_lea.hbm %s16500_s15, %s10994_s14  ;;  %p11314_p5 = pneg %p11313_p10 }
 0x545   : > { %p11319_p0 = scmp.lt.s32.totalorder %s11317_s28, %s11311_s9 }
 0x547   : > { %p11320_p4 = por %p11319_p0, %p11318_p13 }
 0x549   : > { %p11321_p6 = pnand %p11320_p4, %p11314_p5 }
 0x54b   : > { %11324 = shalt.err (!%p11321_p6)
}
 0x54c   : > { %s11325_s18 = scalar_lea.hbm %s10557_s8, 2048  ;;  %s11329_s14 = scalar_lea.hbm %s16500_s15, 4096 }
 0x54d   : > { %p11326_p9 = scmp.ne.s32.totalorder %s10557_s8, %s11325_s18  ;;  %p11330_p3 = scmp.lt.u32.totalorder %s10557_s8, %s16500_s15 }
 0x54e   : > { %p11331_p7 = scmp.lt.u32.totalorder %s11329_s14, %s11325_s18  ;;  %p11333_p1 = scmp.lt.u32.totalorder %s11325_s18, %s10557_s8 }
 0x54f   : > { %p11327_p12 = pnand %p11326_p9, %p16501_p8 }
 0x550   : > { %p11332_p11 = por %p11331_p7, %p11330_p3 }
 0x551   : > { %p11328_p2 = pneg %p11327_p12 }
 0x552   : > { %p11334_p10 = por %p11333_p1, %p11332_p11 }
 0x554   : > { %p11335_p5 = pnand %p11334_p10, %p11328_p2 }
 0x556   : > { %11338 = shalt.err (!%p11335_p5)
}
 0x557   : > { %11165 = dma.vmem_to_hbm [thread:$0]  (%p16501_p8), %s15178_s17, 2048, %s10557_s8, %s10544_s24  }
 0x558 PF: > { %p11176_p13 = scmp.ge.s32.totalorder %s11433_s7, 2  ;;  %s10571_s9 = sand.u32 1, %s11393_s21  }
 0x559   : > { %p16502_p0 = scmp.ne.s32.totalorder %s15527_s19, 0  ;;  %s10572_s20 = scalar_lea.sflag [#allocation7], %s10571_s9 }
 0x55b   : > { %p11172_p4 = pnand %p11176_p13, %p16502_p0 }
 0x55d   : > { %11388 = dma.done.wait (!%p11172_p4), %s10572_s20, 2048  }
 0x55e   : > { %11390 = vsyncadd (!%p11172_p4), %s10572_s20, 4294965248  ;;  %s22_s7 = sadd.s32 1, %s11433_s7   ;;  %s16503_s28 = sld [smem:[#allocation11_spill]] }
 0x55f   : > { %p19_p6 = scmp.ge.s32.totalorder %s22_s7, 6   ;;  %s16504_s30 = sld [smem:[#allocation12_spill]] }
 0x560   : > { %s16505_s21 = smov %s11397_s22  ;;  %s16506_s22 = smov %s11401_s23 }
 0x561   : > { %s16507_s23 = smov %s11575_s6  ;;  %s16508_s24 = smov %s11409_s25 }
 0x562   : > { %s16509_s25 = smov %s11413_s26  ;;  %s16510_s26 = smov %s11578_s5 }
 0x563   : > { %s16511_s27 = smov %s11425_s29  ;;  %s16512_s29 = smov %s16514_s10 }
 0x564   :  { %21 = sbr.rel (!%p19_p6) target bundleno = 12 (0xc), region = 113 }
 0x56b   :  { %10577 = vsyncpa [#allocation6], 1 }
 0x56c   :  { %10579 = vsyncpa [#allocation6 + $0x1], 1 }
 0x56d   :  { %10580 = vsyncpa [#allocation7], 1 }
 0x56e   :  { %10582 = vsyncpa [#allocation7 + $0x1], 1 }

</bundles_post_ra>
